<compile_context>
chip_gen: v7x
topology: tpu7x:2x2x1
jax: 0.10.0
libtpu: 0.0.40
codegen_flags: <defaults>
</compile_context>

<pallas_src>
import jax
import jax.numpy as jnp
from jax.experimental import pallas as pl
from jax.experimental.pallas import tpu as pltpu


# ----------------------------------------------------------------------------
# Fused kernel: bilinear 2x upsample + 3x3 conv (pad=1, no bias) + PixelShuffle
# ----------------------------------------------------------------------------
def _upsampler_kernel(x_ref, wv_ref, o_ref, xw_ref, upe_ref, upo_ref):
    # x_ref : (1, Cin, H+2, Wp)  input repeated x4 along W, edge padded (1 row / 4 lanes)
    # wv_ref: (NW, WL)           per-lane conv weights, WL = 4W, NW = (Cout/2)*Cin*9
    # o_ref : (1, C4, TP, 4*WL)  pixel-shuffled output slab for this row tile
    # xw_ref: (Cin, TP+2, Wp)    scratch: W-direction upsampled rows (lane-doubled)
    # upe/upo: (Cin, TP+1, Wp)   scratch: fully upsampled rows, even/odd 2H-row parity
    f32 = jnp.float32
    cin = x_ref.shape[1]
    h = x_ref.shape[2] - 2
    wp = x_ref.shape[3]
    c4 = o_ref.shape[1]
    tp = o_ref.shape[2]
    wl = o_ref.shape[3] // 4

    t = pl.program_id(1)
    p0 = t * tp
    if tp % 8 == 0:
        p0 = pl.multiple_of(p0, 8)

    # ---- per-lane coefficient / mask vectors (built once per grid step) ----
    lane = jax.lax.broadcasted_iota(jnp.int32, (1, 1, wp), 2)
    phase = lane % 4
    mask_w = jnp.logical_and(lane >= 4, lane < 4 + wl).astype(f32)  # conv zero-pad along W
    a0 = jnp.where(phase < 2, 0.25, 0.0).astype(f32)    # lanes blending x[j-1]
    a2 = jnp.where(phase >= 2, 0.25, 0.0).astype(f32)   # lanes blending x[j+1]

    # ---- W-direction bilinear blend (whole row window, block-wise) ---------
    win = x_ref[0, :, pl.ds(p0, tp + 2), :]              # (Cin, TP+2, Wp)
    left = jnp.concatenate([win[:, :, :4], win[:, :, :-4]], axis=-1)    # value at lane l-4
    right = jnp.concatenate([win[:, :, 4:], win[:, :, -4:]], axis=-1)   # value at lane l+4
    xw_ref[...] = a0 * left + 0.75 * win + a2 * right

    # ---- H-direction bilinear blend, split by upsampled-row parity ---------
    xw_lo = xw_ref[:, 0:tp + 1, :]     # input row p0+k-1 (edge-padded)
    xw_hi = xw_ref[:, 1:tp + 2, :]     # input row p0+k   (edge-padded)
    rowk = jax.lax.broadcasted_iota(jnp.int32, (1, tp + 1, 1), 1)
    mask_e = (rowk + p0 < h).astype(f32)    # upsampled row 2*(p0+k)   in range
    mask_o = (rowk + p0 >= 1).astype(f32)   # upsampled row 2*(p0+k)-1 in range
    upe_ref[...] = (0.25 * xw_lo + 0.75 * xw_hi) * (mask_e * mask_w)
    upo_ref[...] = (0.75 * xw_lo + 0.25 * xw_hi) * (mask_o * mask_w)

    # ---- 3x3 conv + PixelShuffle(2): pure VPU FMAs on (TP, 4W) blocks ------
    cin9 = cin * 9
    for c in range(c4):
        segs = []
        for sig in range(2):            # conv-row parity        (output-row bit 1)
            for r1 in range(2):         # pixel-shuffle row phase (output-row bit 0)
                acc = jnp.zeros((tp, wl), dtype=f32)
                wbase = (2 * c + r1) * cin9
                for ci in range(cin):
                    for kh in range(3):
                        if (sig + kh - 1) % 2 == 0:
                            src = upe_ref
                            k0 = (sig + kh - 1) // 2
                        else:
                            src = upo_ref
                            k0 = (sig + kh) // 2
                        for kw in range(3):
                            row = wbase + ci * 9 + kh * 3 + kw
                            wv = wv_ref[row:row + 1, :]                    # (1, WL)
                            data = src[ci, k0:k0 + tp, 2 + 2 * kw:2 + 2 * kw + wl]
                            acc = acc + wv * data
                segs.append(acc)
        o_ref[0, c, :, :] = jnp.concatenate(segs, axis=-1).astype(o_ref.dtype)


# ----------------------------------------------------------------------------
# Wrapper
# ----------------------------------------------------------------------------
def _pick_row_tile(h, w, row_tile):
    if row_tile is not None:
        tp = int(row_tile)
        if h % tp != 0 or not (tp % 8 == 0 or tp == h):
            raise ValueError("row_tile must divide H and be a multiple of 8 (or == H)")
        return tp
    # Keep the per-segment f32 accumulator (TP x 4W) around <= ~64 KiB.
    cap = max(8, min(32, (64 * 1024) // max(1, 16 * w)))
    best = None
    for d in range(1, h + 1):
        if h % d == 0 and d <= cap and d % 8 == 0:
            best = d
    return best if best is not None else h


def upsampler_forward(x, conv_weight, *, row_tile=None):
    # x:           (N, Cin, H, W)  NCHW (PyTorch convention)
    # conv_weight: (Cout, Cin, 3, 3), Cout % 4 == 0
    n, cin, h, w = x.shape
    cout = conv_weight.shape[0]
    assert conv_weight.shape == (cout, cin, 3, 3)
    assert cout % 4 == 0, "PixelShuffle(2) requires Cout % 4 == 0"
    c4 = cout // 4
    wl = 4 * w
    wp = wl + 8
    nw = (cout // 2) * cin * 9

    tp = _pick_row_tile(h, w, row_tile)
    nt = h // tp

    # --- small-input prep (cheap XLA on the pre-upsample tensor) ------------
    x4 = jnp.repeat(x, 4, axis=-1)                               # (N, Cin, H, 4W)
    x4p = jnp.pad(x4, ((0, 0), (0, 0), (1, 1), (4, 4)), mode="edge")

    # Per-lane conv weights: lane parity selects the even/odd conv output
    # channel of each PixelShuffle column pair.
    w_pairs = conv_weight.astype(jnp.float32).reshape(cout // 2, 2, cin, 3, 3)
    lane_parity = jnp.arange(wl) % 2
    wvec = jnp.transpose(w_pairs, (0, 2, 3, 4, 1))[..., lane_parity]   # (Cout/2,Cin,3,3,4W)
    wvec = wvec.reshape(nw, wl)

    # --- VMEM budget (double-buffered blocks + scratch) ---------------------
    in_block = cin * (h + 2) * wp * 4
    out_block = c4 * tp * 4 * wl * 4
    wv_block = nw * wl * 4
    scratch = (cin * (tp + 2) + 2 * cin * (tp + 1)) * wp * 4
    est = 2 * (in_block + out_block + wv_block) + scratch
    vmem_limit = int(min(max(2 * est, 16 * 2**20), 64 * 2**20))

    y = pl.pallas_call(
        _upsampler_kernel,
        out_shape=jax.ShapeDtypeStruct((n, c4, h, 4 * wl), x.dtype),
        grid_spec=pltpu.PrefetchScalarGridSpec(
            num_scalar_prefetch=0,
            grid=(n, nt),
            in_specs=[
                pl.BlockSpec((1, cin, h + 2, wp), lambda b, t: (b, 0, 0, 0)),
                pl.BlockSpec((nw, wl), lambda b, t: (0, 0)),
            ],
            out_specs=pl.BlockSpec((1, c4, tp, 4 * wl), lambda b, t: (b, 0, t, 0)),
            scratch_shapes=[
                pltpu.VMEM((cin, tp + 2, wp), jnp.float32),
                pltpu.VMEM((cin, tp + 1, wp), jnp.float32),
                pltpu.VMEM((cin, tp + 1, wp), jnp.float32),
            ],
        ),
        compiler_params=pltpu.CompilerParams(
            dimension_semantics=("parallel", "parallel"),
            vmem_limit_bytes=vmem_limit,
        ),
    )(x4p, wvec)

    # HBM layout of y is already the pixel-shuffled layout: this reshape is free.
    return y.reshape(n, c4, 4 * h, 4 * w)


# ----------------------------------------------------------------------------
# Pure-JAX reference (PyTorch semantics) for verification
# ----------------------------------------------------------------------------
def _bilinear_up2x_ref(x):
    _, _, h, w = x.shape

    def idx(length):
        i = jnp.arange(2 * length, dtype=jnp.float32)
        src = jnp.maximum((i + 0.5) / 2.0 - 0.5, 0.0)
        i0 = jnp.floor(src).astype(jnp.int32)
        i1 = jnp.minimum(i0 + 1, length - 1)
        return i0, i1, src - i0.astype(jnp.float32)

    h0, h1, fh = idx(h)
    w0, w1, fw = idx(w)
    xr = (x[:, :, h0, :] * (1.0 - fh)[None, None, :, None]
          + x[:, :, h1, :] * fh[None, None, :, None])
    return (xr[:, :, :, w0] * (1.0 - fw)[None, None, None, :]
            + xr[:, :, :, w1] * fw[None, None, None, :])


def _upsampler_reference(x, wgt):
    up = _bilinear_up2x_ref(x)
    y = jax.lax.conv_general_dilated(
        up, wgt, window_strides=(1, 1), padding=((1, 1), (1, 1)),
        dimension_numbers=("NCHW", "OIHW", "NCHW"),
        precision=jax.lax.Precision.HIGHEST)
    n, c4x4, h2, w2 = y.shape
    c = c4x4 // 4
    y = y.reshape(n, c, 2, 2, h2, w2)
    y = jnp.transpose(y, (0, 1, 4, 2, 5, 3))
    return y.reshape(n, c, 2 * h2, 2 * w2)


if __name__ == "__main__":
    N, Cin, H, W = 2, 4, 16, 16
    Cout = 8

    key = jax.random.PRNGKey(0)
    kx, kw = jax.random.split(key)
    x = jax.random.normal(kx, (N, Cin, H, W), dtype=jnp.float32)
    conv_weight = 0.1 * jax.random.normal(kw, (Cout, Cin, 3, 3), dtype=jnp.float32)

    fwd = jax.jit(lambda a, b: upsampler_forward(a, b, row_tile=8))
    out = fwd(x, conv_weight)
    jax.block_until_ready(out)
    assert out.shape == (N, Cout // 4, 4 * H, 4 * W), out.shape

    ref = jax.jit(_upsampler_reference)(x, conv_weight)
    err = float(jnp.max(jnp.abs(out - ref)))
    assert err < 1e-3, f"max abs err vs reference: {err}"

    print("KERNEL_OK")
</pallas_src>

<mosaic_0001>
module attributes {stable_mosaic.version = 11 : i64} {
  func.func @_upsampler_kernel(%arg0: i32, %arg1: i32, %arg2: memref<1x4x18x72xf32, #tpu.memory_space<vmem>>, %arg3: memref<144x64xf32, #tpu.memory_space<vmem>>, %arg4: memref<1x2x8x256xf32, #tpu.memory_space<vmem>>, %arg5: memref<4x10x72xf32, #tpu.memory_space<vmem>>, %arg6: memref<4x9x72xf32, #tpu.memory_space<vmem>>, %arg7: memref<4x9x72xf32, #tpu.memory_space<vmem>>) attributes {dimension_semantics = [#tpu.dimension_semantics<parallel>, #tpu.dimension_semantics<parallel>], iteration_bounds = array<i64: 2, 2>, scalar_prefetch = 0 : i64, scratch_operands = 3 : i64, tpu.core_type = #tpu.core_type<tc>, window_params = [{transform_indices = @transform_0, window_bounds = array<i64: 1, 4, 18, 72>}, {pipeline_mode = #tpu.pipeline_mode<synchronous>, transform_indices = @transform_1, window_bounds = array<i64: 144, 64>}, {transform_indices = @transform_2, window_bounds = array<i64: 1, 2, 8, 256>}]} {
    %c8_i32 = arith.constant 8 : i32
    %0 = arith.muli %arg1, %c8_i32 : i32
    %1 = tpu.assume_multiple %0, 8 : i32
    %2 = tpu.iota {dimensions = array<i32: 2>} : vector<1x1x72xi32>
    %c4_i32 = arith.constant 4 : i32
    %c0_i32 = arith.constant 0 : i32
    %3 = arith.cmpi eq, %c4_i32, %c0_i32 : i32
    %c1_i32 = arith.constant 1 : i32
    %4 = arith.select %3, %c1_i32, %c4_i32 : i32
    %5 = vector.broadcast %4 : i32 to vector<1x1x72xi32>
    %6 = arith.remsi %2, %5 : vector<1x1x72xi32>
    %c0_i32_0 = arith.constant 0 : i32
    %7 = vector.broadcast %c0_i32_0 : i32 to vector<1x1x72xi32>
    %8 = arith.cmpi ne, %6, %7 : vector<1x1x72xi32>
    %c0_i32_1 = arith.constant 0 : i32
    %9 = vector.broadcast %c0_i32_1 : i32 to vector<1x1x72xi32>
    %10 = arith.cmpi slt, %6, %9 : vector<1x1x72xi32>
    %c0_i32_2 = arith.constant 0 : i32
    %11 = arith.cmpi slt, %4, %c0_i32_2 : i32
    %12 = vector.broadcast %11 : i1 to vector<1x1x72xi1>
    %13 = vector.broadcast %12 : vector<1x1x72xi1> to vector<1x1x72xi1>
    %14 = arith.xori %10, %13 : vector<1x1x72xi1>
    %15 = arith.andi %14, %8 : vector<1x1x72xi1>
    %16 = vector.broadcast %4 : i32 to vector<1x1x72xi32>
    %17 = arith.addi %6, %16 : vector<1x1x72xi32>
    %18 = arith.select %15, %17, %6 : vector<1x1x72xi1>, vector<1x1x72xi32>
    %c4_i32_3 = arith.constant 4 : i32
    %19 = vector.broadcast %c4_i32_3 : i32 to vector<1x1x72xi32>
    %20 = arith.cmpi sge, %2, %19 : vector<1x1x72xi32>
    %c68_i32 = arith.constant 68 : i32
    %21 = vector.broadcast %c68_i32 : i32 to vector<1x1x72xi32>
    %22 = arith.cmpi slt, %2, %21 : vector<1x1x72xi32>
    %23 = arith.andi %20, %22 : vector<1x1x72xi1>
    %24 = arith.extui %23 : vector<1x1x72xi1> to vector<1x1x72xi32>
    %25 = arith.sitofp %24 : vector<1x1x72xi32> to vector<1x1x72xf32>
    %c2_i32 = arith.constant 2 : i32
    %26 = vector.broadcast %c2_i32 : i32 to vector<1x1x72xi32>
    %27 = arith.cmpi slt, %18, %26 : vector<1x1x72xi32>
    %cst = arith.constant 2.500000e-01 : f32
    %cst_4 = arith.constant 0.000000e+00 : f32
    %28 = vector.broadcast %cst : f32 to vector<1x1x72xf32>
    %29 = vector.broadcast %cst_4 : f32 to vector<1x1x72xf32>
    %30 = arith.select %27, %28, %29 : vector<1x1x72xi1>, vector<1x1x72xf32>
    %c2_i32_5 = arith.constant 2 : i32
    %31 = vector.broadcast %c2_i32_5 : i32 to vector<1x1x72xi32>
    %32 = arith.cmpi sge, %18, %31 : vector<1x1x72xi32>
    %cst_6 = arith.constant 2.500000e-01 : f32
    %cst_7 = arith.constant 0.000000e+00 : f32
    %33 = vector.broadcast %cst_6 : f32 to vector<1x1x72xf32>
    %34 = vector.broadcast %cst_7 : f32 to vector<1x1x72xf32>
    %35 = arith.select %32, %33, %34 : vector<1x1x72xi1>, vector<1x1x72xf32>
    %c0 = arith.constant 0 : index
    %c0_8 = arith.constant 0 : index
    %36 = arith.index_cast %1 : i32 to index
    %c0_9 = arith.constant 0 : index
    %37 = vector.load %arg2[%c0, %c0_8, %36, %c0_9] : memref<1x4x18x72xf32, #tpu.memory_space<vmem>>, vector<1x4x10x72xf32>
    %38 = vector.shape_cast %37 : vector<1x4x10x72xf32> to vector<4x10x72xf32>
    %39 = vector.extract_strided_slice %38 {offsets = [0, 0, 0], sizes = [4, 10, 4], strides = [1, 1, 1]} : vector<4x10x72xf32> to vector<4x10x4xf32>
    %40 = vector.extract_strided_slice %38 {offsets = [0, 0, 0], sizes = [4, 10, 68], strides = [1, 1, 1]} : vector<4x10x72xf32> to vector<4x10x68xf32>
    %41 = tpu.concatenate %39, %40 in 2 : vector<4x10x4xf32>, vector<4x10x68xf32> -> vector<4x10x72xf32>
    %42 = vector.extract_strided_slice %38 {offsets = [0, 0, 4], sizes = [4, 10, 68], strides = [1, 1, 1]} : vector<4x10x72xf32> to vector<4x10x68xf32>
    %43 = vector.extract_strided_slice %38 {offsets = [0, 0, 68], sizes = [4, 10, 4], strides = [1, 1, 1]} : vector<4x10x72xf32> to vector<4x10x4xf32>
    %44 = tpu.concatenate %42, %43 in 2 : vector<4x10x68xf32>, vector<4x10x4xf32> -> vector<4x10x72xf32>
    %45 = vector.broadcast %30 : vector<1x1x72xf32> to vector<4x10x72xf32>
    %46 = arith.mulf %45, %41 : vector<4x10x72xf32>
    %cst_10 = arith.constant 7.500000e-01 : f32
    %47 = vector.broadcast %cst_10 : f32 to vector<4x10x72xf32>
    %48 = arith.mulf %47, %38 : vector<4x10x72xf32>
    %49 = arith.addf %46, %48 : vector<4x10x72xf32>
    %50 = vector.broadcast %35 : vector<1x1x72xf32> to vector<4x10x72xf32>
    %51 = arith.mulf %50, %44 : vector<4x10x72xf32>
    %52 = arith.addf %49, %51 : vector<4x10x72xf32>
    %c0_11 = arith.constant 0 : index
    %c0_12 = arith.constant 0 : index
    %c0_13 = arith.constant 0 : index
    %53 = vector.load %arg5[%c0_11, %c0_12, %c0_13] : memref<4x10x72xf32, #tpu.memory_space<vmem>>, vector<4x10x72xf32>
    tpu.vector_store %arg5[%c0_11, %c0_12, %c0_13], %52 {strides = array<i32>} : memref<4x10x72xf32, #tpu.memory_space<vmem>>, vector<4x10x72xf32>,
    %c0_14 = arith.constant 0 : index
    %c0_15 = arith.constant 0 : index
    %c0_16 = arith.constant 0 : index
    %54 = vector.load %arg5[%c0_14, %c0_15, %c0_16] : memref<4x10x72xf32, #tpu.memory_space<vmem>>, vector<4x9x72xf32>
    %c0_17 = arith.constant 0 : index
    %c1 = arith.constant 1 : index
    %c0_18 = arith.constant 0 : index
    %55 = vector.load %arg5[%c0_17, %c1, %c0_18] : memref<4x10x72xf32, #tpu.memory_space<vmem>>, vector<4x9x72xf32>
    %56 = tpu.iota {dimensions = array<i32: 1>} : vector<1x9x1xi32>
    %57 = vector.broadcast %1 : i32 to vector<1x9x1xi32>
    %58 = arith.addi %56, %57 : vector<1x9x1xi32>
    %c16_i32 = arith.constant 16 : i32
    %59 = vector.broadcast %c16_i32 : i32 to vector<1x9x1xi32>
    %60 = arith.cmpi slt, %58, %59 : vector<1x9x1xi32>
    %61 = arith.extui %60 : vector<1x9x1xi1> to vector<1x9x1xi32>
    %62 = arith.sitofp %61 : vector<1x9x1xi32> to vector<1x9x1xf32>
    %63 = vector.broadcast %1 : i32 to vector<1x9x1xi32>
    %64 = arith.addi %56, %63 : vector<1x9x1xi32>
    %c1_i32_19 = arith.constant 1 : i32
    %65 = vector.broadcast %c1_i32_19 : i32 to vector<1x9x1xi32>
    %66 = arith.cmpi sge, %64, %65 : vector<1x9x1xi32>
    %67 = arith.extui %66 : vector<1x9x1xi1> to vector<1x9x1xi32>
    %68 = arith.sitofp %67 : vector<1x9x1xi32> to vector<1x9x1xf32>
    %cst_20 = arith.constant 2.500000e-01 : f32
    %69 = vector.broadcast %cst_20 : f32 to vector<4x9x72xf32>
    %70 = arith.mulf %69, %54 : vector<4x9x72xf32>
    %cst_21 = arith.constant 7.500000e-01 : f32
    %71 = vector.broadcast %cst_21 : f32 to vector<4x9x72xf32>
    %72 = arith.mulf %71, %55 : vector<4x9x72xf32>
    %73 = arith.addf %70, %72 : vector<4x9x72xf32>
    %74 = vector.broadcast %62 : vector<1x9x1xf32> to vector<1x9x72xf32>
    %75 = vector.broadcast %25 : vector<1x1x72xf32> to vector<1x9x72xf32>
    %76 = arith.mulf %74, %75 : vector<1x9x72xf32>
    %77 = vector.broadcast %76 : vector<1x9x72xf32> to vector<4x9x72xf32>
    %78 = arith.mulf %73, %77 : vector<4x9x72xf32>
    %c0_22 = arith.constant 0 : index
    %c0_23 = arith.constant 0 : index
    %c0_24 = arith.constant 0 : index
    %79 = vector.load %arg6[%c0_22, %c0_23, %c0_24] : memref<4x9x72xf32, #tpu.memory_space<vmem>>, vector<4x9x72xf32>
    tpu.vector_store %arg6[%c0_22, %c0_23, %c0_24], %78 {strides = array<i32>} : memref<4x9x72xf32, #tpu.memory_space<vmem>>, vector<4x9x72xf32>,
    %cst_25 = arith.constant 7.500000e-01 : f32
    %80 = vector.broadcast %cst_25 : f32 to vector<4x9x72xf32>
    %81 = arith.mulf %80, %54 : vector<4x9x72xf32>
    %cst_26 = arith.constant 2.500000e-01 : f32
    %82 = vector.broadcast %cst_26 : f32 to vector<4x9x72xf32>
    %83 = arith.mulf %82, %55 : vector<4x9x72xf32>
    %84 = arith.addf %81, %83 : vector<4x9x72xf32>
    %85 = vector.broadcast %68 : vector<1x9x1xf32> to vector<1x9x72xf32>
    %86 = vector.broadcast %25 : vector<1x1x72xf32> to vector<1x9x72xf32>
    %87 = arith.mulf %85, %86 : vector<1x9x72xf32>
    %88 = vector.broadcast %87 : vector<1x9x72xf32> to vector<4x9x72xf32>
    %89 = arith.mulf %84, %88 : vector<4x9x72xf32>
    %c0_27 = arith.constant 0 : index
    %c0_28 = arith.constant 0 : index
    %c0_29 = arith.constant 0 : index
    %90 = vector.load %arg7[%c0_27, %c0_28, %c0_29] : memref<4x9x72xf32, #tpu.memory_space<vmem>>, vector<4x9x72xf32>
    tpu.vector_store %arg7[%c0_27, %c0_28, %c0_29], %89 {strides = array<i32>} : memref<4x9x72xf32, #tpu.memory_space<vmem>>, vector<4x9x72xf32>,
    %cst_30 = arith.constant 0.000000e+00 : f32
    %91 = vector.broadcast %cst_30 : f32 to vector<8x64xf32>
    %c0_31 = arith.constant 0 : index
    %c0_32 = arith.constant 0 : index
    %92 = vector.load %arg3[%c0_31, %c0_32] : memref<144x64xf32, #tpu.memory_space<vmem>>, vector<1x64xf32>
    %c0_33 = arith.constant 0 : index
    %c0_34 = arith.constant 0 : index
    %c2 = arith.constant 2 : index
    %93 = vector.load %arg7[%c0_33, %c0_34, %c2] : memref<4x9x72xf32, #tpu.memory_space<vmem>>, vector<1x8x64xf32>
    %94 = vector.shape_cast %93 : vector<1x8x64xf32> to vector<8x64xf32>
    %95 = vector.broadcast %92 : vector<1x64xf32> to vector<8x64xf32>
    %96 = arith.mulf %95, %94 : vector<8x64xf32>
    %97 = arith.addf %91, %96 : vector<8x64xf32>
    %c1_35 = arith.constant 1 : index
    %c0_36 = arith.constant 0 : index
    %98 = vector.load %arg3[%c1_35, %c0_36] : memref<144x64xf32, #tpu.memory_space<vmem>>, vector<1x64xf32>
    %c0_37 = arith.constant 0 : index
    %c0_38 = arith.constant 0 : index
    %c4 = arith.constant 4 : index
    %99 = vector.load %arg7[%c0_37, %c0_38, %c4] : memref<4x9x72xf32, #tpu.memory_space<vmem>>, vector<1x8x64xf32>
    %100 = vector.shape_cast %99 : vector<1x8x64xf32> to vector<8x64xf32>
    %101 = vector.broadcast %98 : vector<1x64xf32> to vector<8x64xf32>
    %102 = arith.mulf %101, %100 : vector<8x64xf32>
    %103 = arith.addf %97, %102 : vector<8x64xf32>
    %c2_39 = arith.constant 2 : index
    %c0_40 = arith.constant 0 : index
    %104 = vector.load %arg3[%c2_39, %c0_40] : memref<144x64xf32, #tpu.memory_space<vmem>>, vector<1x64xf32>
    %c0_41 = arith.constant 0 : index
    %c0_42 = arith.constant 0 : index
    %c6 = arith.constant 6 : index
    %105 = vector.load %arg7[%c0_41, %c0_42, %c6] : memref<4x9x72xf32, #tpu.memory_space<vmem>>, vector<1x8x64xf32>
    %106 = vector.shape_cast %105 : vector<1x8x64xf32> to vector<8x64xf32>
    %107 = vector.broadcast %104 : vector<1x64xf32> to vector<8x64xf32>
    %108 = arith.mulf %107, %106 : vector<8x64xf32>
    %109 = arith.addf %103, %108 : vector<8x64xf32>
    %c3 = arith.constant 3 : index
    %c0_43 = arith.constant 0 : index
    %110 = vector.load %arg3[%c3, %c0_43] : memref<144x64xf32, #tpu.memory_space<vmem>>, vector<1x64xf32>
    %c0_44 = arith.constant 0 : index
    %c0_45 = arith.constant 0 : index
    %c2_46 = arith.constant 2 : index
    %111 = vector.load %arg6[%c0_44, %c0_45, %c2_46] : memref<4x9x72xf32, #tpu.memory_space<vmem>>, vector<1x8x64xf32>
    %112 = vector.shape_cast %111 : vector<1x8x64xf32> to vector<8x64xf32>
    %113 = vector.broadcast %110 : vector<1x64xf32> to vector<8x64xf32>
    %114 = arith.mulf %113, %112 : vector<8x64xf32>
    %115 = arith.addf %109, %114 : vector<8x64xf32>
    %c4_47 = arith.constant 4 : index
    %c0_48 = arith.constant 0 : index
    %116 = vector.load %arg3[%c4_47, %c0_48] : memref<144x64xf32, #tpu.memory_space<vmem>>, vector<1x64xf32>
    %c0_49 = arith.constant 0 : index
    %c0_50 = arith.constant 0 : index
    %c4_51 = arith.constant 4 : index
    %117 = vector.load %arg6[%c0_49, %c0_50, %c4_51] : memref<4x9x72xf32, #tpu.memory_space<vmem>>, vector<1x8x64xf32>
    %118 = vector.shape_cast %117 : vector<1x8x64xf32> to vector<8x64xf32>
    %119 = vector.broadcast %116 : vector<1x64xf32> to vector<8x64xf32>
    %120 = arith.mulf %119, %118 : vector<8x64xf32>
    %121 = arith.addf %115, %120 : vector<8x64xf32>
    %c5 = arith.constant 5 : index
    %c0_52 = arith.constant 0 : index
    %122 = vector.load %arg3[%c5, %c0_52] : memref<144x64xf32, #tpu.memory_space<vmem>>, vector<1x64xf32>
    %c0_53 = arith.constant 0 : index
    %c0_54 = arith.constant 0 : index
    %c6_55 = arith.constant 6 : index
    %123 = vector.load %arg6[%c0_53, %c0_54, %c6_55] : memref<4x9x72xf32, #tpu.memory_space<vmem>>, vector<1x8x64xf32>
    %124 = vector.shape_cast %123 : vector<1x8x64xf32> to vector<8x64xf32>
    %125 = vector.broadcast %122 : vector<1x64xf32> to vector<8x64xf32>
    %126 = arith.mulf %125, %124 : vector<8x64xf32>
    %127 = arith.addf %121, %126 : vector<8x64xf32>
    %c6_56 = arith.constant 6 : index
    %c0_57 = arith.constant 0 : index
    %128 = vector.load %arg3[%c6_56, %c0_57] : memref<144x64xf32, #tpu.memory_space<vmem>>, vector<1x64xf32>
    %c0_58 = arith.constant 0 : index
    %c1_59 = arith.constant 1 : index
    %c2_60 = arith.constant 2 : index
    %129 = vector.load %arg7[%c0_58, %c1_59, %c2_60] : memref<4x9x72xf32, #tpu.memory_space<vmem>>, vector<1x8x64xf32>
    %130 = vector.shape_cast %129 : vector<1x8x64xf32> to vector<8x64xf32>
    %131 = vector.broadcast %128 : vector<1x64xf32> to vector<8x64xf32>
    %132 = arith.mulf %131, %130 : vector<8x64xf32>
    %133 = arith.addf %127, %132 : vector<8x64xf32>
    %c7 = arith.constant 7 : index
    %c0_61 = arith.constant 0 : index
    %134 = vector.load %arg3[%c7, %c0_61] : memref<144x64xf32, #tpu.memory_space<vmem>>, vector<1x64xf32>
    %c0_62 = arith.constant 0 : index
    %c1_63 = arith.constant 1 : index
    %c4_64 = arith.constant 4 : index
    %135 = vector.load %arg7[%c0_62, %c1_63, %c4_64] : memref<4x9x72xf32, #tpu.memory_space<vmem>>, vector<1x8x64xf32>
    %136 = vector.shape_cast %135 : vector<1x8x64xf32> to vector<8x64xf32>
    %137 = vector.broadcast %134 : vector<1x64xf32> to vector<8x64xf32>
    %138 = arith.mulf %137, %136 : vector<8x64xf32>
    %139 = arith.addf %133, %138 : vector<8x64xf32>
    %c8 = arith.constant 8 : index
    %c0_65 = arith.constant 0 : index
    %140 = vector.load %arg3[%c8, %c0_65] : memref<144x64xf32, #tpu.memory_space<vmem>>, vector<1x64xf32>
    %c0_66 = arith.constant 0 : index
    %c1_67 = arith.constant 1 : index
    %c6_68 = arith.constant 6 : index
    %141 = vector.load %arg7[%c0_66, %c1_67, %c6_68] : memref<4x9x72xf32, #tpu.memory_space<vmem>>, vector<1x8x64xf32>
    %142 = vector.shape_cast %141 : vector<1x8x64xf32> to vector<8x64xf32>
    %143 = vector.broadcast %140 : vector<1x64xf32> to vector<8x64xf32>
    %144 = arith.mulf %143, %142 : vector<8x64xf32>
    %145 = arith.addf %139, %144 : vector<8x64xf32>
    %c9 = arith.constant 9 : index
    %c0_69 = arith.constant 0 : index
    %146 = vector.load %arg3[%c9, %c0_69] : memref<144x64xf32, #tpu.memory_space<vmem>>, vector<1x64xf32>
    %c1_70 = arith.constant 1 : index
    %c0_71 = arith.constant 0 : index
    %c2_72 = arith.constant 2 : index
    %147 = vector.load %arg7[%c1_70, %c0_71, %c2_72] : memref<4x9x72xf32, #tpu.memory_space<vmem>>, vector<1x8x64xf32>
    %148 = vector.shape_cast %147 : vector<1x8x64xf32> to vector<8x64xf32>
    %149 = vector.broadcast %146 : vector<1x64xf32> to vector<8x64xf32>
    %150 = arith.mulf %149, %148 : vector<8x64xf32>
    %151 = arith.addf %145, %150 : vector<8x64xf32>
    %c10 = arith.constant 10 : index
    %c0_73 = arith.constant 0 : index
    %152 = vector.load %arg3[%c10, %c0_73] : memref<144x64xf32, #tpu.memory_space<vmem>>, vector<1x64xf32>
    %c1_74 = arith.constant 1 : index
    %c0_75 = arith.constant 0 : index
    %c4_76 = arith.constant 4 : index
    %153 = vector.load %arg7[%c1_74, %c0_75, %c4_76] : memref<4x9x72xf32, #tpu.memory_space<vmem>>, vector<1x8x64xf32>
    %154 = vector.shape_cast %153 : vector<1x8x64xf32> to vector<8x64xf32>
    %155 = vector.broadcast %152 : vector<1x64xf32> to vector<8x64xf32>
    %156 = arith.mulf %155, %154 : vector<8x64xf32>
    %157 = arith.addf %151, %156 : vector<8x64xf32>
    %c11 = arith.constant 11 : index
    %c0_77 = arith.constant 0 : index
    %158 = vector.load %arg3[%c11, %c0_77] : memref<144x64xf32, #tpu.memory_space<vmem>>, vector<1x64xf32>
    %c1_78 = arith.constant 1 : index
    %c0_79 = arith.constant 0 : index
    %c6_80 = arith.constant 6 : index
    %159 = vector.load %arg7[%c1_78, %c0_79, %c6_80] : memref<4x9x72xf32, #tpu.memory_space<vmem>>, vector<1x8x64xf32>
    %160 = vector.shape_cast %159 : vector<1x8x64xf32> to vector<8x64xf32>
    %161 = vector.broadcast %158 : vector<1x64xf32> to vector<8x64xf32>
    %162 = arith.mulf %161, %160 : vector<8x64xf32>
    %163 = arith.addf %157, %162 : vector<8x64xf32>
    %c12 = arith.constant 12 : index
    %c0_81 = arith.constant 0 : index
    %164 = vector.load %arg3[%c12, %c0_81] : memref<144x64xf32, #tpu.memory_space<vmem>>, vector<1x64xf32>
    %c1_82 = arith.constant 1 : index
    %c0_83 = arith.constant 0 : index
    %c2_84 = arith.constant 2 : index
    %165 = vector.load %arg6[%c1_82, %c0_83, %c2_84] : memref<4x9x72xf32, #tpu.memory_space<vmem>>, vector<1x8x64xf32>
    %166 = vector.shape_cast %165 : vector<1x8x64xf32> to vector<8x64xf32>
    %167 = vector.broadcast %164 : vector<1x64xf32> to vector<8x64xf32>
    %168 = arith.mulf %167, %166 : vector<8x64xf32>
    %169 = arith.addf %163, %168 : vector<8x64xf32>
    %c13 = arith.constant 13 : index
    %c0_85 = arith.constant 0 : index
    %170 = vector.load %arg3[%c13, %c0_85] : memref<144x64xf32, #tpu.memory_space<vmem>>, vector<1x64xf32>
    %c1_86 = arith.constant 1 : index
    %c0_87 = arith.constant 0 : index
    %c4_88 = arith.constant 4 : index
    %171 = vector.load %arg6[%c1_86, %c0_87, %c4_88] : memref<4x9x72xf32, #tpu.memory_space<vmem>>, vector<1x8x64xf32>
    %172 = vector.shape_cast %171 : vector<1x8x64xf32> to vector<8x64xf32>
    %173 = vector.broadcast %170 : vector<1x64xf32> to vector<8x64xf32>
    %174 = arith.mulf %173, %172 : vector<8x64xf32>
    %175 = arith.addf %169, %174 : vector<8x64xf32>
    %c14 = arith.constant 14 : index
    %c0_89 = arith.constant 0 : index
    %176 = vector.load %arg3[%c14, %c0_89] : memref<144x64xf32, #tpu.memory_space<vmem>>, vector<1x64xf32>
    %c1_90 = arith.constant 1 : index
    %c0_91 = arith.constant 0 : index
    %c6_92 = arith.constant 6 : index
    %177 = vector.load %arg6[%c1_90, %c0_91, %c6_92] : memref<4x9x72xf32, #tpu.memory_space<vmem>>, vector<1x8x64xf32>
    %178 = vector.shape_cast %177 : vector<1x8x64xf32> to vector<8x64xf32>
    %179 = vector.broadcast %176 : vector<1x64xf32> to vector<8x64xf32>
    %180 = arith.mulf %179, %178 : vector<8x64xf32>
    %181 = arith.addf %175, %180 : vector<8x64xf32>
    %c15 = arith.constant 15 : index
    %c0_93 = arith.constant 0 : index
    %182 = vector.load %arg3[%c15, %c0_93] : memref<144x64xf32, #tpu.memory_space<vmem>>, vector<1x64xf32>
    %c1_94 = arith.constant 1 : index
    %c1_95 = arith.constant 1 : index
    %c2_96 = arith.constant 2 : index
    %183 = vector.load %arg7[%c1_94, %c1_95, %c2_96] : memref<4x9x72xf32, #tpu.memory_space<vmem>>, vector<1x8x64xf32>
    %184 = vector.shape_cast %183 : vector<1x8x64xf32> to vector<8x64xf32>
    %185 = vector.broadcast %182 : vector<1x64xf32> to vector<8x64xf32>
    %186 = arith.mulf %185, %184 : vector<8x64xf32>
    %187 = arith.addf %181, %186 : vector<8x64xf32>
    %c16 = arith.constant 16 : index
    %c0_97 = arith.constant 0 : index
    %188 = vector.load %arg3[%c16, %c0_97] : memref<144x64xf32, #tpu.memory_space<vmem>>, vector<1x64xf32>
    %c1_98 = arith.constant 1 : index
    %c1_99 = arith.constant 1 : index
    %c4_100 = arith.constant 4 : index
    %189 = vector.load %arg7[%c1_98, %c1_99, %c4_100] : memref<4x9x72xf32, #tpu.memory_space<vmem>>, vector<1x8x64xf32>
    %190 = vector.shape_cast %189 : vector<1x8x64xf32> to vector<8x64xf32>
    %191 = vector.broadcast %188 : vector<1x64xf32> to vector<8x64xf32>
    %192 = arith.mulf %191, %190 : vector<8x64xf32>
    %193 = arith.addf %187, %192 : vector<8x64xf32>
    %c17 = arith.constant 17 : index
    %c0_101 = arith.constant 0 : index
    %194 = vector.load %arg3[%c17, %c0_101] : memref<144x64xf32, #tpu.memory_space<vmem>>, vector<1x64xf32>
    %c1_102 = arith.constant 1 : index
    %c1_103 = arith.constant 1 : index
    %c6_104 = arith.constant 6 : index
    %195 = vector.load %arg7[%c1_102, %c1_103, %c6_104] : memref<4x9x72xf32, #tpu.memory_space<vmem>>, vector<1x8x64xf32>
    %196 = vector.shape_cast %195 : vector<1x8x64xf32> to vector<8x64xf32>
    %197 = vector.broadcast %194 : vector<1x64xf32> to vector<8x64xf32>
    %198 = arith.mulf %197, %196 : vector<8x64xf32>
    %199 = arith.addf %193, %198 : vector<8x64xf32>
    %c18 = arith.constant 18 : index
    %c0_105 = arith.constant 0 : index
    %200 = vector.load %arg3[%c18, %c0_105] : memref<144x64xf32, #tpu.memory_space<vmem>>, vector<1x64xf32>
    %c2_106 = arith.constant 2 : index
    %c0_107 = arith.constant 0 : index
    %c2_108 = arith.constant 2 : index
    %201 = vector.load %arg7[%c2_106, %c0_107, %c2_108] : memref<4x9x72xf32, #tpu.memory_space<vmem>>, vector<1x8x64xf32>
    %202 = vector.shape_cast %201 : vector<1x8x64xf32> to vector<8x64xf32>
    %203 = vector.broadcast %200 : vector<1x64xf32> to vector<8x64xf32>
    %204 = arith.mulf %203, %202 : vector<8x64xf32>
    %205 = arith.addf %199, %204 : vector<8x64xf32>
    %c19 = arith.constant 19 : index
    %c0_109 = arith.constant 0 : index
    %206 = vector.load %arg3[%c19, %c0_109] : memref<144x64xf32, #tpu.memory_space<vmem>>, vector<1x64xf32>
    %c2_110 = arith.constant 2 : index
    %c0_111 = arith.constant 0 : index
    %c4_112 = arith.constant 4 : index
    %207 = vector.load %arg7[%c2_110, %c0_111, %c4_112] : memref<4x9x72xf32, #tpu.memory_space<vmem>>, vector<1x8x64xf32>
    %208 = vector.shape_cast %207 : vector<1x8x64xf32> to vector<8x64xf32>
    %209 = vector.broadcast %206 : vector<1x64xf32> to vector<8x64xf32>
    %210 = arith.mulf %209, %208 : vector<8x64xf32>
    %211 = arith.addf %205, %210 : vector<8x64xf32>
    %c20 = arith.constant 20 : index
    %c0_113 = arith.constant 0 : index
    %212 = vector.load %arg3[%c20, %c0_113] : memref<144x64xf32, #tpu.memory_space<vmem>>, vector<1x64xf32>
    %c2_114 = arith.constant 2 : index
    %c0_115 = arith.constant 0 : index
    %c6_116 = arith.constant 6 : index
    %213 = vector.load %arg7[%c2_114, %c0_115, %c6_116] : memref<4x9x72xf32, #tpu.memory_space<vmem>>, vector<1x8x64xf32>
    %214 = vector.shape_cast %213 : vector<1x8x64xf32> to vector<8x64xf32>
    %215 = vector.broadcast %212 : vector<1x64xf32> to vector<8x64xf32>
    %216 = arith.mulf %215, %214 : vector<8x64xf32>
    %217 = arith.addf %211, %216 : vector<8x64xf32>
    %c21 = arith.constant 21 : index
    %c0_117 = arith.constant 0 : index
    %218 = vector.load %arg3[%c21, %c0_117] : memref<144x64xf32, #tpu.memory_space<vmem>>, vector<1x64xf32>
    %c2_118 = arith.constant 2 : index
    %c0_119 = arith.constant 0 : index
    %c2_120 = arith.constant 2 : index
    %219 = vector.load %arg6[%c2_118, %c0_119, %c2_120] : memref<4x9x72xf32, #tpu.memory_space<vmem>>, vector<1x8x64xf32>
    %220 = vector.shape_cast %219 : vector<1x8x64xf32> to vector<8x64xf32>
    %221 = vector.broadcast %218 : vector<1x64xf32> to vector<8x64xf32>
    %222 = arith.mulf %221, %220 : vector<8x64xf32>
    %223 = arith.addf %217, %222 : vector<8x64xf32>
    %c22 = arith.constant 22 : index
    %c0_121 = arith.constant 0 : index
    %224 = vector.load %arg3[%c22, %c0_121] : memref<144x64xf32, #tpu.memory_space<vmem>>, vector<1x64xf32>
    %c2_122 = arith.constant 2 : index
    %c0_123 = arith.constant 0 : index
    %c4_124 = arith.constant 4 : index
    %225 = vector.load %arg6[%c2_122, %c0_123, %c4_124] : memref<4x9x72xf32, #tpu.memory_space<vmem>>, vector<1x8x64xf32>
    %226 = vector.shape_cast %225 : vector<1x8x64xf32> to vector<8x64xf32>
    %227 = vector.broadcast %224 : vector<1x64xf32> to vector<8x64xf32>
    %228 = arith.mulf %227, %226 : vector<8x64xf32>
    %229 = arith.addf %223, %228 : vector<8x64xf32>
    %c23 = arith.constant 23 : index
    %c0_125 = arith.constant 0 : index
    %230 = vector.load %arg3[%c23, %c0_125] : memref<144x64xf32, #tpu.memory_space<vmem>>, vector<1x64xf32>
    %c2_126 = arith.constant 2 : index
    %c0_127 = arith.constant 0 : index
    %c6_128 = arith.constant 6 : index
    %231 = vector.load %arg6[%c2_126, %c0_127, %c6_128] : memref<4x9x72xf32, #tpu.memory_space<vmem>>, vector<1x8x64xf32>
    %232 = vector.shape_cast %231 : vector<1x8x64xf32> to vector<8x64xf32>
    %233 = vector.broadcast %230 : vector<1x64xf32> to vector<8x64xf32>
    %234 = arith.mulf %233, %232 : vector<8x64xf32>
    %235 = arith.addf %229, %234 : vector<8x64xf32>
    %c24 = arith.constant 24 : index
    %c0_129 = arith.constant 0 : index
    %236 = vector.load %arg3[%c24, %c0_129] : memref<144x64xf32, #tpu.memory_space<vmem>>, vector<1x64xf32>
    %c2_130 = arith.constant 2 : index
    %c1_131 = arith.constant 1 : index
    %c2_132 = arith.constant 2 : index
    %237 = vector.load %arg7[%c2_130, %c1_131, %c2_132] : memref<4x9x72xf32, #tpu.memory_space<vmem>>, vector<1x8x64xf32>
    %238 = vector.shape_cast %237 : vector<1x8x64xf32> to vector<8x64xf32>
    %239 = vector.broadcast %236 : vector<1x64xf32> to vector<8x64xf32>
    %240 = arith.mulf %239, %238 : vector<8x64xf32>
    %241 = arith.addf %235, %240 : vector<8x64xf32>
    %c25 = arith.constant 25 : index
    %c0_133 = arith.constant 0 : index
    %242 = vector.load %arg3[%c25, %c0_133] : memref<144x64xf32, #tpu.memory_space<vmem>>, vector<1x64xf32>
    %c2_134 = arith.constant 2 : index
    %c1_135 = arith.constant 1 : index
    %c4_136 = arith.constant 4 : index
    %243 = vector.load %arg7[%c2_134, %c1_135, %c4_136] : memref<4x9x72xf32, #tpu.memory_space<vmem>>, vector<1x8x64xf32>
    %244 = vector.shape_cast %243 : vector<1x8x64xf32> to vector<8x64xf32>
    %245 = vector.broadcast %242 : vector<1x64xf32> to vector<8x64xf32>
    %246 = arith.mulf %245, %244 : vector<8x64xf32>
    %247 = arith.addf %241, %246 : vector<8x64xf32>
    %c26 = arith.constant 26 : index
    %c0_137 = arith.constant 0 : index
    %248 = vector.load %arg3[%c26, %c0_137] : memref<144x64xf32, #tpu.memory_space<vmem>>, vector<1x64xf32>
    %c2_138 = arith.constant 2 : index
    %c1_139 = arith.constant 1 : index
    %c6_140 = arith.constant 6 : index
    %249 = vector.load %arg7[%c2_138, %c1_139, %c6_140] : memref<4x9x72xf32, #tpu.memory_space<vmem>>, vector<1x8x64xf32>
    %250 = vector.shape_cast %249 : vector<1x8x64xf32> to vector<8x64xf32>
    %251 = vector.broadcast %248 : vector<1x64xf32> to vector<8x64xf32>
    %252 = arith.mulf %251, %250 : vector<8x64xf32>
    %253 = arith.addf %247, %252 : vector<8x64xf32>
    %c27 = arith.constant 27 : index
    %c0_141 = arith.constant 0 : index
    %254 = vector.load %arg3[%c27, %c0_141] : memref<144x64xf32, #tpu.memory_space<vmem>>, vector<1x64xf32>
    %c3_142 = arith.constant 3 : index
    %c0_143 = arith.constant 0 : index
    %c2_144 = arith.constant 2 : index
    %255 = vector.load %arg7[%c3_142, %c0_143, %c2_144] : memref<4x9x72xf32, #tpu.memory_space<vmem>>, vector<1x8x64xf32>
    %256 = vector.shape_cast %255 : vector<1x8x64xf32> to vector<8x64xf32>
    %257 = vector.broadcast %254 : vector<1x64xf32> to vector<8x64xf32>
    %258 = arith.mulf %257, %256 : vector<8x64xf32>
    %259 = arith.addf %253, %258 : vector<8x64xf32>
    %c28 = arith.constant 28 : index
    %c0_145 = arith.constant 0 : index
    %260 = vector.load %arg3[%c28, %c0_145] : memref<144x64xf32, #tpu.memory_space<vmem>>, vector<1x64xf32>
    %c3_146 = arith.constant 3 : index
    %c0_147 = arith.constant 0 : index
    %c4_148 = arith.constant 4 : index
    %261 = vector.load %arg7[%c3_146, %c0_147, %c4_148] : memref<4x9x72xf32, #tpu.memory_space<vmem>>, vector<1x8x64xf32>
    %262 = vector.shape_cast %261 : vector<1x8x64xf32> to vector<8x64xf32>
    %263 = vector.broadcast %260 : vector<1x64xf32> to vector<8x64xf32>
    %264 = arith.mulf %263, %262 : vector<8x64xf32>
    %265 = arith.addf %259, %264 : vector<8x64xf32>
    %c29 = arith.constant 29 : index
    %c0_149 = arith.constant 0 : index
    %266 = vector.load %arg3[%c29, %c0_149] : memref<144x64xf32, #tpu.memory_space<vmem>>, vector<1x64xf32>
    %c3_150 = arith.constant 3 : index
    %c0_151 = arith.constant 0 : index
    %c6_152 = arith.constant 6 : index
    %267 = vector.load %arg7[%c3_150, %c0_151, %c6_152] : memref<4x9x72xf32, #tpu.memory_space<vmem>>, vector<1x8x64xf32>
    %268 = vector.shape_cast %267 : vector<1x8x64xf32> to vector<8x64xf32>
    %269 = vector.broadcast %266 : vector<1x64xf32> to vector<8x64xf32>
    %270 = arith.mulf %269, %268 : vector<8x64xf32>
    %271 = arith.addf %265, %270 : vector<8x64xf32>
    %c30 = arith.constant 30 : index
    %c0_153 = arith.constant 0 : index
    %272 = vector.load %arg3[%c30, %c0_153] : memref<144x64xf32, #tpu.memory_space<vmem>>, vector<1x64xf32>
    %c3_154 = arith.constant 3 : index
    %c0_155 = arith.constant 0 : index
    %c2_156 = arith.constant 2 : index
    %273 = vector.load %arg6[%c3_154, %c0_155, %c2_156] : memref<4x9x72xf32, #tpu.memory_space<vmem>>, vector<1x8x64xf32>
    %274 = vector.shape_cast %273 : vector<1x8x64xf32> to vector<8x64xf32>
    %275 = vector.broadcast %272 : vector<1x64xf32> to vector<8x64xf32>
    %276 = arith.mulf %275, %274 : vector<8x64xf32>
    %277 = arith.addf %271, %276 : vector<8x64xf32>
    %c31 = arith.constant 31 : index
    %c0_157 = arith.constant 0 : index
    %278 = vector.load %arg3[%c31, %c0_157] : memref<144x64xf32, #tpu.memory_space<vmem>>, vector<1x64xf32>
    %c3_158 = arith.constant 3 : index
    %c0_159 = arith.constant 0 : index
    %c4_160 = arith.constant 4 : index
    %279 = vector.load %arg6[%c3_158, %c0_159, %c4_160] : memref<4x9x72xf32, #tpu.memory_space<vmem>>, vector<1x8x64xf32>
    %280 = vector.shape_cast %279 : vector<1x8x64xf32> to vector<8x64xf32>
    %281 = vector.broadcast %278 : vector<1x64xf32> to vector<8x64xf32>
    %282 = arith.mulf %281, %280 : vector<8x64xf32>
    %283 = arith.addf %277, %282 : vector<8x64xf32>
    %c32 = arith.constant 32 : index
    %c0_161 = arith.constant 0 : index
    %284 = vector.load %arg3[%c32, %c0_161] : memref<144x64xf32, #tpu.memory_space<vmem>>, vector<1x64xf32>
    %c3_162 = arith.constant 3 : index
    %c0_163 = arith.constant 0 : index
    %c6_164 = arith.constant 6 : index
    %285 = vector.load %arg6[%c3_162, %c0_163, %c6_164] : memref<4x9x72xf32, #tpu.memory_space<vmem>>, vector<1x8x64xf32>
    %286 = vector.shape_cast %285 : vector<1x8x64xf32> to vector<8x64xf32>
    %287 = vector.broadcast %284 : vector<1x64xf32> to vector<8x64xf32>
    %288 = arith.mulf %287, %286 : vector<8x64xf32>
    %289 = arith.addf %283, %288 : vector<8x64xf32>
    %c33 = arith.constant 33 : index
    %c0_165 = arith.constant 0 : index
    %290 = vector.load %arg3[%c33, %c0_165] : memref<144x64xf32, #tpu.memory_space<vmem>>, vector<1x64xf32>
    %c3_166 = arith.constant 3 : index
    %c1_167 = arith.constant 1 : index
    %c2_168 = arith.constant 2 : index
    %291 = vector.load %arg7[%c3_166, %c1_167, %c2_168] : memref<4x9x72xf32, #tpu.memory_space<vmem>>, vector<1x8x64xf32>
    %292 = vector.shape_cast %291 : vector<1x8x64xf32> to vector<8x64xf32>
    %293 = vector.broadcast %290 : vector<1x64xf32> to vector<8x64xf32>
    %294 = arith.mulf %293, %292 : vector<8x64xf32>
    %295 = arith.addf %289, %294 : vector<8x64xf32>
    %c34 = arith.constant 34 : index
    %c0_169 = arith.constant 0 : index
    %296 = vector.load %arg3[%c34, %c0_169] : memref<144x64xf32, #tpu.memory_space<vmem>>, vector<1x64xf32>
    %c3_170 = arith.constant 3 : index
    %c1_171 = arith.constant 1 : index
    %c4_172 = arith.constant 4 : index
    %297 = vector.load %arg7[%c3_170, %c1_171, %c4_172] : memref<4x9x72xf32, #tpu.memory_space<vmem>>, vector<1x8x64xf32>
    %298 = vector.shape_cast %297 : vector<1x8x64xf32> to vector<8x64xf32>
    %299 = vector.broadcast %296 : vector<1x64xf32> to vector<8x64xf32>
    %300 = arith.mulf %299, %298 : vector<8x64xf32>
    %301 = arith.addf %295, %300 : vector<8x64xf32>
    %c35 = arith.constant 35 : index
    %c0_173 = arith.constant 0 : index
    %302 = vector.load %arg3[%c35, %c0_173] : memref<144x64xf32, #tpu.memory_space<vmem>>, vector<1x64xf32>
    %c3_174 = arith.constant 3 : index
    %c1_175 = arith.constant 1 : index
    %c6_176 = arith.constant 6 : index
    %303 = vector.load %arg7[%c3_174, %c1_175, %c6_176] : memref<4x9x72xf32, #tpu.memory_space<vmem>>, vector<1x8x64xf32>
    %304 = vector.shape_cast %303 : vector<1x8x64xf32> to vector<8x64xf32>
    %305 = vector.broadcast %302 : vector<1x64xf32> to vector<8x64xf32>
    %306 = arith.mulf %305, %304 : vector<8x64xf32>
    %307 = arith.addf %301, %306 : vector<8x64xf32>
    %cst_177 = arith.constant 0.000000e+00 : f32
    %308 = vector.broadcast %cst_177 : f32 to vector<8x64xf32>
    %c36 = arith.constant 36 : index
    %c0_178 = arith.constant 0 : index
    %309 = vector.load %arg3[%c36, %c0_178] : memref<144x64xf32, #tpu.memory_space<vmem>>, vector<1x64xf32>
    %c0_179 = arith.constant 0 : index
    %c0_180 = arith.constant 0 : index
    %c2_181 = arith.constant 2 : index
    %310 = vector.load %arg7[%c0_179, %c0_180, %c2_181] : memref<4x9x72xf32, #tpu.memory_space<vmem>>, vector<1x8x64xf32>
    %311 = vector.shape_cast %310 : vector<1x8x64xf32> to vector<8x64xf32>
    %312 = vector.broadcast %309 : vector<1x64xf32> to vector<8x64xf32>
    %313 = arith.mulf %312, %311 : vector<8x64xf32>
    %314 = arith.addf %308, %313 : vector<8x64xf32>
    %c37 = arith.constant 37 : index
    %c0_182 = arith.constant 0 : index
    %315 = vector.load %arg3[%c37, %c0_182] : memref<144x64xf32, #tpu.memory_space<vmem>>, vector<1x64xf32>
    %c0_183 = arith.constant 0 : index
    %c0_184 = arith.constant 0 : index
    %c4_185 = arith.constant 4 : index
    %316 = vector.load %arg7[%c0_183, %c0_184, %c4_185] : memref<4x9x72xf32, #tpu.memory_space<vmem>>, vector<1x8x64xf32>
    %317 = vector.shape_cast %316 : vector<1x8x64xf32> to vector<8x64xf32>
    %318 = vector.broadcast %315 : vector<1x64xf32> to vector<8x64xf32>
    %319 = arith.mulf %318, %317 : vector<8x64xf32>
    %320 = arith.addf %314, %319 : vector<8x64xf32>
    %c38 = arith.constant 38 : index
    %c0_186 = arith.constant 0 : index
    %321 = vector.load %arg3[%c38, %c0_186] : memref<144x64xf32, #tpu.memory_space<vmem>>, vector<1x64xf32>
    %c0_187 = arith.constant 0 : index
    %c0_188 = arith.constant 0 : index
    %c6_189 = arith.constant 6 : index
    %322 = vector.load %arg7[%c0_187, %c0_188, %c6_189] : memref<4x9x72xf32, #tpu.memory_space<vmem>>, vector<1x8x64xf32>
    %323 = vector.shape_cast %322 : vector<1x8x64xf32> to vector<8x64xf32>
    %324 = vector.broadcast %321 : vector<1x64xf32> to vector<8x64xf32>
    %325 = arith.mulf %324, %323 : vector<8x64xf32>
    %326 = arith.addf %320, %325 : vector<8x64xf32>
    %c39 = arith.constant 39 : index
    %c0_190 = arith.constant 0 : index
    %327 = vector.load %arg3[%c39, %c0_190] : memref<144x64xf32, #tpu.memory_space<vmem>>, vector<1x64xf32>
    %c0_191 = arith.constant 0 : index
    %c0_192 = arith.constant 0 : index
    %c2_193 = arith.constant 2 : index
    %328 = vector.load %arg6[%c0_191, %c0_192, %c2_193] : memref<4x9x72xf32, #tpu.memory_space<vmem>>, vector<1x8x64xf32>
    %329 = vector.shape_cast %328 : vector<1x8x64xf32> to vector<8x64xf32>
    %330 = vector.broadcast %327 : vector<1x64xf32> to vector<8x64xf32>
    %331 = arith.mulf %330, %329 : vector<8x64xf32>
    %332 = arith.addf %326, %331 : vector<8x64xf32>
    %c40 = arith.constant 40 : index
    %c0_194 = arith.constant 0 : index
    %333 = vector.load %arg3[%c40, %c0_194] : memref<144x64xf32, #tpu.memory_space<vmem>>, vector<1x64xf32>
    %c0_195 = arith.constant 0 : index
    %c0_196 = arith.constant 0 : index
    %c4_197 = arith.constant 4 : index
    %334 = vector.load %arg6[%c0_195, %c0_196, %c4_197] : memref<4x9x72xf32, #tpu.memory_space<vmem>>, vector<1x8x64xf32>
    %335 = vector.shape_cast %334 : vector<1x8x64xf32> to vector<8x64xf32>
    %336 = vector.broadcast %333 : vector<1x64xf32> to vector<8x64xf32>
    %337 = arith.mulf %336, %335 : vector<8x64xf32>
    %338 = arith.addf %332, %337 : vector<8x64xf32>
    %c41 = arith.constant 41 : index
    %c0_198 = arith.constant 0 : index
    %339 = vector.load %arg3[%c41, %c0_198] : memref<144x64xf32, #tpu.memory_space<vmem>>, vector<1x64xf32>
    %c0_199 = arith.constant 0 : index
    %c0_200 = arith.constant 0 : index
    %c6_201 = arith.constant 6 : index
    %340 = vector.load %arg6[%c0_199, %c0_200, %c6_201] : memref<4x9x72xf32, #tpu.memory_space<vmem>>, vector<1x8x64xf32>
    %341 = vector.shape_cast %340 : vector<1x8x64xf32> to vector<8x64xf32>
    %342 = vector.broadcast %339 : vector<1x64xf32> to vector<8x64xf32>
    %343 = arith.mulf %342, %341 : vector<8x64xf32>
    %344 = arith.addf %338, %343 : vector<8x64xf32>
    %c42 = arith.constant 42 : index
    %c0_202 = arith.constant 0 : index
    %345 = vector.load %arg3[%c42, %c0_202] : memref<144x64xf32, #tpu.memory_space<vmem>>, vector<1x64xf32>
    %c0_203 = arith.constant 0 : index
    %c1_204 = arith.constant 1 : index
    %c2_205 = arith.constant 2 : index
    %346 = vector.load %arg7[%c0_203, %c1_204, %c2_205] : memref<4x9x72xf32, #tpu.memory_space<vmem>>, vector<1x8x64xf32>
    %347 = vector.shape_cast %346 : vector<1x8x64xf32> to vector<8x64xf32>
    %348 = vector.broadcast %345 : vector<1x64xf32> to vector<8x64xf32>
    %349 = arith.mulf %348, %347 : vector<8x64xf32>
    %350 = arith.addf %344, %349 : vector<8x64xf32>
    %c43 = arith.constant 43 : index
    %c0_206 = arith.constant 0 : index
    %351 = vector.load %arg3[%c43, %c0_206] : memref<144x64xf32, #tpu.memory_space<vmem>>, vector<1x64xf32>
    %c0_207 = arith.constant 0 : index
    %c1_208 = arith.constant 1 : index
    %c4_209 = arith.constant 4 : index
    %352 = vector.load %arg7[%c0_207, %c1_208, %c4_209] : memref<4x9x72xf32, #tpu.memory_space<vmem>>, vector<1x8x64xf32>
    %353 = vector.shape_cast %352 : vector<1x8x64xf32> to vector<8x64xf32>
    %354 = vector.broadcast %351 : vector<1x64xf32> to vector<8x64xf32>
    %355 = arith.mulf %354, %353 : vector<8x64xf32>
    %356 = arith.addf %350, %355 : vector<8x64xf32>
    %c44 = arith.constant 44 : index
    %c0_210 = arith.constant 0 : index
    %357 = vector.load %arg3[%c44, %c0_210] : memref<144x64xf32, #tpu.memory_space<vmem>>, vector<1x64xf32>
    %c0_211 = arith.constant 0 : index
    %c1_212 = arith.constant 1 : index
    %c6_213 = arith.constant 6 : index
    %358 = vector.load %arg7[%c0_211, %c1_212, %c6_213] : memref<4x9x72xf32, #tpu.memory_space<vmem>>, vector<1x8x64xf32>
    %359 = vector.shape_cast %358 : vector<1x8x64xf32> to vector<8x64xf32>
    %360 = vector.broadcast %357 : vector<1x64xf32> to vector<8x64xf32>
    %361 = arith.mulf %360, %359 : vector<8x64xf32>
    %362 = arith.addf %356, %361 : vector<8x64xf32>
    %c45 = arith.constant 45 : index
    %c0_214 = arith.constant 0 : index
    %363 = vector.load %arg3[%c45, %c0_214] : memref<144x64xf32, #tpu.memory_space<vmem>>, vector<1x64xf32>
    %c1_215 = arith.constant 1 : index
    %c0_216 = arith.constant 0 : index
    %c2_217 = arith.constant 2 : index
    %364 = vector.load %arg7[%c1_215, %c0_216, %c2_217] : memref<4x9x72xf32, #tpu.memory_space<vmem>>, vector<1x8x64xf32>
    %365 = vector.shape_cast %364 : vector<1x8x64xf32> to vector<8x64xf32>
    %366 = vector.broadcast %363 : vector<1x64xf32> to vector<8x64xf32>
    %367 = arith.mulf %366, %365 : vector<8x64xf32>
    %368 = arith.addf %362, %367 : vector<8x64xf32>
    %c46 = arith.constant 46 : index
    %c0_218 = arith.constant 0 : index
    %369 = vector.load %arg3[%c46, %c0_218] : memref<144x64xf32, #tpu.memory_space<vmem>>, vector<1x64xf32>
    %c1_219 = arith.constant 1 : index
    %c0_220 = arith.constant 0 : index
    %c4_221 = arith.constant 4 : index
    %370 = vector.load %arg7[%c1_219, %c0_220, %c4_221] : memref<4x9x72xf32, #tpu.memory_space<vmem>>, vector<1x8x64xf32>
    %371 = vector.shape_cast %370 : vector<1x8x64xf32> to vector<8x64xf32>
    %372 = vector.broadcast %369 : vector<1x64xf32> to vector<8x64xf32>
    %373 = arith.mulf %372, %371 : vector<8x64xf32>
    %374 = arith.addf %368, %373 : vector<8x64xf32>
    %c47 = arith.constant 47 : index
    %c0_222 = arith.constant 0 : index
    %375 = vector.load %arg3[%c47, %c0_222] : memref<144x64xf32, #tpu.memory_space<vmem>>, vector<1x64xf32>
    %c1_223 = arith.constant 1 : index
    %c0_224 = arith.constant 0 : index
    %c6_225 = arith.constant 6 : index
    %376 = vector.load %arg7[%c1_223, %c0_224, %c6_225] : memref<4x9x72xf32, #tpu.memory_space<vmem>>, vector<1x8x64xf32>
    %377 = vector.shape_cast %376 : vector<1x8x64xf32> to vector<8x64xf32>
    %378 = vector.broadcast %375 : vector<1x64xf32> to vector<8x64xf32>
    %379 = arith.mulf %378, %377 : vector<8x64xf32>
    %380 = arith.addf %374, %379 : vector<8x64xf32>
    %c48 = arith.constant 48 : index
    %c0_226 = arith.constant 0 : index
    %381 = vector.load %arg3[%c48, %c0_226] : memref<144x64xf32, #tpu.memory_space<vmem>>, vector<1x64xf32>
    %c1_227 = arith.constant 1 : index
    %c0_228 = arith.constant 0 : index
    %c2_229 = arith.constant 2 : index
    %382 = vector.load %arg6[%c1_227, %c0_228, %c2_229] : memref<4x9x72xf32, #tpu.memory_space<vmem>>, vector<1x8x64xf32>
    %383 = vector.shape_cast %382 : vector<1x8x64xf32> to vector<8x64xf32>
    %384 = vector.broadcast %381 : vector<1x64xf32> to vector<8x64xf32>
    %385 = arith.mulf %384, %383 : vector<8x64xf32>
    %386 = arith.addf %380, %385 : vector<8x64xf32>
    %c49 = arith.constant 49 : index
    %c0_230 = arith.constant 0 : index
    %387 = vector.load %arg3[%c49, %c0_230] : memref<144x64xf32, #tpu.memory_space<vmem>>, vector<1x64xf32>
    %c1_231 = arith.constant 1 : index
    %c0_232 = arith.constant 0 : index
    %c4_233 = arith.constant 4 : index
    %388 = vector.load %arg6[%c1_231, %c0_232, %c4_233] : memref<4x9x72xf32, #tpu.memory_space<vmem>>, vector<1x8x64xf32>
    %389 = vector.shape_cast %388 : vector<1x8x64xf32> to vector<8x64xf32>
    %390 = vector.broadcast %387 : vector<1x64xf32> to vector<8x64xf32>
    %391 = arith.mulf %390, %389 : vector<8x64xf32>
    %392 = arith.addf %386, %391 : vector<8x64xf32>
    %c50 = arith.constant 50 : index
    %c0_234 = arith.constant 0 : index
    %393 = vector.load %arg3[%c50, %c0_234] : memref<144x64xf32, #tpu.memory_space<vmem>>, vector<1x64xf32>
    %c1_235 = arith.constant 1 : index
    %c0_236 = arith.constant 0 : index
    %c6_237 = arith.constant 6 : index
    %394 = vector.load %arg6[%c1_235, %c0_236, %c6_237] : memref<4x9x72xf32, #tpu.memory_space<vmem>>, vector<1x8x64xf32>
    %395 = vector.shape_cast %394 : vector<1x8x64xf32> to vector<8x64xf32>
    %396 = vector.broadcast %393 : vector<1x64xf32> to vector<8x64xf32>
    %397 = arith.mulf %396, %395 : vector<8x64xf32>
    %398 = arith.addf %392, %397 : vector<8x64xf32>
    %c51 = arith.constant 51 : index
    %c0_238 = arith.constant 0 : index
    %399 = vector.load %arg3[%c51, %c0_238] : memref<144x64xf32, #tpu.memory_space<vmem>>, vector<1x64xf32>
    %c1_239 = arith.constant 1 : index
    %c1_240 = arith.constant 1 : index
    %c2_241 = arith.constant 2 : index
    %400 = vector.load %arg7[%c1_239, %c1_240, %c2_241] : memref<4x9x72xf32, #tpu.memory_space<vmem>>, vector<1x8x64xf32>
    %401 = vector.shape_cast %400 : vector<1x8x64xf32> to vector<8x64xf32>
    %402 = vector.broadcast %399 : vector<1x64xf32> to vector<8x64xf32>
    %403 = arith.mulf %402, %401 : vector<8x64xf32>
    %404 = arith.addf %398, %403 : vector<8x64xf32>
    %c52 = arith.constant 52 : index
    %c0_242 = arith.constant 0 : index
    %405 = vector.load %arg3[%c52, %c0_242] : memref<144x64xf32, #tpu.memory_space<vmem>>, vector<1x64xf32>
    %c1_243 = arith.constant 1 : index
    %c1_244 = arith.constant 1 : index
    %c4_245 = arith.constant 4 : index
    %406 = vector.load %arg7[%c1_243, %c1_244, %c4_245] : memref<4x9x72xf32, #tpu.memory_space<vmem>>, vector<1x8x64xf32>
    %407 = vector.shape_cast %406 : vector<1x8x64xf32> to vector<8x64xf32>
    %408 = vector.broadcast %405 : vector<1x64xf32> to vector<8x64xf32>
    %409 = arith.mulf %408, %407 : vector<8x64xf32>
    %410 = arith.addf %404, %409 : vector<8x64xf32>
    %c53 = arith.constant 53 : index
    %c0_246 = arith.constant 0 : index
    %411 = vector.load %arg3[%c53, %c0_246] : memref<144x64xf32, #tpu.memory_space<vmem>>, vector<1x64xf32>
    %c1_247 = arith.constant 1 : index
    %c1_248 = arith.constant 1 : index
    %c6_249 = arith.constant 6 : index
    %412 = vector.load %arg7[%c1_247, %c1_248, %c6_249] : memref<4x9x72xf32, #tpu.memory_space<vmem>>, vector<1x8x64xf32>
    %413 = vector.shape_cast %412 : vector<1x8x64xf32> to vector<8x64xf32>
    %414 = vector.broadcast %411 : vector<1x64xf32> to vector<8x64xf32>
    %415 = arith.mulf %414, %413 : vector<8x64xf32>
    %416 = arith.addf %410, %415 : vector<8x64xf32>
    %c54 = arith.constant 54 : index
    %c0_250 = arith.constant 0 : index
    %417 = vector.load %arg3[%c54, %c0_250] : memref<144x64xf32, #tpu.memory_space<vmem>>, vector<1x64xf32>
    %c2_251 = arith.constant 2 : index
    %c0_252 = arith.constant 0 : index
    %c2_253 = arith.constant 2 : index
    %418 = vector.load %arg7[%c2_251, %c0_252, %c2_253] : memref<4x9x72xf32, #tpu.memory_space<vmem>>, vector<1x8x64xf32>
    %419 = vector.shape_cast %418 : vector<1x8x64xf32> to vector<8x64xf32>
    %420 = vector.broadcast %417 : vector<1x64xf32> to vector<8x64xf32>
    %421 = arith.mulf %420, %419 : vector<8x64xf32>
    %422 = arith.addf %416, %421 : vector<8x64xf32>
    %c55 = arith.constant 55 : index
    %c0_254 = arith.constant 0 : index
    %423 = vector.load %arg3[%c55, %c0_254] : memref<144x64xf32, #tpu.memory_space<vmem>>, vector<1x64xf32>
    %c2_255 = arith.constant 2 : index
    %c0_256 = arith.constant 0 : index
    %c4_257 = arith.constant 4 : index
    %424 = vector.load %arg7[%c2_255, %c0_256, %c4_257] : memref<4x9x72xf32, #tpu.memory_space<vmem>>, vector<1x8x64xf32>
    %425 = vector.shape_cast %424 : vector<1x8x64xf32> to vector<8x64xf32>
    %426 = vector.broadcast %423 : vector<1x64xf32> to vector<8x64xf32>
    %427 = arith.mulf %426, %425 : vector<8x64xf32>
    %428 = arith.addf %422, %427 : vector<8x64xf32>
    %c56 = arith.constant 56 : index
    %c0_258 = arith.constant 0 : index
    %429 = vector.load %arg3[%c56, %c0_258] : memref<144x64xf32, #tpu.memory_space<vmem>>, vector<1x64xf32>
    %c2_259 = arith.constant 2 : index
    %c0_260 = arith.constant 0 : index
    %c6_261 = arith.constant 6 : index
    %430 = vector.load %arg7[%c2_259, %c0_260, %c6_261] : memref<4x9x72xf32, #tpu.memory_space<vmem>>, vector<1x8x64xf32>
    %431 = vector.shape_cast %430 : vector<1x8x64xf32> to vector<8x64xf32>
    %432 = vector.broadcast %429 : vector<1x64xf32> to vector<8x64xf32>
    %433 = arith.mulf %432, %431 : vector<8x64xf32>
    %434 = arith.addf %428, %433 : vector<8x64xf32>
    %c57 = arith.constant 57 : index
    %c0_262 = arith.constant 0 : index
    %435 = vector.load %arg3[%c57, %c0_262] : memref<144x64xf32, #tpu.memory_space<vmem>>, vector<1x64xf32>
    %c2_263 = arith.constant 2 : index
    %c0_264 = arith.constant 0 : index
    %c2_265 = arith.constant 2 : index
    %436 = vector.load %arg6[%c2_263, %c0_264, %c2_265] : memref<4x9x72xf32, #tpu.memory_space<vmem>>, vector<1x8x64xf32>
    %437 = vector.shape_cast %436 : vector<1x8x64xf32> to vector<8x64xf32>
    %438 = vector.broadcast %435 : vector<1x64xf32> to vector<8x64xf32>
    %439 = arith.mulf %438, %437 : vector<8x64xf32>
    %440 = arith.addf %434, %439 : vector<8x64xf32>
    %c58 = arith.constant 58 : index
    %c0_266 = arith.constant 0 : index
    %441 = vector.load %arg3[%c58, %c0_266] : memref<144x64xf32, #tpu.memory_space<vmem>>, vector<1x64xf32>
    %c2_267 = arith.constant 2 : index
    %c0_268 = arith.constant 0 : index
    %c4_269 = arith.constant 4 : index
    %442 = vector.load %arg6[%c2_267, %c0_268, %c4_269] : memref<4x9x72xf32, #tpu.memory_space<vmem>>, vector<1x8x64xf32>
    %443 = vector.shape_cast %442 : vector<1x8x64xf32> to vector<8x64xf32>
    %444 = vector.broadcast %441 : vector<1x64xf32> to vector<8x64xf32>
    %445 = arith.mulf %444, %443 : vector<8x64xf32>
    %446 = arith.addf %440, %445 : vector<8x64xf32>
    %c59 = arith.constant 59 : index
    %c0_270 = arith.constant 0 : index
    %447 = vector.load %arg3[%c59, %c0_270] : memref<144x64xf32, #tpu.memory_space<vmem>>, vector<1x64xf32>
    %c2_271 = arith.constant 2 : index
    %c0_272 = arith.constant 0 : index
    %c6_273 = arith.constant 6 : index
    %448 = vector.load %arg6[%c2_271, %c0_272, %c6_273] : memref<4x9x72xf32, #tpu.memory_space<vmem>>, vector<1x8x64xf32>
    %449 = vector.shape_cast %448 : vector<1x8x64xf32> to vector<8x64xf32>
    %450 = vector.broadcast %447 : vector<1x64xf32> to vector<8x64xf32>
    %451 = arith.mulf %450, %449 : vector<8x64xf32>
    %452 = arith.addf %446, %451 : vector<8x64xf32>
    %c60 = arith.constant 60 : index
    %c0_274 = arith.constant 0 : index
    %453 = vector.load %arg3[%c60, %c0_274] : memref<144x64xf32, #tpu.memory_space<vmem>>, vector<1x64xf32>
    %c2_275 = arith.constant 2 : index
    %c1_276 = arith.constant 1 : index
    %c2_277 = arith.constant 2 : index
    %454 = vector.load %arg7[%c2_275, %c1_276, %c2_277] : memref<4x9x72xf32, #tpu.memory_space<vmem>>, vector<1x8x64xf32>
    %455 = vector.shape_cast %454 : vector<1x8x64xf32> to vector<8x64xf32>
    %456 = vector.broadcast %453 : vector<1x64xf32> to vector<8x64xf32>
    %457 = arith.mulf %456, %455 : vector<8x64xf32>
    %458 = arith.addf %452, %457 : vector<8x64xf32>
    %c61 = arith.constant 61 : index
    %c0_278 = arith.constant 0 : index
    %459 = vector.load %arg3[%c61, %c0_278] : memref<144x64xf32, #tpu.memory_space<vmem>>, vector<1x64xf32>
    %c2_279 = arith.constant 2 : index
    %c1_280 = arith.constant 1 : index
    %c4_281 = arith.constant 4 : index
    %460 = vector.load %arg7[%c2_279, %c1_280, %c4_281] : memref<4x9x72xf32, #tpu.memory_space<vmem>>, vector<1x8x64xf32>
    %461 = vector.shape_cast %460 : vector<1x8x64xf32> to vector<8x64xf32>
    %462 = vector.broadcast %459 : vector<1x64xf32> to vector<8x64xf32>
    %463 = arith.mulf %462, %461 : vector<8x64xf32>
    %464 = arith.addf %458, %463 : vector<8x64xf32>
    %c62 = arith.constant 62 : index
    %c0_282 = arith.constant 0 : index
    %465 = vector.load %arg3[%c62, %c0_282] : memref<144x64xf32, #tpu.memory_space<vmem>>, vector<1x64xf32>
    %c2_283 = arith.constant 2 : index
    %c1_284 = arith.constant 1 : index
    %c6_285 = arith.constant 6 : index
    %466 = vector.load %arg7[%c2_283, %c1_284, %c6_285] : memref<4x9x72xf32, #tpu.memory_space<vmem>>, vector<1x8x64xf32>
    %467 = vector.shape_cast %466 : vector<1x8x64xf32> to vector<8x64xf32>
    %468 = vector.broadcast %465 : vector<1x64xf32> to vector<8x64xf32>
    %469 = arith.mulf %468, %467 : vector<8x64xf32>
    %470 = arith.addf %464, %469 : vector<8x64xf32>
    %c63 = arith.constant 63 : index
    %c0_286 = arith.constant 0 : index
    %471 = vector.load %arg3[%c63, %c0_286] : memref<144x64xf32, #tpu.memory_space<vmem>>, vector<1x64xf32>
    %c3_287 = arith.constant 3 : index
    %c0_288 = arith.constant 0 : index
    %c2_289 = arith.constant 2 : index
    %472 = vector.load %arg7[%c3_287, %c0_288, %c2_289] : memref<4x9x72xf32, #tpu.memory_space<vmem>>, vector<1x8x64xf32>
    %473 = vector.shape_cast %472 : vector<1x8x64xf32> to vector<8x64xf32>
    %474 = vector.broadcast %471 : vector<1x64xf32> to vector<8x64xf32>
    %475 = arith.mulf %474, %473 : vector<8x64xf32>
    %476 = arith.addf %470, %475 : vector<8x64xf32>
    %c64 = arith.constant 64 : index
    %c0_290 = arith.constant 0 : index
    %477 = vector.load %arg3[%c64, %c0_290] : memref<144x64xf32, #tpu.memory_space<vmem>>, vector<1x64xf32>
    %c3_291 = arith.constant 3 : index
    %c0_292 = arith.constant 0 : index
    %c4_293 = arith.constant 4 : index
    %478 = vector.load %arg7[%c3_291, %c0_292, %c4_293] : memref<4x9x72xf32, #tpu.memory_space<vmem>>, vector<1x8x64xf32>
    %479 = vector.shape_cast %478 : vector<1x8x64xf32> to vector<8x64xf32>
    %480 = vector.broadcast %477 : vector<1x64xf32> to vector<8x64xf32>
    %481 = arith.mulf %480, %479 : vector<8x64xf32>
    %482 = arith.addf %476, %481 : vector<8x64xf32>
    %c65 = arith.constant 65 : index
    %c0_294 = arith.constant 0 : index
    %483 = vector.load %arg3[%c65, %c0_294] : memref<144x64xf32, #tpu.memory_space<vmem>>, vector<1x64xf32>
    %c3_295 = arith.constant 3 : index
    %c0_296 = arith.constant 0 : index
    %c6_297 = arith.constant 6 : index
    %484 = vector.load %arg7[%c3_295, %c0_296, %c6_297] : memref<4x9x72xf32, #tpu.memory_space<vmem>>, vector<1x8x64xf32>
    %485 = vector.shape_cast %484 : vector<1x8x64xf32> to vector<8x64xf32>
    %486 = vector.broadcast %483 : vector<1x64xf32> to vector<8x64xf32>
    %487 = arith.mulf %486, %485 : vector<8x64xf32>
    %488 = arith.addf %482, %487 : vector<8x64xf32>
    %c66 = arith.constant 66 : index
    %c0_298 = arith.constant 0 : index
    %489 = vector.load %arg3[%c66, %c0_298] : memref<144x64xf32, #tpu.memory_space<vmem>>, vector<1x64xf32>
    %c3_299 = arith.constant 3 : index
    %c0_300 = arith.constant 0 : index
    %c2_301 = arith.constant 2 : index
    %490 = vector.load %arg6[%c3_299, %c0_300, %c2_301] : memref<4x9x72xf32, #tpu.memory_space<vmem>>, vector<1x8x64xf32>
    %491 = vector.shape_cast %490 : vector<1x8x64xf32> to vector<8x64xf32>
    %492 = vector.broadcast %489 : vector<1x64xf32> to vector<8x64xf32>
    %493 = arith.mulf %492, %491 : vector<8x64xf32>
    %494 = arith.addf %488, %493 : vector<8x64xf32>
    %c67 = arith.constant 67 : index
    %c0_302 = arith.constant 0 : index
    %495 = vector.load %arg3[%c67, %c0_302] : memref<144x64xf32, #tpu.memory_space<vmem>>, vector<1x64xf32>
    %c3_303 = arith.constant 3 : index
    %c0_304 = arith.constant 0 : index
    %c4_305 = arith.constant 4 : index
    %496 = vector.load %arg6[%c3_303, %c0_304, %c4_305] : memref<4x9x72xf32, #tpu.memory_space<vmem>>, vector<1x8x64xf32>
    %497 = vector.shape_cast %496 : vector<1x8x64xf32> to vector<8x64xf32>
    %498 = vector.broadcast %495 : vector<1x64xf32> to vector<8x64xf32>
    %499 = arith.mulf %498, %497 : vector<8x64xf32>
    %500 = arith.addf %494, %499 : vector<8x64xf32>
    %c68 = arith.constant 68 : index
    %c0_306 = arith.constant 0 : index
    %501 = vector.load %arg3[%c68, %c0_306] : memref<144x64xf32, #tpu.memory_space<vmem>>, vector<1x64xf32>
    %c3_307 = arith.constant 3 : index
    %c0_308 = arith.constant 0 : index
    %c6_309 = arith.constant 6 : index
    %502 = vector.load %arg6[%c3_307, %c0_308, %c6_309] : memref<4x9x72xf32, #tpu.memory_space<vmem>>, vector<1x8x64xf32>
    %503 = vector.shape_cast %502 : vector<1x8x64xf32> to vector<8x64xf32>
    %504 = vector.broadcast %501 : vector<1x64xf32> to vector<8x64xf32>
    %505 = arith.mulf %504, %503 : vector<8x64xf32>
    %506 = arith.addf %500, %505 : vector<8x64xf32>
    %c69 = arith.constant 69 : index
    %c0_310 = arith.constant 0 : index
    %507 = vector.load %arg3[%c69, %c0_310] : memref<144x64xf32, #tpu.memory_space<vmem>>, vector<1x64xf32>
    %c3_311 = arith.constant 3 : index
    %c1_312 = arith.constant 1 : index
    %c2_313 = arith.constant 2 : index
    %508 = vector.load %arg7[%c3_311, %c1_312, %c2_313] : memref<4x9x72xf32, #tpu.memory_space<vmem>>, vector<1x8x64xf32>
    %509 = vector.shape_cast %508 : vector<1x8x64xf32> to vector<8x64xf32>
    %510 = vector.broadcast %507 : vector<1x64xf32> to vector<8x64xf32>
    %511 = arith.mulf %510, %509 : vector<8x64xf32>
    %512 = arith.addf %506, %511 : vector<8x64xf32>
    %c70 = arith.constant 70 : index
    %c0_314 = arith.constant 0 : index
    %513 = vector.load %arg3[%c70, %c0_314] : memref<144x64xf32, #tpu.memory_space<vmem>>, vector<1x64xf32>
    %c3_315 = arith.constant 3 : index
    %c1_316 = arith.constant 1 : index
    %c4_317 = arith.constant 4 : index
    %514 = vector.load %arg7[%c3_315, %c1_316, %c4_317] : memref<4x9x72xf32, #tpu.memory_space<vmem>>, vector<1x8x64xf32>
    %515 = vector.shape_cast %514 : vector<1x8x64xf32> to vector<8x64xf32>
    %516 = vector.broadcast %513 : vector<1x64xf32> to vector<8x64xf32>
    %517 = arith.mulf %516, %515 : vector<8x64xf32>
    %518 = arith.addf %512, %517 : vector<8x64xf32>
    %c71 = arith.constant 71 : index
    %c0_318 = arith.constant 0 : index
    %519 = vector.load %arg3[%c71, %c0_318] : memref<144x64xf32, #tpu.memory_space<vmem>>, vector<1x64xf32>
    %c3_319 = arith.constant 3 : index
    %c1_320 = arith.constant 1 : index
    %c6_321 = arith.constant 6 : index
    %520 = vector.load %arg7[%c3_319, %c1_320, %c6_321] : memref<4x9x72xf32, #tpu.memory_space<vmem>>, vector<1x8x64xf32>
    %521 = vector.shape_cast %520 : vector<1x8x64xf32> to vector<8x64xf32>
    %522 = vector.broadcast %519 : vector<1x64xf32> to vector<8x64xf32>
    %523 = arith.mulf %522, %521 : vector<8x64xf32>
    %524 = arith.addf %518, %523 : vector<8x64xf32>
    %cst_322 = arith.constant 0.000000e+00 : f32
    %525 = vector.broadcast %cst_322 : f32 to vector<8x64xf32>
    %c0_323 = arith.constant 0 : index
    %c0_324 = arith.constant 0 : index
    %526 = vector.load %arg3[%c0_323, %c0_324] : memref<144x64xf32, #tpu.memory_space<vmem>>, vector<1x64xf32>
    %c0_325 = arith.constant 0 : index
    %c0_326 = arith.constant 0 : index
    %c2_327 = arith.constant 2 : index
    %527 = vector.load %arg6[%c0_325, %c0_326, %c2_327] : memref<4x9x72xf32, #tpu.memory_space<vmem>>, vector<1x8x64xf32>
    %528 = vector.shape_cast %527 : vector<1x8x64xf32> to vector<8x64xf32>
    %529 = vector.broadcast %526 : vector<1x64xf32> to vector<8x64xf32>
    %530 = arith.mulf %529, %528 : vector<8x64xf32>
    %531 = arith.addf %525, %530 : vector<8x64xf32>
    %c1_328 = arith.constant 1 : index
    %c0_329 = arith.constant 0 : index
    %532 = vector.load %arg3[%c1_328, %c0_329] : memref<144x64xf32, #tpu.memory_space<vmem>>, vector<1x64xf32>
    %c0_330 = arith.constant 0 : index
    %c0_331 = arith.constant 0 : index
    %c4_332 = arith.constant 4 : index
    %533 = vector.load %arg6[%c0_330, %c0_331, %c4_332] : memref<4x9x72xf32, #tpu.memory_space<vmem>>, vector<1x8x64xf32>
    %534 = vector.shape_cast %533 : vector<1x8x64xf32> to vector<8x64xf32>
    %535 = vector.broadcast %532 : vector<1x64xf32> to vector<8x64xf32>
    %536 = arith.mulf %535, %534 : vector<8x64xf32>
    %537 = arith.addf %531, %536 : vector<8x64xf32>
    %c2_333 = arith.constant 2 : index
    %c0_334 = arith.constant 0 : index
    %538 = vector.load %arg3[%c2_333, %c0_334] : memref<144x64xf32, #tpu.memory_space<vmem>>, vector<1x64xf32>
    %c0_335 = arith.constant 0 : index
    %c0_336 = arith.constant 0 : index
    %c6_337 = arith.constant 6 : index
    %539 = vector.load %arg6[%c0_335, %c0_336, %c6_337] : memref<4x9x72xf32, #tpu.memory_space<vmem>>, vector<1x8x64xf32>
    %540 = vector.shape_cast %539 : vector<1x8x64xf32> to vector<8x64xf32>
    %541 = vector.broadcast %538 : vector<1x64xf32> to vector<8x64xf32>
    %542 = arith.mulf %541, %540 : vector<8x64xf32>
    %543 = arith.addf %537, %542 : vector<8x64xf32>
    %c3_338 = arith.constant 3 : index
    %c0_339 = arith.constant 0 : index
    %544 = vector.load %arg3[%c3_338, %c0_339] : memref<144x64xf32, #tpu.memory_space<vmem>>, vector<1x64xf32>
    %c0_340 = arith.constant 0 : index
    %c1_341 = arith.constant 1 : index
    %c2_342 = arith.constant 2 : index
    %545 = vector.load %arg7[%c0_340, %c1_341, %c2_342] : memref<4x9x72xf32, #tpu.memory_space<vmem>>, vector<1x8x64xf32>
    %546 = vector.shape_cast %545 : vector<1x8x64xf32> to vector<8x64xf32>
    %547 = vector.broadcast %544 : vector<1x64xf32> to vector<8x64xf32>
    %548 = arith.mulf %547, %546 : vector<8x64xf32>
    %549 = arith.addf %543, %548 : vector<8x64xf32>
    %c4_343 = arith.constant 4 : index
    %c0_344 = arith.constant 0 : index
    %550 = vector.load %arg3[%c4_343, %c0_344] : memref<144x64xf32, #tpu.memory_space<vmem>>, vector<1x64xf32>
    %c0_345 = arith.constant 0 : index
    %c1_346 = arith.constant 1 : index
    %c4_347 = arith.constant 4 : index
    %551 = vector.load %arg7[%c0_345, %c1_346, %c4_347] : memref<4x9x72xf32, #tpu.memory_space<vmem>>, vector<1x8x64xf32>
    %552 = vector.shape_cast %551 : vector<1x8x64xf32> to vector<8x64xf32>
    %553 = vector.broadcast %550 : vector<1x64xf32> to vector<8x64xf32>
    %554 = arith.mulf %553, %552 : vector<8x64xf32>
    %555 = arith.addf %549, %554 : vector<8x64xf32>
    %c5_348 = arith.constant 5 : index
    %c0_349 = arith.constant 0 : index
    %556 = vector.load %arg3[%c5_348, %c0_349] : memref<144x64xf32, #tpu.memory_space<vmem>>, vector<1x64xf32>
    %c0_350 = arith.constant 0 : index
    %c1_351 = arith.constant 1 : index
    %c6_352 = arith.constant 6 : index
    %557 = vector.load %arg7[%c0_350, %c1_351, %c6_352] : memref<4x9x72xf32, #tpu.memory_space<vmem>>, vector<1x8x64xf32>
    %558 = vector.shape_cast %557 : vector<1x8x64xf32> to vector<8x64xf32>
    %559 = vector.broadcast %556 : vector<1x64xf32> to vector<8x64xf32>
    %560 = arith.mulf %559, %558 : vector<8x64xf32>
    %561 = arith.addf %555, %560 : vector<8x64xf32>
    %c6_353 = arith.constant 6 : index
    %c0_354 = arith.constant 0 : index
    %562 = vector.load %arg3[%c6_353, %c0_354] : memref<144x64xf32, #tpu.memory_space<vmem>>, vector<1x64xf32>
    %c0_355 = arith.constant 0 : index
    %c1_356 = arith.constant 1 : index
    %c2_357 = arith.constant 2 : index
    %563 = vector.load %arg6[%c0_355, %c1_356, %c2_357] : memref<4x9x72xf32, #tpu.memory_space<vmem>>, vector<1x8x64xf32>
    %564 = vector.shape_cast %563 : vector<1x8x64xf32> to vector<8x64xf32>
    %565 = vector.broadcast %562 : vector<1x64xf32> to vector<8x64xf32>
    %566 = arith.mulf %565, %564 : vector<8x64xf32>
    %567 = arith.addf %561, %566 : vector<8x64xf32>
    %c7_358 = arith.constant 7 : index
    %c0_359 = arith.constant 0 : index
    %568 = vector.load %arg3[%c7_358, %c0_359] : memref<144x64xf32, #tpu.memory_space<vmem>>, vector<1x64xf32>
    %c0_360 = arith.constant 0 : index
    %c1_361 = arith.constant 1 : index
    %c4_362 = arith.constant 4 : index
    %569 = vector.load %arg6[%c0_360, %c1_361, %c4_362] : memref<4x9x72xf32, #tpu.memory_space<vmem>>, vector<1x8x64xf32>
    %570 = vector.shape_cast %569 : vector<1x8x64xf32> to vector<8x64xf32>
    %571 = vector.broadcast %568 : vector<1x64xf32> to vector<8x64xf32>
    %572 = arith.mulf %571, %570 : vector<8x64xf32>
    %573 = arith.addf %567, %572 : vector<8x64xf32>
    %c8_363 = arith.constant 8 : index
    %c0_364 = arith.constant 0 : index
    %574 = vector.load %arg3[%c8_363, %c0_364] : memref<144x64xf32, #tpu.memory_space<vmem>>, vector<1x64xf32>
    %c0_365 = arith.constant 0 : index
    %c1_366 = arith.constant 1 : index
    %c6_367 = arith.constant 6 : index
    %575 = vector.load %arg6[%c0_365, %c1_366, %c6_367] : memref<4x9x72xf32, #tpu.memory_space<vmem>>, vector<1x8x64xf32>
    %576 = vector.shape_cast %575 : vector<1x8x64xf32> to vector<8x64xf32>
    %577 = vector.broadcast %574 : vector<1x64xf32> to vector<8x64xf32>
    %578 = arith.mulf %577, %576 : vector<8x64xf32>
    %579 = arith.addf %573, %578 : vector<8x64xf32>
    %c9_368 = arith.constant 9 : index
    %c0_369 = arith.constant 0 : index
    %580 = vector.load %arg3[%c9_368, %c0_369] : memref<144x64xf32, #tpu.memory_space<vmem>>, vector<1x64xf32>
    %c1_370 = arith.constant 1 : index
    %c0_371 = arith.constant 0 : index
    %c2_372 = arith.constant 2 : index
    %581 = vector.load %arg6[%c1_370, %c0_371, %c2_372] : memref<4x9x72xf32, #tpu.memory_space<vmem>>, vector<1x8x64xf32>
    %582 = vector.shape_cast %581 : vector<1x8x64xf32> to vector<8x64xf32>
    %583 = vector.broadcast %580 : vector<1x64xf32> to vector<8x64xf32>
    %584 = arith.mulf %583, %582 : vector<8x64xf32>
    %585 = arith.addf %579, %584 : vector<8x64xf32>
    %c10_373 = arith.constant 10 : index
    %c0_374 = arith.constant 0 : index
    %586 = vector.load %arg3[%c10_373, %c0_374] : memref<144x64xf32, #tpu.memory_space<vmem>>, vector<1x64xf32>
    %c1_375 = arith.constant 1 : index
    %c0_376 = arith.constant 0 : index
    %c4_377 = arith.constant 4 : index
    %587 = vector.load %arg6[%c1_375, %c0_376, %c4_377] : memref<4x9x72xf32, #tpu.memory_space<vmem>>, vector<1x8x64xf32>
    %588 = vector.shape_cast %587 : vector<1x8x64xf32> to vector<8x64xf32>
    %589 = vector.broadcast %586 : vector<1x64xf32> to vector<8x64xf32>
    %590 = arith.mulf %589, %588 : vector<8x64xf32>
    %591 = arith.addf %585, %590 : vector<8x64xf32>
    %c11_378 = arith.constant 11 : index
    %c0_379 = arith.constant 0 : index
    %592 = vector.load %arg3[%c11_378, %c0_379] : memref<144x64xf32, #tpu.memory_space<vmem>>, vector<1x64xf32>
    %c1_380 = arith.constant 1 : index
    %c0_381 = arith.constant 0 : index
    %c6_382 = arith.constant 6 : index
    %593 = vector.load %arg6[%c1_380, %c0_381, %c6_382] : memref<4x9x72xf32, #tpu.memory_space<vmem>>, vector<1x8x64xf32>
    %594 = vector.shape_cast %593 : vector<1x8x64xf32> to vector<8x64xf32>
    %595 = vector.broadcast %592 : vector<1x64xf32> to vector<8x64xf32>
    %596 = arith.mulf %595, %594 : vector<8x64xf32>
    %597 = arith.addf %591, %596 : vector<8x64xf32>
    %c12_383 = arith.constant 12 : index
    %c0_384 = arith.constant 0 : index
    %598 = vector.load %arg3[%c12_383, %c0_384] : memref<144x64xf32, #tpu.memory_space<vmem>>, vector<1x64xf32>
    %c1_385 = arith.constant 1 : index
    %c1_386 = arith.constant 1 : index
    %c2_387 = arith.constant 2 : index
    %599 = vector.load %arg7[%c1_385, %c1_386, %c2_387] : memref<4x9x72xf32, #tpu.memory_space<vmem>>, vector<1x8x64xf32>
    %600 = vector.shape_cast %599 : vector<1x8x64xf32> to vector<8x64xf32>
    %601 = vector.broadcast %598 : vector<1x64xf32> to vector<8x64xf32>
    %602 = arith.mulf %601, %600 : vector<8x64xf32>
    %603 = arith.addf %597, %602 : vector<8x64xf32>
    %c13_388 = arith.constant 13 : index
    %c0_389 = arith.constant 0 : index
    %604 = vector.load %arg3[%c13_388, %c0_389] : memref<144x64xf32, #tpu.memory_space<vmem>>, vector<1x64xf32>
    %c1_390 = arith.constant 1 : index
    %c1_391 = arith.constant 1 : index
    %c4_392 = arith.constant 4 : index
    %605 = vector.load %arg7[%c1_390, %c1_391, %c4_392] : memref<4x9x72xf32, #tpu.memory_space<vmem>>, vector<1x8x64xf32>
    %606 = vector.shape_cast %605 : vector<1x8x64xf32> to vector<8x64xf32>
    %607 = vector.broadcast %604 : vector<1x64xf32> to vector<8x64xf32>
    %608 = arith.mulf %607, %606 : vector<8x64xf32>
    %609 = arith.addf %603, %608 : vector<8x64xf32>
    %c14_393 = arith.constant 14 : index
    %c0_394 = arith.constant 0 : index
    %610 = vector.load %arg3[%c14_393, %c0_394] : memref<144x64xf32, #tpu.memory_space<vmem>>, vector<1x64xf32>
    %c1_395 = arith.constant 1 : index
    %c1_396 = arith.constant 1 : index
    %c6_397 = arith.constant 6 : index
    %611 = vector.load %arg7[%c1_395, %c1_396, %c6_397] : memref<4x9x72xf32, #tpu.memory_space<vmem>>, vector<1x8x64xf32>
    %612 = vector.shape_cast %611 : vector<1x8x64xf32> to vector<8x64xf32>
    %613 = vector.broadcast %610 : vector<1x64xf32> to vector<8x64xf32>
    %614 = arith.mulf %613, %612 : vector<8x64xf32>
    %615 = arith.addf %609, %614 : vector<8x64xf32>
    %c15_398 = arith.constant 15 : index
    %c0_399 = arith.constant 0 : index
    %616 = vector.load %arg3[%c15_398, %c0_399] : memref<144x64xf32, #tpu.memory_space<vmem>>, vector<1x64xf32>
    %c1_400 = arith.constant 1 : index
    %c1_401 = arith.constant 1 : index
    %c2_402 = arith.constant 2 : index
    %617 = vector.load %arg6[%c1_400, %c1_401, %c2_402] : memref<4x9x72xf32, #tpu.memory_space<vmem>>, vector<1x8x64xf32>
    %618 = vector.shape_cast %617 : vector<1x8x64xf32> to vector<8x64xf32>
    %619 = vector.broadcast %616 : vector<1x64xf32> to vector<8x64xf32>
    %620 = arith.mulf %619, %618 : vector<8x64xf32>
    %621 = arith.addf %615, %620 : vector<8x64xf32>
    %c16_403 = arith.constant 16 : index
    %c0_404 = arith.constant 0 : index
    %622 = vector.load %arg3[%c16_403, %c0_404] : memref<144x64xf32, #tpu.memory_space<vmem>>, vector<1x64xf32>
    %c1_405 = arith.constant 1 : index
    %c1_406 = arith.constant 1 : index
    %c4_407 = arith.constant 4 : index
    %623 = vector.load %arg6[%c1_405, %c1_406, %c4_407] : memref<4x9x72xf32, #tpu.memory_space<vmem>>, vector<1x8x64xf32>
    %624 = vector.shape_cast %623 : vector<1x8x64xf32> to vector<8x64xf32>
    %625 = vector.broadcast %622 : vector<1x64xf32> to vector<8x64xf32>
    %626 = arith.mulf %625, %624 : vector<8x64xf32>
    %627 = arith.addf %621, %626 : vector<8x64xf32>
    %c17_408 = arith.constant 17 : index
    %c0_409 = arith.constant 0 : index
    %628 = vector.load %arg3[%c17_408, %c0_409] : memref<144x64xf32, #tpu.memory_space<vmem>>, vector<1x64xf32>
    %c1_410 = arith.constant 1 : index
    %c1_411 = arith.constant 1 : index
    %c6_412 = arith.constant 6 : index
    %629 = vector.load %arg6[%c1_410, %c1_411, %c6_412] : memref<4x9x72xf32, #tpu.memory_space<vmem>>, vector<1x8x64xf32>
    %630 = vector.shape_cast %629 : vector<1x8x64xf32> to vector<8x64xf32>
    %631 = vector.broadcast %628 : vector<1x64xf32> to vector<8x64xf32>
    %632 = arith.mulf %631, %630 : vector<8x64xf32>
    %633 = arith.addf %627, %632 : vector<8x64xf32>
    %c18_413 = arith.constant 18 : index
    %c0_414 = arith.constant 0 : index
    %634 = vector.load %arg3[%c18_413, %c0_414] : memref<144x64xf32, #tpu.memory_space<vmem>>, vector<1x64xf32>
    %c2_415 = arith.constant 2 : index
    %c0_416 = arith.constant 0 : index
    %c2_417 = arith.constant 2 : index
    %635 = vector.load %arg6[%c2_415, %c0_416, %c2_417] : memref<4x9x72xf32, #tpu.memory_space<vmem>>, vector<1x8x64xf32>
    %636 = vector.shape_cast %635 : vector<1x8x64xf32> to vector<8x64xf32>
    %637 = vector.broadcast %634 : vector<1x64xf32> to vector<8x64xf32>
    %638 = arith.mulf %637, %636 : vector<8x64xf32>
    %639 = arith.addf %633, %638 : vector<8x64xf32>
    %c19_418 = arith.constant 19 : index
    %c0_419 = arith.constant 0 : index
    %640 = vector.load %arg3[%c19_418, %c0_419] : memref<144x64xf32, #tpu.memory_space<vmem>>, vector<1x64xf32>
    %c2_420 = arith.constant 2 : index
    %c0_421 = arith.constant 0 : index
    %c4_422 = arith.constant 4 : index
    %641 = vector.load %arg6[%c2_420, %c0_421, %c4_422] : memref<4x9x72xf32, #tpu.memory_space<vmem>>, vector<1x8x64xf32>
    %642 = vector.shape_cast %641 : vector<1x8x64xf32> to vector<8x64xf32>
    %643 = vector.broadcast %640 : vector<1x64xf32> to vector<8x64xf32>
    %644 = arith.mulf %643, %642 : vector<8x64xf32>
    %645 = arith.addf %639, %644 : vector<8x64xf32>
    %c20_423 = arith.constant 20 : index
    %c0_424 = arith.constant 0 : index
    %646 = vector.load %arg3[%c20_423, %c0_424] : memref<144x64xf32, #tpu.memory_space<vmem>>, vector<1x64xf32>
    %c2_425 = arith.constant 2 : index
    %c0_426 = arith.constant 0 : index
    %c6_427 = arith.constant 6 : index
    %647 = vector.load %arg6[%c2_425, %c0_426, %c6_427] : memref<4x9x72xf32, #tpu.memory_space<vmem>>, vector<1x8x64xf32>
    %648 = vector.shape_cast %647 : vector<1x8x64xf32> to vector<8x64xf32>
    %649 = vector.broadcast %646 : vector<1x64xf32> to vector<8x64xf32>
    %650 = arith.mulf %649, %648 : vector<8x64xf32>
    %651 = arith.addf %645, %650 : vector<8x64xf32>
    %c21_428 = arith.constant 21 : index
    %c0_429 = arith.constant 0 : index
    %652 = vector.load %arg3[%c21_428, %c0_429] : memref<144x64xf32, #tpu.memory_space<vmem>>, vector<1x64xf32>
    %c2_430 = arith.constant 2 : index
    %c1_431 = arith.constant 1 : index
    %c2_432 = arith.constant 2 : index
    %653 = vector.load %arg7[%c2_430, %c1_431, %c2_432] : memref<4x9x72xf32, #tpu.memory_space<vmem>>, vector<1x8x64xf32>
    %654 = vector.shape_cast %653 : vector<1x8x64xf32> to vector<8x64xf32>
    %655 = vector.broadcast %652 : vector<1x64xf32> to vector<8x64xf32>
    %656 = arith.mulf %655, %654 : vector<8x64xf32>
    %657 = arith.addf %651, %656 : vector<8x64xf32>
    %c22_433 = arith.constant 22 : index
    %c0_434 = arith.constant 0 : index
    %658 = vector.load %arg3[%c22_433, %c0_434] : memref<144x64xf32, #tpu.memory_space<vmem>>, vector<1x64xf32>
    %c2_435 = arith.constant 2 : index
    %c1_436 = arith.constant 1 : index
    %c4_437 = arith.constant 4 : index
    %659 = vector.load %arg7[%c2_435, %c1_436, %c4_437] : memref<4x9x72xf32, #tpu.memory_space<vmem>>, vector<1x8x64xf32>
    %660 = vector.shape_cast %659 : vector<1x8x64xf32> to vector<8x64xf32>
    %661 = vector.broadcast %658 : vector<1x64xf32> to vector<8x64xf32>
    %662 = arith.mulf %661, %660 : vector<8x64xf32>
    %663 = arith.addf %657, %662 : vector<8x64xf32>
    %c23_438 = arith.constant 23 : index
    %c0_439 = arith.constant 0 : index
    %664 = vector.load %arg3[%c23_438, %c0_439] : memref<144x64xf32, #tpu.memory_space<vmem>>, vector<1x64xf32>
    %c2_440 = arith.constant 2 : index
    %c1_441 = arith.constant 1 : index
    %c6_442 = arith.constant 6 : index
    %665 = vector.load %arg7[%c2_440, %c1_441, %c6_442] : memref<4x9x72xf32, #tpu.memory_space<vmem>>, vector<1x8x64xf32>
    %666 = vector.shape_cast %665 : vector<1x8x64xf32> to vector<8x64xf32>
    %667 = vector.broadcast %664 : vector<1x64xf32> to vector<8x64xf32>
    %668 = arith.mulf %667, %666 : vector<8x64xf32>
    %669 = arith.addf %663, %668 : vector<8x64xf32>
    %c24_443 = arith.constant 24 : index
    %c0_444 = arith.constant 0 : index
    %670 = vector.load %arg3[%c24_443, %c0_444] : memref<144x64xf32, #tpu.memory_space<vmem>>, vector<1x64xf32>
    %c2_445 = arith.constant 2 : index
    %c1_446 = arith.constant 1 : index
    %c2_447 = arith.constant 2 : index
    %671 = vector.load %arg6[%c2_445, %c1_446, %c2_447] : memref<4x9x72xf32, #tpu.memory_space<vmem>>, vector<1x8x64xf32>
    %672 = vector.shape_cast %671 : vector<1x8x64xf32> to vector<8x64xf32>
    %673 = vector.broadcast %670 : vector<1x64xf32> to vector<8x64xf32>
    %674 = arith.mulf %673, %672 : vector<8x64xf32>
    %675 = arith.addf %669, %674 : vector<8x64xf32>
    %c25_448 = arith.constant 25 : index
    %c0_449 = arith.constant 0 : index
    %676 = vector.load %arg3[%c25_448, %c0_449] : memref<144x64xf32, #tpu.memory_space<vmem>>, vector<1x64xf32>
    %c2_450 = arith.constant 2 : index
    %c1_451 = arith.constant 1 : index
    %c4_452 = arith.constant 4 : index
    %677 = vector.load %arg6[%c2_450, %c1_451, %c4_452] : memref<4x9x72xf32, #tpu.memory_space<vmem>>, vector<1x8x64xf32>
    %678 = vector.shape_cast %677 : vector<1x8x64xf32> to vector<8x64xf32>
    %679 = vector.broadcast %676 : vector<1x64xf32> to vector<8x64xf32>
    %680 = arith.mulf %679, %678 : vector<8x64xf32>
    %681 = arith.addf %675, %680 : vector<8x64xf32>
    %c26_453 = arith.constant 26 : index
    %c0_454 = arith.constant 0 : index
    %682 = vector.load %arg3[%c26_453, %c0_454] : memref<144x64xf32, #tpu.memory_space<vmem>>, vector<1x64xf32>
    %c2_455 = arith.constant 2 : index
    %c1_456 = arith.constant 1 : index
    %c6_457 = arith.constant 6 : index
    %683 = vector.load %arg6[%c2_455, %c1_456, %c6_457] : memref<4x9x72xf32, #tpu.memory_space<vmem>>, vector<1x8x64xf32>
    %684 = vector.shape_cast %683 : vector<1x8x64xf32> to vector<8x64xf32>
    %685 = vector.broadcast %682 : vector<1x64xf32> to vector<8x64xf32>
    %686 = arith.mulf %685, %684 : vector<8x64xf32>
    %687 = arith.addf %681, %686 : vector<8x64xf32>
    %c27_458 = arith.constant 27 : index
    %c0_459 = arith.constant 0 : index
    %688 = vector.load %arg3[%c27_458, %c0_459] : memref<144x64xf32, #tpu.memory_space<vmem>>, vector<1x64xf32>
    %c3_460 = arith.constant 3 : index
    %c0_461 = arith.constant 0 : index
    %c2_462 = arith.constant 2 : index
    %689 = vector.load %arg6[%c3_460, %c0_461, %c2_462] : memref<4x9x72xf32, #tpu.memory_space<vmem>>, vector<1x8x64xf32>
    %690 = vector.shape_cast %689 : vector<1x8x64xf32> to vector<8x64xf32>
    %691 = vector.broadcast %688 : vector<1x64xf32> to vector<8x64xf32>
    %692 = arith.mulf %691, %690 : vector<8x64xf32>
    %693 = arith.addf %687, %692 : vector<8x64xf32>
    %c28_463 = arith.constant 28 : index
    %c0_464 = arith.constant 0 : index
    %694 = vector.load %arg3[%c28_463, %c0_464] : memref<144x64xf32, #tpu.memory_space<vmem>>, vector<1x64xf32>
    %c3_465 = arith.constant 3 : index
    %c0_466 = arith.constant 0 : index
    %c4_467 = arith.constant 4 : index
    %695 = vector.load %arg6[%c3_465, %c0_466, %c4_467] : memref<4x9x72xf32, #tpu.memory_space<vmem>>, vector<1x8x64xf32>
    %696 = vector.shape_cast %695 : vector<1x8x64xf32> to vector<8x64xf32>
    %697 = vector.broadcast %694 : vector<1x64xf32> to vector<8x64xf32>
    %698 = arith.mulf %697, %696 : vector<8x64xf32>
    %699 = arith.addf %693, %698 : vector<8x64xf32>
    %c29_468 = arith.constant 29 : index
    %c0_469 = arith.constant 0 : index
    %700 = vector.load %arg3[%c29_468, %c0_469] : memref<144x64xf32, #tpu.memory_space<vmem>>, vector<1x64xf32>
    %c3_470 = arith.constant 3 : index
    %c0_471 = arith.constant 0 : index
    %c6_472 = arith.constant 6 : index
    %701 = vector.load %arg6[%c3_470, %c0_471, %c6_472] : memref<4x9x72xf32, #tpu.memory_space<vmem>>, vector<1x8x64xf32>
    %702 = vector.shape_cast %701 : vector<1x8x64xf32> to vector<8x64xf32>
    %703 = vector.broadcast %700 : vector<1x64xf32> to vector<8x64xf32>
    %704 = arith.mulf %703, %702 : vector<8x64xf32>
    %705 = arith.addf %699, %704 : vector<8x64xf32>
    %c30_473 = arith.constant 30 : index
    %c0_474 = arith.constant 0 : index
    %706 = vector.load %arg3[%c30_473, %c0_474] : memref<144x64xf32, #tpu.memory_space<vmem>>, vector<1x64xf32>
    %c3_475 = arith.constant 3 : index
    %c1_476 = arith.constant 1 : index
    %c2_477 = arith.constant 2 : index
    %707 = vector.load %arg7[%c3_475, %c1_476, %c2_477] : memref<4x9x72xf32, #tpu.memory_space<vmem>>, vector<1x8x64xf32>
    %708 = vector.shape_cast %707 : vector<1x8x64xf32> to vector<8x64xf32>
    %709 = vector.broadcast %706 : vector<1x64xf32> to vector<8x64xf32>
    %710 = arith.mulf %709, %708 : vector<8x64xf32>
    %711 = arith.addf %705, %710 : vector<8x64xf32>
    %c31_478 = arith.constant 31 : index
    %c0_479 = arith.constant 0 : index
    %712 = vector.load %arg3[%c31_478, %c0_479] : memref<144x64xf32, #tpu.memory_space<vmem>>, vector<1x64xf32>
    %c3_480 = arith.constant 3 : index
    %c1_481 = arith.constant 1 : index
    %c4_482 = arith.constant 4 : index
    %713 = vector.load %arg7[%c3_480, %c1_481, %c4_482] : memref<4x9x72xf32, #tpu.memory_space<vmem>>, vector<1x8x64xf32>
    %714 = vector.shape_cast %713 : vector<1x8x64xf32> to vector<8x64xf32>
    %715 = vector.broadcast %712 : vector<1x64xf32> to vector<8x64xf32>
    %716 = arith.mulf %715, %714 : vector<8x64xf32>
    %717 = arith.addf %711, %716 : vector<8x64xf32>
    %c32_483 = arith.constant 32 : index
    %c0_484 = arith.constant 0 : index
    %718 = vector.load %arg3[%c32_483, %c0_484] : memref<144x64xf32, #tpu.memory_space<vmem>>, vector<1x64xf32>
    %c3_485 = arith.constant 3 : index
    %c1_486 = arith.constant 1 : index
    %c6_487 = arith.constant 6 : index
    %719 = vector.load %arg7[%c3_485, %c1_486, %c6_487] : memref<4x9x72xf32, #tpu.memory_space<vmem>>, vector<1x8x64xf32>
    %720 = vector.shape_cast %719 : vector<1x8x64xf32> to vector<8x64xf32>
    %721 = vector.broadcast %718 : vector<1x64xf32> to vector<8x64xf32>
    %722 = arith.mulf %721, %720 : vector<8x64xf32>
    %723 = arith.addf %717, %722 : vector<8x64xf32>
    %c33_488 = arith.constant 33 : index
    %c0_489 = arith.constant 0 : index
    %724 = vector.load %arg3[%c33_488, %c0_489] : memref<144x64xf32, #tpu.memory_space<vmem>>, vector<1x64xf32>
    %c3_490 = arith.constant 3 : index
    %c1_491 = arith.constant 1 : index
    %c2_492 = arith.constant 2 : index
    %725 = vector.load %arg6[%c3_490, %c1_491, %c2_492] : memref<4x9x72xf32, #tpu.memory_space<vmem>>, vector<1x8x64xf32>
    %726 = vector.shape_cast %725 : vector<1x8x64xf32> to vector<8x64xf32>
    %727 = vector.broadcast %724 : vector<1x64xf32> to vector<8x64xf32>
    %728 = arith.mulf %727, %726 : vector<8x64xf32>
    %729 = arith.addf %723, %728 : vector<8x64xf32>
    %c34_493 = arith.constant 34 : index
    %c0_494 = arith.constant 0 : index
    %730 = vector.load %arg3[%c34_493, %c0_494] : memref<144x64xf32, #tpu.memory_space<vmem>>, vector<1x64xf32>
    %c3_495 = arith.constant 3 : index
    %c1_496 = arith.constant 1 : index
    %c4_497 = arith.constant 4 : index
    %731 = vector.load %arg6[%c3_495, %c1_496, %c4_497] : memref<4x9x72xf32, #tpu.memory_space<vmem>>, vector<1x8x64xf32>
    %732 = vector.shape_cast %731 : vector<1x8x64xf32> to vector<8x64xf32>
    %733 = vector.broadcast %730 : vector<1x64xf32> to vector<8x64xf32>
    %734 = arith.mulf %733, %732 : vector<8x64xf32>
    %735 = arith.addf %729, %734 : vector<8x64xf32>
    %c35_498 = arith.constant 35 : index
    %c0_499 = arith.constant 0 : index
    %736 = vector.load %arg3[%c35_498, %c0_499] : memref<144x64xf32, #tpu.memory_space<vmem>>, vector<1x64xf32>
    %c3_500 = arith.constant 3 : index
    %c1_501 = arith.constant 1 : index
    %c6_502 = arith.constant 6 : index
    %737 = vector.load %arg6[%c3_500, %c1_501, %c6_502] : memref<4x9x72xf32, #tpu.memory_space<vmem>>, vector<1x8x64xf32>
    %738 = vector.shape_cast %737 : vector<1x8x64xf32> to vector<8x64xf32>
    %739 = vector.broadcast %736 : vector<1x64xf32> to vector<8x64xf32>
    %740 = arith.mulf %739, %738 : vector<8x64xf32>
    %741 = arith.addf %735, %740 : vector<8x64xf32>
    %cst_503 = arith.constant 0.000000e+00 : f32
    %742 = vector.broadcast %cst_503 : f32 to vector<8x64xf32>
    %c36_504 = arith.constant 36 : index
    %c0_505 = arith.constant 0 : index
    %743 = vector.load %arg3[%c36_504, %c0_505] : memref<144x64xf32, #tpu.memory_space<vmem>>, vector<1x64xf32>
    %c0_506 = arith.constant 0 : index
    %c0_507 = arith.constant 0 : index
    %c2_508 = arith.constant 2 : index
    %744 = vector.load %arg6[%c0_506, %c0_507, %c2_508] : memref<4x9x72xf32, #tpu.memory_space<vmem>>, vector<1x8x64xf32>
    %745 = vector.shape_cast %744 : vector<1x8x64xf32> to vector<8x64xf32>
    %746 = vector.broadcast %743 : vector<1x64xf32> to vector<8x64xf32>
    %747 = arith.mulf %746, %745 : vector<8x64xf32>
    %748 = arith.addf %742, %747 : vector<8x64xf32>
    %c37_509 = arith.constant 37 : index
    %c0_510 = arith.constant 0 : index
    %749 = vector.load %arg3[%c37_509, %c0_510] : memref<144x64xf32, #tpu.memory_space<vmem>>, vector<1x64xf32>
    %c0_511 = arith.constant 0 : index
    %c0_512 = arith.constant 0 : index
    %c4_513 = arith.constant 4 : index
    %750 = vector.load %arg6[%c0_511, %c0_512, %c4_513] : memref<4x9x72xf32, #tpu.memory_space<vmem>>, vector<1x8x64xf32>
    %751 = vector.shape_cast %750 : vector<1x8x64xf32> to vector<8x64xf32>
    %752 = vector.broadcast %749 : vector<1x64xf32> to vector<8x64xf32>
    %753 = arith.mulf %752, %751 : vector<8x64xf32>
    %754 = arith.addf %748, %753 : vector<8x64xf32>
    %c38_514 = arith.constant 38 : index
    %c0_515 = arith.constant 0 : index
    %755 = vector.load %arg3[%c38_514, %c0_515] : memref<144x64xf32, #tpu.memory_space<vmem>>, vector<1x64xf32>
    %c0_516 = arith.constant 0 : index
    %c0_517 = arith.constant 0 : index
    %c6_518 = arith.constant 6 : index
    %756 = vector.load %arg6[%c0_516, %c0_517, %c6_518] : memref<4x9x72xf32, #tpu.memory_space<vmem>>, vector<1x8x64xf32>
    %757 = vector.shape_cast %756 : vector<1x8x64xf32> to vector<8x64xf32>
    %758 = vector.broadcast %755 : vector<1x64xf32> to vector<8x64xf32>
    %759 = arith.mulf %758, %757 : vector<8x64xf32>
    %760 = arith.addf %754, %759 : vector<8x64xf32>
    %c39_519 = arith.constant 39 : index
    %c0_520 = arith.constant 0 : index
    %761 = vector.load %arg3[%c39_519, %c0_520] : memref<144x64xf32, #tpu.memory_space<vmem>>, vector<1x64xf32>
    %c0_521 = arith.constant 0 : index
    %c1_522 = arith.constant 1 : index
    %c2_523 = arith.constant 2 : index
    %762 = vector.load %arg7[%c0_521, %c1_522, %c2_523] : memref<4x9x72xf32, #tpu.memory_space<vmem>>, vector<1x8x64xf32>
    %763 = vector.shape_cast %762 : vector<1x8x64xf32> to vector<8x64xf32>
    %764 = vector.broadcast %761 : vector<1x64xf32> to vector<8x64xf32>
    %765 = arith.mulf %764, %763 : vector<8x64xf32>
    %766 = arith.addf %760, %765 : vector<8x64xf32>
    %c40_524 = arith.constant 40 : index
    %c0_525 = arith.constant 0 : index
    %767 = vector.load %arg3[%c40_524, %c0_525] : memref<144x64xf32, #tpu.memory_space<vmem>>, vector<1x64xf32>
    %c0_526 = arith.constant 0 : index
    %c1_527 = arith.constant 1 : index
    %c4_528 = arith.constant 4 : index
    %768 = vector.load %arg7[%c0_526, %c1_527, %c4_528] : memref<4x9x72xf32, #tpu.memory_space<vmem>>, vector<1x8x64xf32>
    %769 = vector.shape_cast %768 : vector<1x8x64xf32> to vector<8x64xf32>
    %770 = vector.broadcast %767 : vector<1x64xf32> to vector<8x64xf32>
    %771 = arith.mulf %770, %769 : vector<8x64xf32>
    %772 = arith.addf %766, %771 : vector<8x64xf32>
    %c41_529 = arith.constant 41 : index
    %c0_530 = arith.constant 0 : index
    %773 = vector.load %arg3[%c41_529, %c0_530] : memref<144x64xf32, #tpu.memory_space<vmem>>, vector<1x64xf32>
    %c0_531 = arith.constant 0 : index
    %c1_532 = arith.constant 1 : index
    %c6_533 = arith.constant 6 : index
    %774 = vector.load %arg7[%c0_531, %c1_532, %c6_533] : memref<4x9x72xf32, #tpu.memory_space<vmem>>, vector<1x8x64xf32>
    %775 = vector.shape_cast %774 : vector<1x8x64xf32> to vector<8x64xf32>
    %776 = vector.broadcast %773 : vector<1x64xf32> to vector<8x64xf32>
    %777 = arith.mulf %776, %775 : vector<8x64xf32>
    %778 = arith.addf %772, %777 : vector<8x64xf32>
    %c42_534 = arith.constant 42 : index
    %c0_535 = arith.constant 0 : index
    %779 = vector.load %arg3[%c42_534, %c0_535] : memref<144x64xf32, #tpu.memory_space<vmem>>, vector<1x64xf32>
    %c0_536 = arith.constant 0 : index
    %c1_537 = arith.constant 1 : index
    %c2_538 = arith.constant 2 : index
    %780 = vector.load %arg6[%c0_536, %c1_537, %c2_538] : memref<4x9x72xf32, #tpu.memory_space<vmem>>, vector<1x8x64xf32>
    %781 = vector.shape_cast %780 : vector<1x8x64xf32> to vector<8x64xf32>
    %782 = vector.broadcast %779 : vector<1x64xf32> to vector<8x64xf32>
    %783 = arith.mulf %782, %781 : vector<8x64xf32>
    %784 = arith.addf %778, %783 : vector<8x64xf32>
    %c43_539 = arith.constant 43 : index
    %c0_540 = arith.constant 0 : index
    %785 = vector.load %arg3[%c43_539, %c0_540] : memref<144x64xf32, #tpu.memory_space<vmem>>, vector<1x64xf32>
    %c0_541 = arith.constant 0 : index
    %c1_542 = arith.constant 1 : index
    %c4_543 = arith.constant 4 : index
    %786 = vector.load %arg6[%c0_541, %c1_542, %c4_543] : memref<4x9x72xf32, #tpu.memory_space<vmem>>, vector<1x8x64xf32>
    %787 = vector.shape_cast %786 : vector<1x8x64xf32> to vector<8x64xf32>
    %788 = vector.broadcast %785 : vector<1x64xf32> to vector<8x64xf32>
    %789 = arith.mulf %788, %787 : vector<8x64xf32>
    %790 = arith.addf %784, %789 : vector<8x64xf32>
    %c44_544 = arith.constant 44 : index
    %c0_545 = arith.constant 0 : index
    %791 = vector.load %arg3[%c44_544, %c0_545] : memref<144x64xf32, #tpu.memory_space<vmem>>, vector<1x64xf32>
    %c0_546 = arith.constant 0 : index
    %c1_547 = arith.constant 1 : index
    %c6_548 = arith.constant 6 : index
    %792 = vector.load %arg6[%c0_546, %c1_547, %c6_548] : memref<4x9x72xf32, #tpu.memory_space<vmem>>, vector<1x8x64xf32>
    %793 = vector.shape_cast %792 : vector<1x8x64xf32> to vector<8x64xf32>
    %794 = vector.broadcast %791 : vector<1x64xf32> to vector<8x64xf32>
    %795 = arith.mulf %794, %793 : vector<8x64xf32>
    %796 = arith.addf %790, %795 : vector<8x64xf32>
    %c45_549 = arith.constant 45 : index
    %c0_550 = arith.constant 0 : index
    %797 = vector.load %arg3[%c45_549, %c0_550] : memref<144x64xf32, #tpu.memory_space<vmem>>, vector<1x64xf32>
    %c1_551 = arith.constant 1 : index
    %c0_552 = arith.constant 0 : index
    %c2_553 = arith.constant 2 : index
    %798 = vector.load %arg6[%c1_551, %c0_552, %c2_553] : memref<4x9x72xf32, #tpu.memory_space<vmem>>, vector<1x8x64xf32>
    %799 = vector.shape_cast %798 : vector<1x8x64xf32> to vector<8x64xf32>
    %800 = vector.broadcast %797 : vector<1x64xf32> to vector<8x64xf32>
    %801 = arith.mulf %800, %799 : vector<8x64xf32>
    %802 = arith.addf %796, %801 : vector<8x64xf32>
    %c46_554 = arith.constant 46 : index
    %c0_555 = arith.constant 0 : index
    %803 = vector.load %arg3[%c46_554, %c0_555] : memref<144x64xf32, #tpu.memory_space<vmem>>, vector<1x64xf32>
    %c1_556 = arith.constant 1 : index
    %c0_557 = arith.constant 0 : index
    %c4_558 = arith.constant 4 : index
    %804 = vector.load %arg6[%c1_556, %c0_557, %c4_558] : memref<4x9x72xf32, #tpu.memory_space<vmem>>, vector<1x8x64xf32>
    %805 = vector.shape_cast %804 : vector<1x8x64xf32> to vector<8x64xf32>
    %806 = vector.broadcast %803 : vector<1x64xf32> to vector<8x64xf32>
    %807 = arith.mulf %806, %805 : vector<8x64xf32>
    %808 = arith.addf %802, %807 : vector<8x64xf32>
    %c47_559 = arith.constant 47 : index
    %c0_560 = arith.constant 0 : index
    %809 = vector.load %arg3[%c47_559, %c0_560] : memref<144x64xf32, #tpu.memory_space<vmem>>, vector<1x64xf32>
    %c1_561 = arith.constant 1 : index
    %c0_562 = arith.constant 0 : index
    %c6_563 = arith.constant 6 : index
    %810 = vector.load %arg6[%c1_561, %c0_562, %c6_563] : memref<4x9x72xf32, #tpu.memory_space<vmem>>, vector<1x8x64xf32>
    %811 = vector.shape_cast %810 : vector<1x8x64xf32> to vector<8x64xf32>
    %812 = vector.broadcast %809 : vector<1x64xf32> to vector<8x64xf32>
    %813 = arith.mulf %812, %811 : vector<8x64xf32>
    %814 = arith.addf %808, %813 : vector<8x64xf32>
    %c48_564 = arith.constant 48 : index
    %c0_565 = arith.constant 0 : index
    %815 = vector.load %arg3[%c48_564, %c0_565] : memref<144x64xf32, #tpu.memory_space<vmem>>, vector<1x64xf32>
    %c1_566 = arith.constant 1 : index
    %c1_567 = arith.constant 1 : index
    %c2_568 = arith.constant 2 : index
    %816 = vector.load %arg7[%c1_566, %c1_567, %c2_568] : memref<4x9x72xf32, #tpu.memory_space<vmem>>, vector<1x8x64xf32>
    %817 = vector.shape_cast %816 : vector<1x8x64xf32> to vector<8x64xf32>
    %818 = vector.broadcast %815 : vector<1x64xf32> to vector<8x64xf32>
    %819 = arith.mulf %818, %817 : vector<8x64xf32>
    %820 = arith.addf %814, %819 : vector<8x64xf32>
    %c49_569 = arith.constant 49 : index
    %c0_570 = arith.constant 0 : index
    %821 = vector.load %arg3[%c49_569, %c0_570] : memref<144x64xf32, #tpu.memory_space<vmem>>, vector<1x64xf32>
    %c1_571 = arith.constant 1 : index
    %c1_572 = arith.constant 1 : index
    %c4_573 = arith.constant 4 : index
    %822 = vector.load %arg7[%c1_571, %c1_572, %c4_573] : memref<4x9x72xf32, #tpu.memory_space<vmem>>, vector<1x8x64xf32>
    %823 = vector.shape_cast %822 : vector<1x8x64xf32> to vector<8x64xf32>
    %824 = vector.broadcast %821 : vector<1x64xf32> to vector<8x64xf32>
    %825 = arith.mulf %824, %823 : vector<8x64xf32>
    %826 = arith.addf %820, %825 : vector<8x64xf32>
    %c50_574 = arith.constant 50 : index
    %c0_575 = arith.constant 0 : index
    %827 = vector.load %arg3[%c50_574, %c0_575] : memref<144x64xf32, #tpu.memory_space<vmem>>, vector<1x64xf32>
    %c1_576 = arith.constant 1 : index
    %c1_577 = arith.constant 1 : index
    %c6_578 = arith.constant 6 : index
    %828 = vector.load %arg7[%c1_576, %c1_577, %c6_578] : memref<4x9x72xf32, #tpu.memory_space<vmem>>, vector<1x8x64xf32>
    %829 = vector.shape_cast %828 : vector<1x8x64xf32> to vector<8x64xf32>
    %830 = vector.broadcast %827 : vector<1x64xf32> to vector<8x64xf32>
    %831 = arith.mulf %830, %829 : vector<8x64xf32>
    %832 = arith.addf %826, %831 : vector<8x64xf32>
    %c51_579 = arith.constant 51 : index
    %c0_580 = arith.constant 0 : index
    %833 = vector.load %arg3[%c51_579, %c0_580] : memref<144x64xf32, #tpu.memory_space<vmem>>, vector<1x64xf32>
    %c1_581 = arith.constant 1 : index
    %c1_582 = arith.constant 1 : index
    %c2_583 = arith.constant 2 : index
    %834 = vector.load %arg6[%c1_581, %c1_582, %c2_583] : memref<4x9x72xf32, #tpu.memory_space<vmem>>, vector<1x8x64xf32>
    %835 = vector.shape_cast %834 : vector<1x8x64xf32> to vector<8x64xf32>
    %836 = vector.broadcast %833 : vector<1x64xf32> to vector<8x64xf32>
    %837 = arith.mulf %836, %835 : vector<8x64xf32>
    %838 = arith.addf %832, %837 : vector<8x64xf32>
    %c52_584 = arith.constant 52 : index
    %c0_585 = arith.constant 0 : index
    %839 = vector.load %arg3[%c52_584, %c0_585] : memref<144x64xf32, #tpu.memory_space<vmem>>, vector<1x64xf32>
    %c1_586 = arith.constant 1 : index
    %c1_587 = arith.constant 1 : index
    %c4_588 = arith.constant 4 : index
    %840 = vector.load %arg6[%c1_586, %c1_587, %c4_588] : memref<4x9x72xf32, #tpu.memory_space<vmem>>, vector<1x8x64xf32>
    %841 = vector.shape_cast %840 : vector<1x8x64xf32> to vector<8x64xf32>
    %842 = vector.broadcast %839 : vector<1x64xf32> to vector<8x64xf32>
    %843 = arith.mulf %842, %841 : vector<8x64xf32>
    %844 = arith.addf %838, %843 : vector<8x64xf32>
    %c53_589 = arith.constant 53 : index
    %c0_590 = arith.constant 0 : index
    %845 = vector.load %arg3[%c53_589, %c0_590] : memref<144x64xf32, #tpu.memory_space<vmem>>, vector<1x64xf32>
    %c1_591 = arith.constant 1 : index
    %c1_592 = arith.constant 1 : index
    %c6_593 = arith.constant 6 : index
    %846 = vector.load %arg6[%c1_591, %c1_592, %c6_593] : memref<4x9x72xf32, #tpu.memory_space<vmem>>, vector<1x8x64xf32>
    %847 = vector.shape_cast %846 : vector<1x8x64xf32> to vector<8x64xf32>
    %848 = vector.broadcast %845 : vector<1x64xf32> to vector<8x64xf32>
    %849 = arith.mulf %848, %847 : vector<8x64xf32>
    %850 = arith.addf %844, %849 : vector<8x64xf32>
    %c54_594 = arith.constant 54 : index
    %c0_595 = arith.constant 0 : index
    %851 = vector.load %arg3[%c54_594, %c0_595] : memref<144x64xf32, #tpu.memory_space<vmem>>, vector<1x64xf32>
    %c2_596 = arith.constant 2 : index
    %c0_597 = arith.constant 0 : index
    %c2_598 = arith.constant 2 : index
    %852 = vector.load %arg6[%c2_596, %c0_597, %c2_598] : memref<4x9x72xf32, #tpu.memory_space<vmem>>, vector<1x8x64xf32>
    %853 = vector.shape_cast %852 : vector<1x8x64xf32> to vector<8x64xf32>
    %854 = vector.broadcast %851 : vector<1x64xf32> to vector<8x64xf32>
    %855 = arith.mulf %854, %853 : vector<8x64xf32>
    %856 = arith.addf %850, %855 : vector<8x64xf32>
    %c55_599 = arith.constant 55 : index
    %c0_600 = arith.constant 0 : index
    %857 = vector.load %arg3[%c55_599, %c0_600] : memref<144x64xf32, #tpu.memory_space<vmem>>, vector<1x64xf32>
    %c2_601 = arith.constant 2 : index
    %c0_602 = arith.constant 0 : index
    %c4_603 = arith.constant 4 : index
    %858 = vector.load %arg6[%c2_601, %c0_602, %c4_603] : memref<4x9x72xf32, #tpu.memory_space<vmem>>, vector<1x8x64xf32>
    %859 = vector.shape_cast %858 : vector<1x8x64xf32> to vector<8x64xf32>
    %860 = vector.broadcast %857 : vector<1x64xf32> to vector<8x64xf32>
    %861 = arith.mulf %860, %859 : vector<8x64xf32>
    %862 = arith.addf %856, %861 : vector<8x64xf32>
    %c56_604 = arith.constant 56 : index
    %c0_605 = arith.constant 0 : index
    %863 = vector.load %arg3[%c56_604, %c0_605] : memref<144x64xf32, #tpu.memory_space<vmem>>, vector<1x64xf32>
    %c2_606 = arith.constant 2 : index
    %c0_607 = arith.constant 0 : index
    %c6_608 = arith.constant 6 : index
    %864 = vector.load %arg6[%c2_606, %c0_607, %c6_608] : memref<4x9x72xf32, #tpu.memory_space<vmem>>, vector<1x8x64xf32>
    %865 = vector.shape_cast %864 : vector<1x8x64xf32> to vector<8x64xf32>
    %866 = vector.broadcast %863 : vector<1x64xf32> to vector<8x64xf32>
    %867 = arith.mulf %866, %865 : vector<8x64xf32>
    %868 = arith.addf %862, %867 : vector<8x64xf32>
    %c57_609 = arith.constant 57 : index
    %c0_610 = arith.constant 0 : index
    %869 = vector.load %arg3[%c57_609, %c0_610] : memref<144x64xf32, #tpu.memory_space<vmem>>, vector<1x64xf32>
    %c2_611 = arith.constant 2 : index
    %c1_612 = arith.constant 1 : index
    %c2_613 = arith.constant 2 : index
    %870 = vector.load %arg7[%c2_611, %c1_612, %c2_613] : memref<4x9x72xf32, #tpu.memory_space<vmem>>, vector<1x8x64xf32>
    %871 = vector.shape_cast %870 : vector<1x8x64xf32> to vector<8x64xf32>
    %872 = vector.broadcast %869 : vector<1x64xf32> to vector<8x64xf32>
    %873 = arith.mulf %872, %871 : vector<8x64xf32>
    %874 = arith.addf %868, %873 : vector<8x64xf32>
    %c58_614 = arith.constant 58 : index
    %c0_615 = arith.constant 0 : index
    %875 = vector.load %arg3[%c58_614, %c0_615] : memref<144x64xf32, #tpu.memory_space<vmem>>, vector<1x64xf32>
    %c2_616 = arith.constant 2 : index
    %c1_617 = arith.constant 1 : index
    %c4_618 = arith.constant 4 : index
    %876 = vector.load %arg7[%c2_616, %c1_617, %c4_618] : memref<4x9x72xf32, #tpu.memory_space<vmem>>, vector<1x8x64xf32>
    %877 = vector.shape_cast %876 : vector<1x8x64xf32> to vector<8x64xf32>
    %878 = vector.broadcast %875 : vector<1x64xf32> to vector<8x64xf32>
    %879 = arith.mulf %878, %877 : vector<8x64xf32>
    %880 = arith.addf %874, %879 : vector<8x64xf32>
    %c59_619 = arith.constant 59 : index
    %c0_620 = arith.constant 0 : index
    %881 = vector.load %arg3[%c59_619, %c0_620] : memref<144x64xf32, #tpu.memory_space<vmem>>, vector<1x64xf32>
    %c2_621 = arith.constant 2 : index
    %c1_622 = arith.constant 1 : index
    %c6_623 = arith.constant 6 : index
    %882 = vector.load %arg7[%c2_621, %c1_622, %c6_623] : memref<4x9x72xf32, #tpu.memory_space<vmem>>, vector<1x8x64xf32>
    %883 = vector.shape_cast %882 : vector<1x8x64xf32> to vector<8x64xf32>
    %884 = vector.broadcast %881 : vector<1x64xf32> to vector<8x64xf32>
    %885 = arith.mulf %884, %883 : vector<8x64xf32>
    %886 = arith.addf %880, %885 : vector<8x64xf32>
    %c60_624 = arith.constant 60 : index
    %c0_625 = arith.constant 0 : index
    %887 = vector.load %arg3[%c60_624, %c0_625] : memref<144x64xf32, #tpu.memory_space<vmem>>, vector<1x64xf32>
    %c2_626 = arith.constant 2 : index
    %c1_627 = arith.constant 1 : index
    %c2_628 = arith.constant 2 : index
    %888 = vector.load %arg6[%c2_626, %c1_627, %c2_628] : memref<4x9x72xf32, #tpu.memory_space<vmem>>, vector<1x8x64xf32>
    %889 = vector.shape_cast %888 : vector<1x8x64xf32> to vector<8x64xf32>
    %890 = vector.broadcast %887 : vector<1x64xf32> to vector<8x64xf32>
    %891 = arith.mulf %890, %889 : vector<8x64xf32>
    %892 = arith.addf %886, %891 : vector<8x64xf32>
    %c61_629 = arith.constant 61 : index
    %c0_630 = arith.constant 0 : index
    %893 = vector.load %arg3[%c61_629, %c0_630] : memref<144x64xf32, #tpu.memory_space<vmem>>, vector<1x64xf32>
    %c2_631 = arith.constant 2 : index
    %c1_632 = arith.constant 1 : index
    %c4_633 = arith.constant 4 : index
    %894 = vector.load %arg6[%c2_631, %c1_632, %c4_633] : memref<4x9x72xf32, #tpu.memory_space<vmem>>, vector<1x8x64xf32>
    %895 = vector.shape_cast %894 : vector<1x8x64xf32> to vector<8x64xf32>
    %896 = vector.broadcast %893 : vector<1x64xf32> to vector<8x64xf32>
    %897 = arith.mulf %896, %895 : vector<8x64xf32>
    %898 = arith.addf %892, %897 : vector<8x64xf32>
    %c62_634 = arith.constant 62 : index
    %c0_635 = arith.constant 0 : index
    %899 = vector.load %arg3[%c62_634, %c0_635] : memref<144x64xf32, #tpu.memory_space<vmem>>, vector<1x64xf32>
    %c2_636 = arith.constant 2 : index
    %c1_637 = arith.constant 1 : index
    %c6_638 = arith.constant 6 : index
    %900 = vector.load %arg6[%c2_636, %c1_637, %c6_638] : memref<4x9x72xf32, #tpu.memory_space<vmem>>, vector<1x8x64xf32>
    %901 = vector.shape_cast %900 : vector<1x8x64xf32> to vector<8x64xf32>
    %902 = vector.broadcast %899 : vector<1x64xf32> to vector<8x64xf32>
    %903 = arith.mulf %902, %901 : vector<8x64xf32>
    %904 = arith.addf %898, %903 : vector<8x64xf32>
    %c63_639 = arith.constant 63 : index
    %c0_640 = arith.constant 0 : index
    %905 = vector.load %arg3[%c63_639, %c0_640] : memref<144x64xf32, #tpu.memory_space<vmem>>, vector<1x64xf32>
    %c3_641 = arith.constant 3 : index
    %c0_642 = arith.constant 0 : index
    %c2_643 = arith.constant 2 : index
    %906 = vector.load %arg6[%c3_641, %c0_642, %c2_643] : memref<4x9x72xf32, #tpu.memory_space<vmem>>, vector<1x8x64xf32>
    %907 = vector.shape_cast %906 : vector<1x8x64xf32> to vector<8x64xf32>
    %908 = vector.broadcast %905 : vector<1x64xf32> to vector<8x64xf32>
    %909 = arith.mulf %908, %907 : vector<8x64xf32>
    %910 = arith.addf %904, %909 : vector<8x64xf32>
    %c64_644 = arith.constant 64 : index
    %c0_645 = arith.constant 0 : index
    %911 = vector.load %arg3[%c64_644, %c0_645] : memref<144x64xf32, #tpu.memory_space<vmem>>, vector<1x64xf32>
    %c3_646 = arith.constant 3 : index
    %c0_647 = arith.constant 0 : index
    %c4_648 = arith.constant 4 : index
    %912 = vector.load %arg6[%c3_646, %c0_647, %c4_648] : memref<4x9x72xf32, #tpu.memory_space<vmem>>, vector<1x8x64xf32>
    %913 = vector.shape_cast %912 : vector<1x8x64xf32> to vector<8x64xf32>
    %914 = vector.broadcast %911 : vector<1x64xf32> to vector<8x64xf32>
    %915 = arith.mulf %914, %913 : vector<8x64xf32>
    %916 = arith.addf %910, %915 : vector<8x64xf32>
    %c65_649 = arith.constant 65 : index
    %c0_650 = arith.constant 0 : index
    %917 = vector.load %arg3[%c65_649, %c0_650] : memref<144x64xf32, #tpu.memory_space<vmem>>, vector<1x64xf32>
    %c3_651 = arith.constant 3 : index
    %c0_652 = arith.constant 0 : index
    %c6_653 = arith.constant 6 : index
    %918 = vector.load %arg6[%c3_651, %c0_652, %c6_653] : memref<4x9x72xf32, #tpu.memory_space<vmem>>, vector<1x8x64xf32>
    %919 = vector.shape_cast %918 : vector<1x8x64xf32> to vector<8x64xf32>
    %920 = vector.broadcast %917 : vector<1x64xf32> to vector<8x64xf32>
    %921 = arith.mulf %920, %919 : vector<8x64xf32>
    %922 = arith.addf %916, %921 : vector<8x64xf32>
    %c66_654 = arith.constant 66 : index
    %c0_655 = arith.constant 0 : index
    %923 = vector.load %arg3[%c66_654, %c0_655] : memref<144x64xf32, #tpu.memory_space<vmem>>, vector<1x64xf32>
    %c3_656 = arith.constant 3 : index
    %c1_657 = arith.constant 1 : index
    %c2_658 = arith.constant 2 : index
    %924 = vector.load %arg7[%c3_656, %c1_657, %c2_658] : memref<4x9x72xf32, #tpu.memory_space<vmem>>, vector<1x8x64xf32>
    %925 = vector.shape_cast %924 : vector<1x8x64xf32> to vector<8x64xf32>
    %926 = vector.broadcast %923 : vector<1x64xf32> to vector<8x64xf32>
    %927 = arith.mulf %926, %925 : vector<8x64xf32>
    %928 = arith.addf %922, %927 : vector<8x64xf32>
    %c67_659 = arith.constant 67 : index
    %c0_660 = arith.constant 0 : index
    %929 = vector.load %arg3[%c67_659, %c0_660] : memref<144x64xf32, #tpu.memory_space<vmem>>, vector<1x64xf32>
    %c3_661 = arith.constant 3 : index
    %c1_662 = arith.constant 1 : index
    %c4_663 = arith.constant 4 : index
    %930 = vector.load %arg7[%c3_661, %c1_662, %c4_663] : memref<4x9x72xf32, #tpu.memory_space<vmem>>, vector<1x8x64xf32>
    %931 = vector.shape_cast %930 : vector<1x8x64xf32> to vector<8x64xf32>
    %932 = vector.broadcast %929 : vector<1x64xf32> to vector<8x64xf32>
    %933 = arith.mulf %932, %931 : vector<8x64xf32>
    %934 = arith.addf %928, %933 : vector<8x64xf32>
    %c68_664 = arith.constant 68 : index
    %c0_665 = arith.constant 0 : index
    %935 = vector.load %arg3[%c68_664, %c0_665] : memref<144x64xf32, #tpu.memory_space<vmem>>, vector<1x64xf32>
    %c3_666 = arith.constant 3 : index
    %c1_667 = arith.constant 1 : index
    %c6_668 = arith.constant 6 : index
    %936 = vector.load %arg7[%c3_666, %c1_667, %c6_668] : memref<4x9x72xf32, #tpu.memory_space<vmem>>, vector<1x8x64xf32>
    %937 = vector.shape_cast %936 : vector<1x8x64xf32> to vector<8x64xf32>
    %938 = vector.broadcast %935 : vector<1x64xf32> to vector<8x64xf32>
    %939 = arith.mulf %938, %937 : vector<8x64xf32>
    %940 = arith.addf %934, %939 : vector<8x64xf32>
    %c69_669 = arith.constant 69 : index
    %c0_670 = arith.constant 0 : index
    %941 = vector.load %arg3[%c69_669, %c0_670] : memref<144x64xf32, #tpu.memory_space<vmem>>, vector<1x64xf32>
    %c3_671 = arith.constant 3 : index
    %c1_672 = arith.constant 1 : index
    %c2_673 = arith.constant 2 : index
    %942 = vector.load %arg6[%c3_671, %c1_672, %c2_673] : memref<4x9x72xf32, #tpu.memory_space<vmem>>, vector<1x8x64xf32>
    %943 = vector.shape_cast %942 : vector<1x8x64xf32> to vector<8x64xf32>
    %944 = vector.broadcast %941 : vector<1x64xf32> to vector<8x64xf32>
    %945 = arith.mulf %944, %943 : vector<8x64xf32>
    %946 = arith.addf %940, %945 : vector<8x64xf32>
    %c70_674 = arith.constant 70 : index
    %c0_675 = arith.constant 0 : index
    %947 = vector.load %arg3[%c70_674, %c0_675] : memref<144x64xf32, #tpu.memory_space<vmem>>, vector<1x64xf32>
    %c3_676 = arith.constant 3 : index
    %c1_677 = arith.constant 1 : index
    %c4_678 = arith.constant 4 : index
    %948 = vector.load %arg6[%c3_676, %c1_677, %c4_678] : memref<4x9x72xf32, #tpu.memory_space<vmem>>, vector<1x8x64xf32>
    %949 = vector.shape_cast %948 : vector<1x8x64xf32> to vector<8x64xf32>
    %950 = vector.broadcast %947 : vector<1x64xf32> to vector<8x64xf32>
    %951 = arith.mulf %950, %949 : vector<8x64xf32>
    %952 = arith.addf %946, %951 : vector<8x64xf32>
    %c71_679 = arith.constant 71 : index
    %c0_680 = arith.constant 0 : index
    %953 = vector.load %arg3[%c71_679, %c0_680] : memref<144x64xf32, #tpu.memory_space<vmem>>, vector<1x64xf32>
    %c3_681 = arith.constant 3 : index
    %c1_682 = arith.constant 1 : index
    %c6_683 = arith.constant 6 : index
    %954 = vector.load %arg6[%c3_681, %c1_682, %c6_683] : memref<4x9x72xf32, #tpu.memory_space<vmem>>, vector<1x8x64xf32>
    %955 = vector.shape_cast %954 : vector<1x8x64xf32> to vector<8x64xf32>
    %956 = vector.broadcast %953 : vector<1x64xf32> to vector<8x64xf32>
    %957 = arith.mulf %956, %955 : vector<8x64xf32>
    %958 = arith.addf %952, %957 : vector<8x64xf32>
    %959 = tpu.concatenate %307, %524, %741, %958 in 1 : vector<8x64xf32>, vector<8x64xf32>, vector<8x64xf32>, vector<8x64xf32> -> vector<8x256xf32>
    %c0_684 = arith.constant 0 : index
    %c0_685 = arith.constant 0 : index
    %c0_686 = arith.constant 0 : index
    %c0_687 = arith.constant 0 : index
    %960 = vector.load %arg4[%c0_684, %c0_685, %c0_686, %c0_687] : memref<1x2x8x256xf32, #tpu.memory_space<vmem>>, vector<1x1x8x256xf32>
    %961 = vector.shape_cast %960 : vector<1x1x8x256xf32> to vector<8x256xf32>
    %962 = vector.shape_cast %959 : vector<8x256xf32> to vector<1x1x8x256xf32>
    tpu.vector_store %arg4[%c0_684, %c0_685, %c0_686, %c0_687], %962 {strides = array<i32>} : memref<1x2x8x256xf32, #tpu.memory_space<vmem>>, vector<1x1x8x256xf32>,
    %cst_688 = arith.constant 0.000000e+00 : f32
    %963 = vector.broadcast %cst_688 : f32 to vector<8x64xf32>
    %c72 = arith.constant 72 : index
    %c0_689 = arith.constant 0 : index
    %964 = vector.load %arg3[%c72, %c0_689] : memref<144x64xf32, #tpu.memory_space<vmem>>, vector<1x64xf32>
    %c0_690 = arith.constant 0 : index
    %c0_691 = arith.constant 0 : index
    %c2_692 = arith.constant 2 : index
    %965 = vector.load %arg7[%c0_690, %c0_691, %c2_692] : memref<4x9x72xf32, #tpu.memory_space<vmem>>, vector<1x8x64xf32>
    %966 = vector.shape_cast %965 : vector<1x8x64xf32> to vector<8x64xf32>
    %967 = vector.broadcast %964 : vector<1x64xf32> to vector<8x64xf32>
    %968 = arith.mulf %967, %966 : vector<8x64xf32>
    %969 = arith.addf %963, %968 : vector<8x64xf32>
    %c73 = arith.constant 73 : index
    %c0_693 = arith.constant 0 : index
    %970 = vector.load %arg3[%c73, %c0_693] : memref<144x64xf32, #tpu.memory_space<vmem>>, vector<1x64xf32>
    %c0_694 = arith.constant 0 : index
    %c0_695 = arith.constant 0 : index
    %c4_696 = arith.constant 4 : index
    %971 = vector.load %arg7[%c0_694, %c0_695, %c4_696] : memref<4x9x72xf32, #tpu.memory_space<vmem>>, vector<1x8x64xf32>
    %972 = vector.shape_cast %971 : vector<1x8x64xf32> to vector<8x64xf32>
    %973 = vector.broadcast %970 : vector<1x64xf32> to vector<8x64xf32>
    %974 = arith.mulf %973, %972 : vector<8x64xf32>
    %975 = arith.addf %969, %974 : vector<8x64xf32>
    %c74 = arith.constant 74 : index
    %c0_697 = arith.constant 0 : index
    %976 = vector.load %arg3[%c74, %c0_697] : memref<144x64xf32, #tpu.memory_space<vmem>>, vector<1x64xf32>
    %c0_698 = arith.constant 0 : index
    %c0_699 = arith.constant 0 : index
    %c6_700 = arith.constant 6 : index
    %977 = vector.load %arg7[%c0_698, %c0_699, %c6_700] : memref<4x9x72xf32, #tpu.memory_space<vmem>>, vector<1x8x64xf32>
    %978 = vector.shape_cast %977 : vector<1x8x64xf32> to vector<8x64xf32>
    %979 = vector.broadcast %976 : vector<1x64xf32> to vector<8x64xf32>
    %980 = arith.mulf %979, %978 : vector<8x64xf32>
    %981 = arith.addf %975, %980 : vector<8x64xf32>
    %c75 = arith.constant 75 : index
    %c0_701 = arith.constant 0 : index
    %982 = vector.load %arg3[%c75, %c0_701] : memref<144x64xf32, #tpu.memory_space<vmem>>, vector<1x64xf32>
    %c0_702 = arith.constant 0 : index
    %c0_703 = arith.constant 0 : index
    %c2_704 = arith.constant 2 : index
    %983 = vector.load %arg6[%c0_702, %c0_703, %c2_704] : memref<4x9x72xf32, #tpu.memory_space<vmem>>, vector<1x8x64xf32>
    %984 = vector.shape_cast %983 : vector<1x8x64xf32> to vector<8x64xf32>
    %985 = vector.broadcast %982 : vector<1x64xf32> to vector<8x64xf32>
    %986 = arith.mulf %985, %984 : vector<8x64xf32>
    %987 = arith.addf %981, %986 : vector<8x64xf32>
    %c76 = arith.constant 76 : index
    %c0_705 = arith.constant 0 : index
    %988 = vector.load %arg3[%c76, %c0_705] : memref<144x64xf32, #tpu.memory_space<vmem>>, vector<1x64xf32>
    %c0_706 = arith.constant 0 : index
    %c0_707 = arith.constant 0 : index
    %c4_708 = arith.constant 4 : index
    %989 = vector.load %arg6[%c0_706, %c0_707, %c4_708] : memref<4x9x72xf32, #tpu.memory_space<vmem>>, vector<1x8x64xf32>
    %990 = vector.shape_cast %989 : vector<1x8x64xf32> to vector<8x64xf32>
    %991 = vector.broadcast %988 : vector<1x64xf32> to vector<8x64xf32>
    %992 = arith.mulf %991, %990 : vector<8x64xf32>
    %993 = arith.addf %987, %992 : vector<8x64xf32>
    %c77 = arith.constant 77 : index
    %c0_709 = arith.constant 0 : index
    %994 = vector.load %arg3[%c77, %c0_709] : memref<144x64xf32, #tpu.memory_space<vmem>>, vector<1x64xf32>
    %c0_710 = arith.constant 0 : index
    %c0_711 = arith.constant 0 : index
    %c6_712 = arith.constant 6 : index
    %995 = vector.load %arg6[%c0_710, %c0_711, %c6_712] : memref<4x9x72xf32, #tpu.memory_space<vmem>>, vector<1x8x64xf32>
    %996 = vector.shape_cast %995 : vector<1x8x64xf32> to vector<8x64xf32>
    %997 = vector.broadcast %994 : vector<1x64xf32> to vector<8x64xf32>
    %998 = arith.mulf %997, %996 : vector<8x64xf32>
    %999 = arith.addf %993, %998 : vector<8x64xf32>
    %c78 = arith.constant 78 : index
    %c0_713 = arith.constant 0 : index
    %1000 = vector.load %arg3[%c78, %c0_713] : memref<144x64xf32, #tpu.memory_space<vmem>>, vector<1x64xf32>
    %c0_714 = arith.constant 0 : index
    %c1_715 = arith.constant 1 : index
    %c2_716 = arith.constant 2 : index
    %1001 = vector.load %arg7[%c0_714, %c1_715, %c2_716] : memref<4x9x72xf32, #tpu.memory_space<vmem>>, vector<1x8x64xf32>
    %1002 = vector.shape_cast %1001 : vector<1x8x64xf32> to vector<8x64xf32>
    %1003 = vector.broadcast %1000 : vector<1x64xf32> to vector<8x64xf32>
    %1004 = arith.mulf %1003, %1002 : vector<8x64xf32>
    %1005 = arith.addf %999, %1004 : vector<8x64xf32>
    %c79 = arith.constant 79 : index
    %c0_717 = arith.constant 0 : index
    %1006 = vector.load %arg3[%c79, %c0_717] : memref<144x64xf32, #tpu.memory_space<vmem>>, vector<1x64xf32>
    %c0_718 = arith.constant 0 : index
    %c1_719 = arith.constant 1 : index
    %c4_720 = arith.constant 4 : index
    %1007 = vector.load %arg7[%c0_718, %c1_719, %c4_720] : memref<4x9x72xf32, #tpu.memory_space<vmem>>, vector<1x8x64xf32>
    %1008 = vector.shape_cast %1007 : vector<1x8x64xf32> to vector<8x64xf32>
    %1009 = vector.broadcast %1006 : vector<1x64xf32> to vector<8x64xf32>
    %1010 = arith.mulf %1009, %1008 : vector<8x64xf32>
    %1011 = arith.addf %1005, %1010 : vector<8x64xf32>
    %c80 = arith.constant 80 : index
    %c0_721 = arith.constant 0 : index
    %1012 = vector.load %arg3[%c80, %c0_721] : memref<144x64xf32, #tpu.memory_space<vmem>>, vector<1x64xf32>
    %c0_722 = arith.constant 0 : index
    %c1_723 = arith.constant 1 : index
    %c6_724 = arith.constant 6 : index
    %1013 = vector.load %arg7[%c0_722, %c1_723, %c6_724] : memref<4x9x72xf32, #tpu.memory_space<vmem>>, vector<1x8x64xf32>
    %1014 = vector.shape_cast %1013 : vector<1x8x64xf32> to vector<8x64xf32>
    %1015 = vector.broadcast %1012 : vector<1x64xf32> to vector<8x64xf32>
    %1016 = arith.mulf %1015, %1014 : vector<8x64xf32>
    %1017 = arith.addf %1011, %1016 : vector<8x64xf32>
    %c81 = arith.constant 81 : index
    %c0_725 = arith.constant 0 : index
    %1018 = vector.load %arg3[%c81, %c0_725] : memref<144x64xf32, #tpu.memory_space<vmem>>, vector<1x64xf32>
    %c1_726 = arith.constant 1 : index
    %c0_727 = arith.constant 0 : index
    %c2_728 = arith.constant 2 : index
    %1019 = vector.load %arg7[%c1_726, %c0_727, %c2_728] : memref<4x9x72xf32, #tpu.memory_space<vmem>>, vector<1x8x64xf32>
    %1020 = vector.shape_cast %1019 : vector<1x8x64xf32> to vector<8x64xf32>
    %1021 = vector.broadcast %1018 : vector<1x64xf32> to vector<8x64xf32>
    %1022 = arith.mulf %1021, %1020 : vector<8x64xf32>
    %1023 = arith.addf %1017, %1022 : vector<8x64xf32>
    %c82 = arith.constant 82 : index
    %c0_729 = arith.constant 0 : index
    %1024 = vector.load %arg3[%c82, %c0_729] : memref<144x64xf32, #tpu.memory_space<vmem>>, vector<1x64xf32>
    %c1_730 = arith.constant 1 : index
    %c0_731 = arith.constant 0 : index
    %c4_732 = arith.constant 4 : index
    %1025 = vector.load %arg7[%c1_730, %c0_731, %c4_732] : memref<4x9x72xf32, #tpu.memory_space<vmem>>, vector<1x8x64xf32>
    %1026 = vector.shape_cast %1025 : vector<1x8x64xf32> to vector<8x64xf32>
    %1027 = vector.broadcast %1024 : vector<1x64xf32> to vector<8x64xf32>
    %1028 = arith.mulf %1027, %1026 : vector<8x64xf32>
    %1029 = arith.addf %1023, %1028 : vector<8x64xf32>
    %c83 = arith.constant 83 : index
    %c0_733 = arith.constant 0 : index
    %1030 = vector.load %arg3[%c83, %c0_733] : memref<144x64xf32, #tpu.memory_space<vmem>>, vector<1x64xf32>
    %c1_734 = arith.constant 1 : index
    %c0_735 = arith.constant 0 : index
    %c6_736 = arith.constant 6 : index
    %1031 = vector.load %arg7[%c1_734, %c0_735, %c6_736] : memref<4x9x72xf32, #tpu.memory_space<vmem>>, vector<1x8x64xf32>
    %1032 = vector.shape_cast %1031 : vector<1x8x64xf32> to vector<8x64xf32>
    %1033 = vector.broadcast %1030 : vector<1x64xf32> to vector<8x64xf32>
    %1034 = arith.mulf %1033, %1032 : vector<8x64xf32>
    %1035 = arith.addf %1029, %1034 : vector<8x64xf32>
    %c84 = arith.constant 84 : index
    %c0_737 = arith.constant 0 : index
    %1036 = vector.load %arg3[%c84, %c0_737] : memref<144x64xf32, #tpu.memory_space<vmem>>, vector<1x64xf32>
    %c1_738 = arith.constant 1 : index
    %c0_739 = arith.constant 0 : index
    %c2_740 = arith.constant 2 : index
    %1037 = vector.load %arg6[%c1_738, %c0_739, %c2_740] : memref<4x9x72xf32, #tpu.memory_space<vmem>>, vector<1x8x64xf32>
    %1038 = vector.shape_cast %1037 : vector<1x8x64xf32> to vector<8x64xf32>
    %1039 = vector.broadcast %1036 : vector<1x64xf32> to vector<8x64xf32>
    %1040 = arith.mulf %1039, %1038 : vector<8x64xf32>
    %1041 = arith.addf %1035, %1040 : vector<8x64xf32>
    %c85 = arith.constant 85 : index
    %c0_741 = arith.constant 0 : index
    %1042 = vector.load %arg3[%c85, %c0_741] : memref<144x64xf32, #tpu.memory_space<vmem>>, vector<1x64xf32>
    %c1_742 = arith.constant 1 : index
    %c0_743 = arith.constant 0 : index
    %c4_744 = arith.constant 4 : index
    %1043 = vector.load %arg6[%c1_742, %c0_743, %c4_744] : memref<4x9x72xf32, #tpu.memory_space<vmem>>, vector<1x8x64xf32>
    %1044 = vector.shape_cast %1043 : vector<1x8x64xf32> to vector<8x64xf32>
    %1045 = vector.broadcast %1042 : vector<1x64xf32> to vector<8x64xf32>
    %1046 = arith.mulf %1045, %1044 : vector<8x64xf32>
    %1047 = arith.addf %1041, %1046 : vector<8x64xf32>
    %c86 = arith.constant 86 : index
    %c0_745 = arith.constant 0 : index
    %1048 = vector.load %arg3[%c86, %c0_745] : memref<144x64xf32, #tpu.memory_space<vmem>>, vector<1x64xf32>
    %c1_746 = arith.constant 1 : index
    %c0_747 = arith.constant 0 : index
    %c6_748 = arith.constant 6 : index
    %1049 = vector.load %arg6[%c1_746, %c0_747, %c6_748] : memref<4x9x72xf32, #tpu.memory_space<vmem>>, vector<1x8x64xf32>
    %1050 = vector.shape_cast %1049 : vector<1x8x64xf32> to vector<8x64xf32>
    %1051 = vector.broadcast %1048 : vector<1x64xf32> to vector<8x64xf32>
    %1052 = arith.mulf %1051, %1050 : vector<8x64xf32>
    %1053 = arith.addf %1047, %1052 : vector<8x64xf32>
    %c87 = arith.constant 87 : index
    %c0_749 = arith.constant 0 : index
    %1054 = vector.load %arg3[%c87, %c0_749] : memref<144x64xf32, #tpu.memory_space<vmem>>, vector<1x64xf32>
    %c1_750 = arith.constant 1 : index
    %c1_751 = arith.constant 1 : index
    %c2_752 = arith.constant 2 : index
    %1055 = vector.load %arg7[%c1_750, %c1_751, %c2_752] : memref<4x9x72xf32, #tpu.memory_space<vmem>>, vector<1x8x64xf32>
    %1056 = vector.shape_cast %1055 : vector<1x8x64xf32> to vector<8x64xf32>
    %1057 = vector.broadcast %1054 : vector<1x64xf32> to vector<8x64xf32>
    %1058 = arith.mulf %1057, %1056 : vector<8x64xf32>
    %1059 = arith.addf %1053, %1058 : vector<8x64xf32>
    %c88 = arith.constant 88 : index
    %c0_753 = arith.constant 0 : index
    %1060 = vector.load %arg3[%c88, %c0_753] : memref<144x64xf32, #tpu.memory_space<vmem>>, vector<1x64xf32>
    %c1_754 = arith.constant 1 : index
    %c1_755 = arith.constant 1 : index
    %c4_756 = arith.constant 4 : index
    %1061 = vector.load %arg7[%c1_754, %c1_755, %c4_756] : memref<4x9x72xf32, #tpu.memory_space<vmem>>, vector<1x8x64xf32>
    %1062 = vector.shape_cast %1061 : vector<1x8x64xf32> to vector<8x64xf32>
    %1063 = vector.broadcast %1060 : vector<1x64xf32> to vector<8x64xf32>
    %1064 = arith.mulf %1063, %1062 : vector<8x64xf32>
    %1065 = arith.addf %1059, %1064 : vector<8x64xf32>
    %c89 = arith.constant 89 : index
    %c0_757 = arith.constant 0 : index
    %1066 = vector.load %arg3[%c89, %c0_757] : memref<144x64xf32, #tpu.memory_space<vmem>>, vector<1x64xf32>
    %c1_758 = arith.constant 1 : index
    %c1_759 = arith.constant 1 : index
    %c6_760 = arith.constant 6 : index
    %1067 = vector.load %arg7[%c1_758, %c1_759, %c6_760] : memref<4x9x72xf32, #tpu.memory_space<vmem>>, vector<1x8x64xf32>
    %1068 = vector.shape_cast %1067 : vector<1x8x64xf32> to vector<8x64xf32>
    %1069 = vector.broadcast %1066 : vector<1x64xf32> to vector<8x64xf32>
    %1070 = arith.mulf %1069, %1068 : vector<8x64xf32>
    %1071 = arith.addf %1065, %1070 : vector<8x64xf32>
    %c90 = arith.constant 90 : index
    %c0_761 = arith.constant 0 : index
    %1072 = vector.load %arg3[%c90, %c0_761] : memref<144x64xf32, #tpu.memory_space<vmem>>, vector<1x64xf32>
    %c2_762 = arith.constant 2 : index
    %c0_763 = arith.constant 0 : index
    %c2_764 = arith.constant 2 : index
    %1073 = vector.load %arg7[%c2_762, %c0_763, %c2_764] : memref<4x9x72xf32, #tpu.memory_space<vmem>>, vector<1x8x64xf32>
    %1074 = vector.shape_cast %1073 : vector<1x8x64xf32> to vector<8x64xf32>
    %1075 = vector.broadcast %1072 : vector<1x64xf32> to vector<8x64xf32>
    %1076 = arith.mulf %1075, %1074 : vector<8x64xf32>
    %1077 = arith.addf %1071, %1076 : vector<8x64xf32>
    %c91 = arith.constant 91 : index
    %c0_765 = arith.constant 0 : index
    %1078 = vector.load %arg3[%c91, %c0_765] : memref<144x64xf32, #tpu.memory_space<vmem>>, vector<1x64xf32>
    %c2_766 = arith.constant 2 : index
    %c0_767 = arith.constant 0 : index
    %c4_768 = arith.constant 4 : index
    %1079 = vector.load %arg7[%c2_766, %c0_767, %c4_768] : memref<4x9x72xf32, #tpu.memory_space<vmem>>, vector<1x8x64xf32>
    %1080 = vector.shape_cast %1079 : vector<1x8x64xf32> to vector<8x64xf32>
    %1081 = vector.broadcast %1078 : vector<1x64xf32> to vector<8x64xf32>
    %1082 = arith.mulf %1081, %1080 : vector<8x64xf32>
    %1083 = arith.addf %1077, %1082 : vector<8x64xf32>
    %c92 = arith.constant 92 : index
    %c0_769 = arith.constant 0 : index
    %1084 = vector.load %arg3[%c92, %c0_769] : memref<144x64xf32, #tpu.memory_space<vmem>>, vector<1x64xf32>
    %c2_770 = arith.constant 2 : index
    %c0_771 = arith.constant 0 : index
    %c6_772 = arith.constant 6 : index
    %1085 = vector.load %arg7[%c2_770, %c0_771, %c6_772] : memref<4x9x72xf32, #tpu.memory_space<vmem>>, vector<1x8x64xf32>
    %1086 = vector.shape_cast %1085 : vector<1x8x64xf32> to vector<8x64xf32>
    %1087 = vector.broadcast %1084 : vector<1x64xf32> to vector<8x64xf32>
    %1088 = arith.mulf %1087, %1086 : vector<8x64xf32>
    %1089 = arith.addf %1083, %1088 : vector<8x64xf32>
    %c93 = arith.constant 93 : index
    %c0_773 = arith.constant 0 : index
    %1090 = vector.load %arg3[%c93, %c0_773] : memref<144x64xf32, #tpu.memory_space<vmem>>, vector<1x64xf32>
    %c2_774 = arith.constant 2 : index
    %c0_775 = arith.constant 0 : index
    %c2_776 = arith.constant 2 : index
    %1091 = vector.load %arg6[%c2_774, %c0_775, %c2_776] : memref<4x9x72xf32, #tpu.memory_space<vmem>>, vector<1x8x64xf32>
    %1092 = vector.shape_cast %1091 : vector<1x8x64xf32> to vector<8x64xf32>
    %1093 = vector.broadcast %1090 : vector<1x64xf32> to vector<8x64xf32>
    %1094 = arith.mulf %1093, %1092 : vector<8x64xf32>
    %1095 = arith.addf %1089, %1094 : vector<8x64xf32>
    %c94 = arith.constant 94 : index
    %c0_777 = arith.constant 0 : index
    %1096 = vector.load %arg3[%c94, %c0_777] : memref<144x64xf32, #tpu.memory_space<vmem>>, vector<1x64xf32>
    %c2_778 = arith.constant 2 : index
    %c0_779 = arith.constant 0 : index
    %c4_780 = arith.constant 4 : index
    %1097 = vector.load %arg6[%c2_778, %c0_779, %c4_780] : memref<4x9x72xf32, #tpu.memory_space<vmem>>, vector<1x8x64xf32>
    %1098 = vector.shape_cast %1097 : vector<1x8x64xf32> to vector<8x64xf32>
    %1099 = vector.broadcast %1096 : vector<1x64xf32> to vector<8x64xf32>
    %1100 = arith.mulf %1099, %1098 : vector<8x64xf32>
    %1101 = arith.addf %1095, %1100 : vector<8x64xf32>
    %c95 = arith.constant 95 : index
    %c0_781 = arith.constant 0 : index
    %1102 = vector.load %arg3[%c95, %c0_781] : memref<144x64xf32, #tpu.memory_space<vmem>>, vector<1x64xf32>
    %c2_782 = arith.constant 2 : index
    %c0_783 = arith.constant 0 : index
    %c6_784 = arith.constant 6 : index
    %1103 = vector.load %arg6[%c2_782, %c0_783, %c6_784] : memref<4x9x72xf32, #tpu.memory_space<vmem>>, vector<1x8x64xf32>
    %1104 = vector.shape_cast %1103 : vector<1x8x64xf32> to vector<8x64xf32>
    %1105 = vector.broadcast %1102 : vector<1x64xf32> to vector<8x64xf32>
    %1106 = arith.mulf %1105, %1104 : vector<8x64xf32>
    %1107 = arith.addf %1101, %1106 : vector<8x64xf32>
    %c96 = arith.constant 96 : index
    %c0_785 = arith.constant 0 : index
    %1108 = vector.load %arg3[%c96, %c0_785] : memref<144x64xf32, #tpu.memory_space<vmem>>, vector<1x64xf32>
    %c2_786 = arith.constant 2 : index
    %c1_787 = arith.constant 1 : index
    %c2_788 = arith.constant 2 : index
    %1109 = vector.load %arg7[%c2_786, %c1_787, %c2_788] : memref<4x9x72xf32, #tpu.memory_space<vmem>>, vector<1x8x64xf32>
    %1110 = vector.shape_cast %1109 : vector<1x8x64xf32> to vector<8x64xf32>
    %1111 = vector.broadcast %1108 : vector<1x64xf32> to vector<8x64xf32>
    %1112 = arith.mulf %1111, %1110 : vector<8x64xf32>
    %1113 = arith.addf %1107, %1112 : vector<8x64xf32>
    %c97 = arith.constant 97 : index
    %c0_789 = arith.constant 0 : index
    %1114 = vector.load %arg3[%c97, %c0_789] : memref<144x64xf32, #tpu.memory_space<vmem>>, vector<1x64xf32>
    %c2_790 = arith.constant 2 : index
    %c1_791 = arith.constant 1 : index
    %c4_792 = arith.constant 4 : index
    %1115 = vector.load %arg7[%c2_790, %c1_791, %c4_792] : memref<4x9x72xf32, #tpu.memory_space<vmem>>, vector<1x8x64xf32>
    %1116 = vector.shape_cast %1115 : vector<1x8x64xf32> to vector<8x64xf32>
    %1117 = vector.broadcast %1114 : vector<1x64xf32> to vector<8x64xf32>
    %1118 = arith.mulf %1117, %1116 : vector<8x64xf32>
    %1119 = arith.addf %1113, %1118 : vector<8x64xf32>
    %c98 = arith.constant 98 : index
    %c0_793 = arith.constant 0 : index
    %1120 = vector.load %arg3[%c98, %c0_793] : memref<144x64xf32, #tpu.memory_space<vmem>>, vector<1x64xf32>
    %c2_794 = arith.constant 2 : index
    %c1_795 = arith.constant 1 : index
    %c6_796 = arith.constant 6 : index
    %1121 = vector.load %arg7[%c2_794, %c1_795, %c6_796] : memref<4x9x72xf32, #tpu.memory_space<vmem>>, vector<1x8x64xf32>
    %1122 = vector.shape_cast %1121 : vector<1x8x64xf32> to vector<8x64xf32>
    %1123 = vector.broadcast %1120 : vector<1x64xf32> to vector<8x64xf32>
    %1124 = arith.mulf %1123, %1122 : vector<8x64xf32>
    %1125 = arith.addf %1119, %1124 : vector<8x64xf32>
    %c99 = arith.constant 99 : index
    %c0_797 = arith.constant 0 : index
    %1126 = vector.load %arg3[%c99, %c0_797] : memref<144x64xf32, #tpu.memory_space<vmem>>, vector<1x64xf32>
    %c3_798 = arith.constant 3 : index
    %c0_799 = arith.constant 0 : index
    %c2_800 = arith.constant 2 : index
    %1127 = vector.load %arg7[%c3_798, %c0_799, %c2_800] : memref<4x9x72xf32, #tpu.memory_space<vmem>>, vector<1x8x64xf32>
    %1128 = vector.shape_cast %1127 : vector<1x8x64xf32> to vector<8x64xf32>
    %1129 = vector.broadcast %1126 : vector<1x64xf32> to vector<8x64xf32>
    %1130 = arith.mulf %1129, %1128 : vector<8x64xf32>
    %1131 = arith.addf %1125, %1130 : vector<8x64xf32>
    %c100 = arith.constant 100 : index
    %c0_801 = arith.constant 0 : index
    %1132 = vector.load %arg3[%c100, %c0_801] : memref<144x64xf32, #tpu.memory_space<vmem>>, vector<1x64xf32>
    %c3_802 = arith.constant 3 : index
    %c0_803 = arith.constant 0 : index
    %c4_804 = arith.constant 4 : index
    %1133 = vector.load %arg7[%c3_802, %c0_803, %c4_804] : memref<4x9x72xf32, #tpu.memory_space<vmem>>, vector<1x8x64xf32>
    %1134 = vector.shape_cast %1133 : vector<1x8x64xf32> to vector<8x64xf32>
    %1135 = vector.broadcast %1132 : vector<1x64xf32> to vector<8x64xf32>
    %1136 = arith.mulf %1135, %1134 : vector<8x64xf32>
    %1137 = arith.addf %1131, %1136 : vector<8x64xf32>
    %c101 = arith.constant 101 : index
    %c0_805 = arith.constant 0 : index
    %1138 = vector.load %arg3[%c101, %c0_805] : memref<144x64xf32, #tpu.memory_space<vmem>>, vector<1x64xf32>
    %c3_806 = arith.constant 3 : index
    %c0_807 = arith.constant 0 : index
    %c6_808 = arith.constant 6 : index
    %1139 = vector.load %arg7[%c3_806, %c0_807, %c6_808] : memref<4x9x72xf32, #tpu.memory_space<vmem>>, vector<1x8x64xf32>
    %1140 = vector.shape_cast %1139 : vector<1x8x64xf32> to vector<8x64xf32>
    %1141 = vector.broadcast %1138 : vector<1x64xf32> to vector<8x64xf32>
    %1142 = arith.mulf %1141, %1140 : vector<8x64xf32>
    %1143 = arith.addf %1137, %1142 : vector<8x64xf32>
    %c102 = arith.constant 102 : index
    %c0_809 = arith.constant 0 : index
    %1144 = vector.load %arg3[%c102, %c0_809] : memref<144x64xf32, #tpu.memory_space<vmem>>, vector<1x64xf32>
    %c3_810 = arith.constant 3 : index
    %c0_811 = arith.constant 0 : index
    %c2_812 = arith.constant 2 : index
    %1145 = vector.load %arg6[%c3_810, %c0_811, %c2_812] : memref<4x9x72xf32, #tpu.memory_space<vmem>>, vector<1x8x64xf32>
    %1146 = vector.shape_cast %1145 : vector<1x8x64xf32> to vector<8x64xf32>
    %1147 = vector.broadcast %1144 : vector<1x64xf32> to vector<8x64xf32>
    %1148 = arith.mulf %1147, %1146 : vector<8x64xf32>
    %1149 = arith.addf %1143, %1148 : vector<8x64xf32>
    %c103 = arith.constant 103 : index
    %c0_813 = arith.constant 0 : index
    %1150 = vector.load %arg3[%c103, %c0_813] : memref<144x64xf32, #tpu.memory_space<vmem>>, vector<1x64xf32>
    %c3_814 = arith.constant 3 : index
    %c0_815 = arith.constant 0 : index
    %c4_816 = arith.constant 4 : index
    %1151 = vector.load %arg6[%c3_814, %c0_815, %c4_816] : memref<4x9x72xf32, #tpu.memory_space<vmem>>, vector<1x8x64xf32>
    %1152 = vector.shape_cast %1151 : vector<1x8x64xf32> to vector<8x64xf32>
    %1153 = vector.broadcast %1150 : vector<1x64xf32> to vector<8x64xf32>
    %1154 = arith.mulf %1153, %1152 : vector<8x64xf32>
    %1155 = arith.addf %1149, %1154 : vector<8x64xf32>
    %c104 = arith.constant 104 : index
    %c0_817 = arith.constant 0 : index
    %1156 = vector.load %arg3[%c104, %c0_817] : memref<144x64xf32, #tpu.memory_space<vmem>>, vector<1x64xf32>
    %c3_818 = arith.constant 3 : index
    %c0_819 = arith.constant 0 : index
    %c6_820 = arith.constant 6 : index
    %1157 = vector.load %arg6[%c3_818, %c0_819, %c6_820] : memref<4x9x72xf32, #tpu.memory_space<vmem>>, vector<1x8x64xf32>
    %1158 = vector.shape_cast %1157 : vector<1x8x64xf32> to vector<8x64xf32>
    %1159 = vector.broadcast %1156 : vector<1x64xf32> to vector<8x64xf32>
    %1160 = arith.mulf %1159, %1158 : vector<8x64xf32>
    %1161 = arith.addf %1155, %1160 : vector<8x64xf32>
    %c105 = arith.constant 105 : index
    %c0_821 = arith.constant 0 : index
    %1162 = vector.load %arg3[%c105, %c0_821] : memref<144x64xf32, #tpu.memory_space<vmem>>, vector<1x64xf32>
    %c3_822 = arith.constant 3 : index
    %c1_823 = arith.constant 1 : index
    %c2_824 = arith.constant 2 : index
    %1163 = vector.load %arg7[%c3_822, %c1_823, %c2_824] : memref<4x9x72xf32, #tpu.memory_space<vmem>>, vector<1x8x64xf32>
    %1164 = vector.shape_cast %1163 : vector<1x8x64xf32> to vector<8x64xf32>
    %1165 = vector.broadcast %1162 : vector<1x64xf32> to vector<8x64xf32>
    %1166 = arith.mulf %1165, %1164 : vector<8x64xf32>
    %1167 = arith.addf %1161, %1166 : vector<8x64xf32>
    %c106 = arith.constant 106 : index
    %c0_825 = arith.constant 0 : index
    %1168 = vector.load %arg3[%c106, %c0_825] : memref<144x64xf32, #tpu.memory_space<vmem>>, vector<1x64xf32>
    %c3_826 = arith.constant 3 : index
    %c1_827 = arith.constant 1 : index
    %c4_828 = arith.constant 4 : index
    %1169 = vector.load %arg7[%c3_826, %c1_827, %c4_828] : memref<4x9x72xf32, #tpu.memory_space<vmem>>, vector<1x8x64xf32>
    %1170 = vector.shape_cast %1169 : vector<1x8x64xf32> to vector<8x64xf32>
    %1171 = vector.broadcast %1168 : vector<1x64xf32> to vector<8x64xf32>
    %1172 = arith.mulf %1171, %1170 : vector<8x64xf32>
    %1173 = arith.addf %1167, %1172 : vector<8x64xf32>
    %c107 = arith.constant 107 : index
    %c0_829 = arith.constant 0 : index
    %1174 = vector.load %arg3[%c107, %c0_829] : memref<144x64xf32, #tpu.memory_space<vmem>>, vector<1x64xf32>
    %c3_830 = arith.constant 3 : index
    %c1_831 = arith.constant 1 : index
    %c6_832 = arith.constant 6 : index
    %1175 = vector.load %arg7[%c3_830, %c1_831, %c6_832] : memref<4x9x72xf32, #tpu.memory_space<vmem>>, vector<1x8x64xf32>
    %1176 = vector.shape_cast %1175 : vector<1x8x64xf32> to vector<8x64xf32>
    %1177 = vector.broadcast %1174 : vector<1x64xf32> to vector<8x64xf32>
    %1178 = arith.mulf %1177, %1176 : vector<8x64xf32>
    %1179 = arith.addf %1173, %1178 : vector<8x64xf32>
    %cst_833 = arith.constant 0.000000e+00 : f32
    %1180 = vector.broadcast %cst_833 : f32 to vector<8x64xf32>
    %c108 = arith.constant 108 : index
    %c0_834 = arith.constant 0 : index
    %1181 = vector.load %arg3[%c108, %c0_834] : memref<144x64xf32, #tpu.memory_space<vmem>>, vector<1x64xf32>
    %c0_835 = arith.constant 0 : index
    %c0_836 = arith.constant 0 : index
    %c2_837 = arith.constant 2 : index
    %1182 = vector.load %arg7[%c0_835, %c0_836, %c2_837] : memref<4x9x72xf32, #tpu.memory_space<vmem>>, vector<1x8x64xf32>
    %1183 = vector.shape_cast %1182 : vector<1x8x64xf32> to vector<8x64xf32>
    %1184 = vector.broadcast %1181 : vector<1x64xf32> to vector<8x64xf32>
    %1185 = arith.mulf %1184, %1183 : vector<8x64xf32>
    %1186 = arith.addf %1180, %1185 : vector<8x64xf32>
    %c109 = arith.constant 109 : index
    %c0_838 = arith.constant 0 : index
    %1187 = vector.load %arg3[%c109, %c0_838] : memref<144x64xf32, #tpu.memory_space<vmem>>, vector<1x64xf32>
    %c0_839 = arith.constant 0 : index
    %c0_840 = arith.constant 0 : index
    %c4_841 = arith.constant 4 : index
    %1188 = vector.load %arg7[%c0_839, %c0_840, %c4_841] : memref<4x9x72xf32, #tpu.memory_space<vmem>>, vector<1x8x64xf32>
    %1189 = vector.shape_cast %1188 : vector<1x8x64xf32> to vector<8x64xf32>
    %1190 = vector.broadcast %1187 : vector<1x64xf32> to vector<8x64xf32>
    %1191 = arith.mulf %1190, %1189 : vector<8x64xf32>
    %1192 = arith.addf %1186, %1191 : vector<8x64xf32>
    %c110 = arith.constant 110 : index
    %c0_842 = arith.constant 0 : index
    %1193 = vector.load %arg3[%c110, %c0_842] : memref<144x64xf32, #tpu.memory_space<vmem>>, vector<1x64xf32>
    %c0_843 = arith.constant 0 : index
    %c0_844 = arith.constant 0 : index
    %c6_845 = arith.constant 6 : index
    %1194 = vector.load %arg7[%c0_843, %c0_844, %c6_845] : memref<4x9x72xf32, #tpu.memory_space<vmem>>, vector<1x8x64xf32>
    %1195 = vector.shape_cast %1194 : vector<1x8x64xf32> to vector<8x64xf32>
    %1196 = vector.broadcast %1193 : vector<1x64xf32> to vector<8x64xf32>
    %1197 = arith.mulf %1196, %1195 : vector<8x64xf32>
    %1198 = arith.addf %1192, %1197 : vector<8x64xf32>
    %c111 = arith.constant 111 : index
    %c0_846 = arith.constant 0 : index
    %1199 = vector.load %arg3[%c111, %c0_846] : memref<144x64xf32, #tpu.memory_space<vmem>>, vector<1x64xf32>
    %c0_847 = arith.constant 0 : index
    %c0_848 = arith.constant 0 : index
    %c2_849 = arith.constant 2 : index
    %1200 = vector.load %arg6[%c0_847, %c0_848, %c2_849] : memref<4x9x72xf32, #tpu.memory_space<vmem>>, vector<1x8x64xf32>
    %1201 = vector.shape_cast %1200 : vector<1x8x64xf32> to vector<8x64xf32>
    %1202 = vector.broadcast %1199 : vector<1x64xf32> to vector<8x64xf32>
    %1203 = arith.mulf %1202, %1201 : vector<8x64xf32>
    %1204 = arith.addf %1198, %1203 : vector<8x64xf32>
    %c112 = arith.constant 112 : index
    %c0_850 = arith.constant 0 : index
    %1205 = vector.load %arg3[%c112, %c0_850] : memref<144x64xf32, #tpu.memory_space<vmem>>, vector<1x64xf32>
    %c0_851 = arith.constant 0 : index
    %c0_852 = arith.constant 0 : index
    %c4_853 = arith.constant 4 : index
    %1206 = vector.load %arg6[%c0_851, %c0_852, %c4_853] : memref<4x9x72xf32, #tpu.memory_space<vmem>>, vector<1x8x64xf32>
    %1207 = vector.shape_cast %1206 : vector<1x8x64xf32> to vector<8x64xf32>
    %1208 = vector.broadcast %1205 : vector<1x64xf32> to vector<8x64xf32>
    %1209 = arith.mulf %1208, %1207 : vector<8x64xf32>
    %1210 = arith.addf %1204, %1209 : vector<8x64xf32>
    %c113 = arith.constant 113 : index
    %c0_854 = arith.constant 0 : index
    %1211 = vector.load %arg3[%c113, %c0_854] : memref<144x64xf32, #tpu.memory_space<vmem>>, vector<1x64xf32>
    %c0_855 = arith.constant 0 : index
    %c0_856 = arith.constant 0 : index
    %c6_857 = arith.constant 6 : index
    %1212 = vector.load %arg6[%c0_855, %c0_856, %c6_857] : memref<4x9x72xf32, #tpu.memory_space<vmem>>, vector<1x8x64xf32>
    %1213 = vector.shape_cast %1212 : vector<1x8x64xf32> to vector<8x64xf32>
    %1214 = vector.broadcast %1211 : vector<1x64xf32> to vector<8x64xf32>
    %1215 = arith.mulf %1214, %1213 : vector<8x64xf32>
    %1216 = arith.addf %1210, %1215 : vector<8x64xf32>
    %c114 = arith.constant 114 : index
    %c0_858 = arith.constant 0 : index
    %1217 = vector.load %arg3[%c114, %c0_858] : memref<144x64xf32, #tpu.memory_space<vmem>>, vector<1x64xf32>
    %c0_859 = arith.constant 0 : index
    %c1_860 = arith.constant 1 : index
    %c2_861 = arith.constant 2 : index
    %1218 = vector.load %arg7[%c0_859, %c1_860, %c2_861] : memref<4x9x72xf32, #tpu.memory_space<vmem>>, vector<1x8x64xf32>
    %1219 = vector.shape_cast %1218 : vector<1x8x64xf32> to vector<8x64xf32>
    %1220 = vector.broadcast %1217 : vector<1x64xf32> to vector<8x64xf32>
    %1221 = arith.mulf %1220, %1219 : vector<8x64xf32>
    %1222 = arith.addf %1216, %1221 : vector<8x64xf32>
    %c115 = arith.constant 115 : index
    %c0_862 = arith.constant 0 : index
    %1223 = vector.load %arg3[%c115, %c0_862] : memref<144x64xf32, #tpu.memory_space<vmem>>, vector<1x64xf32>
    %c0_863 = arith.constant 0 : index
    %c1_864 = arith.constant 1 : index
    %c4_865 = arith.constant 4 : index
    %1224 = vector.load %arg7[%c0_863, %c1_864, %c4_865] : memref<4x9x72xf32, #tpu.memory_space<vmem>>, vector<1x8x64xf32>
    %1225 = vector.shape_cast %1224 : vector<1x8x64xf32> to vector<8x64xf32>
    %1226 = vector.broadcast %1223 : vector<1x64xf32> to vector<8x64xf32>
    %1227 = arith.mulf %1226, %1225 : vector<8x64xf32>
    %1228 = arith.addf %1222, %1227 : vector<8x64xf32>
    %c116 = arith.constant 116 : index
    %c0_866 = arith.constant 0 : index
    %1229 = vector.load %arg3[%c116, %c0_866] : memref<144x64xf32, #tpu.memory_space<vmem>>, vector<1x64xf32>
    %c0_867 = arith.constant 0 : index
    %c1_868 = arith.constant 1 : index
    %c6_869 = arith.constant 6 : index
    %1230 = vector.load %arg7[%c0_867, %c1_868, %c6_869] : memref<4x9x72xf32, #tpu.memory_space<vmem>>, vector<1x8x64xf32>
    %1231 = vector.shape_cast %1230 : vector<1x8x64xf32> to vector<8x64xf32>
    %1232 = vector.broadcast %1229 : vector<1x64xf32> to vector<8x64xf32>
    %1233 = arith.mulf %1232, %1231 : vector<8x64xf32>
    %1234 = arith.addf %1228, %1233 : vector<8x64xf32>
    %c117 = arith.constant 117 : index
    %c0_870 = arith.constant 0 : index
    %1235 = vector.load %arg3[%c117, %c0_870] : memref<144x64xf32, #tpu.memory_space<vmem>>, vector<1x64xf32>
    %c1_871 = arith.constant 1 : index
    %c0_872 = arith.constant 0 : index
    %c2_873 = arith.constant 2 : index
    %1236 = vector.load %arg7[%c1_871, %c0_872, %c2_873] : memref<4x9x72xf32, #tpu.memory_space<vmem>>, vector<1x8x64xf32>
    %1237 = vector.shape_cast %1236 : vector<1x8x64xf32> to vector<8x64xf32>
    %1238 = vector.broadcast %1235 : vector<1x64xf32> to vector<8x64xf32>
    %1239 = arith.mulf %1238, %1237 : vector<8x64xf32>
    %1240 = arith.addf %1234, %1239 : vector<8x64xf32>
    %c118 = arith.constant 118 : index
    %c0_874 = arith.constant 0 : index
    %1241 = vector.load %arg3[%c118, %c0_874] : memref<144x64xf32, #tpu.memory_space<vmem>>, vector<1x64xf32>
    %c1_875 = arith.constant 1 : index
    %c0_876 = arith.constant 0 : index
    %c4_877 = arith.constant 4 : index
    %1242 = vector.load %arg7[%c1_875, %c0_876, %c4_877] : memref<4x9x72xf32, #tpu.memory_space<vmem>>, vector<1x8x64xf32>
    %1243 = vector.shape_cast %1242 : vector<1x8x64xf32> to vector<8x64xf32>
    %1244 = vector.broadcast %1241 : vector<1x64xf32> to vector<8x64xf32>
    %1245 = arith.mulf %1244, %1243 : vector<8x64xf32>
    %1246 = arith.addf %1240, %1245 : vector<8x64xf32>
    %c119 = arith.constant 119 : index
    %c0_878 = arith.constant 0 : index
    %1247 = vector.load %arg3[%c119, %c0_878] : memref<144x64xf32, #tpu.memory_space<vmem>>, vector<1x64xf32>
    %c1_879 = arith.constant 1 : index
    %c0_880 = arith.constant 0 : index
    %c6_881 = arith.constant 6 : index
    %1248 = vector.load %arg7[%c1_879, %c0_880, %c6_881] : memref<4x9x72xf32, #tpu.memory_space<vmem>>, vector<1x8x64xf32>
    %1249 = vector.shape_cast %1248 : vector<1x8x64xf32> to vector<8x64xf32>
    %1250 = vector.broadcast %1247 : vector<1x64xf32> to vector<8x64xf32>
    %1251 = arith.mulf %1250, %1249 : vector<8x64xf32>
    %1252 = arith.addf %1246, %1251 : vector<8x64xf32>
    %c120 = arith.constant 120 : index
    %c0_882 = arith.constant 0 : index
    %1253 = vector.load %arg3[%c120, %c0_882] : memref<144x64xf32, #tpu.memory_space<vmem>>, vector<1x64xf32>
    %c1_883 = arith.constant 1 : index
    %c0_884 = arith.constant 0 : index
    %c2_885 = arith.constant 2 : index
    %1254 = vector.load %arg6[%c1_883, %c0_884, %c2_885] : memref<4x9x72xf32, #tpu.memory_space<vmem>>, vector<1x8x64xf32>
    %1255 = vector.shape_cast %1254 : vector<1x8x64xf32> to vector<8x64xf32>
    %1256 = vector.broadcast %1253 : vector<1x64xf32> to vector<8x64xf32>
    %1257 = arith.mulf %1256, %1255 : vector<8x64xf32>
    %1258 = arith.addf %1252, %1257 : vector<8x64xf32>
    %c121 = arith.constant 121 : index
    %c0_886 = arith.constant 0 : index
    %1259 = vector.load %arg3[%c121, %c0_886] : memref<144x64xf32, #tpu.memory_space<vmem>>, vector<1x64xf32>
    %c1_887 = arith.constant 1 : index
    %c0_888 = arith.constant 0 : index
    %c4_889 = arith.constant 4 : index
    %1260 = vector.load %arg6[%c1_887, %c0_888, %c4_889] : memref<4x9x72xf32, #tpu.memory_space<vmem>>, vector<1x8x64xf32>
    %1261 = vector.shape_cast %1260 : vector<1x8x64xf32> to vector<8x64xf32>
    %1262 = vector.broadcast %1259 : vector<1x64xf32> to vector<8x64xf32>
    %1263 = arith.mulf %1262, %1261 : vector<8x64xf32>
    %1264 = arith.addf %1258, %1263 : vector<8x64xf32>
    %c122 = arith.constant 122 : index
    %c0_890 = arith.constant 0 : index
    %1265 = vector.load %arg3[%c122, %c0_890] : memref<144x64xf32, #tpu.memory_space<vmem>>, vector<1x64xf32>
    %c1_891 = arith.constant 1 : index
    %c0_892 = arith.constant 0 : index
    %c6_893 = arith.constant 6 : index
    %1266 = vector.load %arg6[%c1_891, %c0_892, %c6_893] : memref<4x9x72xf32, #tpu.memory_space<vmem>>, vector<1x8x64xf32>
    %1267 = vector.shape_cast %1266 : vector<1x8x64xf32> to vector<8x64xf32>
    %1268 = vector.broadcast %1265 : vector<1x64xf32> to vector<8x64xf32>
    %1269 = arith.mulf %1268, %1267 : vector<8x64xf32>
    %1270 = arith.addf %1264, %1269 : vector<8x64xf32>
    %c123 = arith.constant 123 : index
    %c0_894 = arith.constant 0 : index
    %1271 = vector.load %arg3[%c123, %c0_894] : memref<144x64xf32, #tpu.memory_space<vmem>>, vector<1x64xf32>
    %c1_895 = arith.constant 1 : index
    %c1_896 = arith.constant 1 : index
    %c2_897 = arith.constant 2 : index
    %1272 = vector.load %arg7[%c1_895, %c1_896, %c2_897] : memref<4x9x72xf32, #tpu.memory_space<vmem>>, vector<1x8x64xf32>
    %1273 = vector.shape_cast %1272 : vector<1x8x64xf32> to vector<8x64xf32>
    %1274 = vector.broadcast %1271 : vector<1x64xf32> to vector<8x64xf32>
    %1275 = arith.mulf %1274, %1273 : vector<8x64xf32>
    %1276 = arith.addf %1270, %1275 : vector<8x64xf32>
    %c124 = arith.constant 124 : index
    %c0_898 = arith.constant 0 : index
    %1277 = vector.load %arg3[%c124, %c0_898] : memref<144x64xf32, #tpu.memory_space<vmem>>, vector<1x64xf32>
    %c1_899 = arith.constant 1 : index
    %c1_900 = arith.constant 1 : index
    %c4_901 = arith.constant 4 : index
    %1278 = vector.load %arg7[%c1_899, %c1_900, %c4_901] : memref<4x9x72xf32, #tpu.memory_space<vmem>>, vector<1x8x64xf32>
    %1279 = vector.shape_cast %1278 : vector<1x8x64xf32> to vector<8x64xf32>
    %1280 = vector.broadcast %1277 : vector<1x64xf32> to vector<8x64xf32>
    %1281 = arith.mulf %1280, %1279 : vector<8x64xf32>
    %1282 = arith.addf %1276, %1281 : vector<8x64xf32>
    %c125 = arith.constant 125 : index
    %c0_902 = arith.constant 0 : index
    %1283 = vector.load %arg3[%c125, %c0_902] : memref<144x64xf32, #tpu.memory_space<vmem>>, vector<1x64xf32>
    %c1_903 = arith.constant 1 : index
    %c1_904 = arith.constant 1 : index
    %c6_905 = arith.constant 6 : index
    %1284 = vector.load %arg7[%c1_903, %c1_904, %c6_905] : memref<4x9x72xf32, #tpu.memory_space<vmem>>, vector<1x8x64xf32>
    %1285 = vector.shape_cast %1284 : vector<1x8x64xf32> to vector<8x64xf32>
    %1286 = vector.broadcast %1283 : vector<1x64xf32> to vector<8x64xf32>
    %1287 = arith.mulf %1286, %1285 : vector<8x64xf32>
    %1288 = arith.addf %1282, %1287 : vector<8x64xf32>
    %c126 = arith.constant 126 : index
    %c0_906 = arith.constant 0 : index
    %1289 = vector.load %arg3[%c126, %c0_906] : memref<144x64xf32, #tpu.memory_space<vmem>>, vector<1x64xf32>
    %c2_907 = arith.constant 2 : index
    %c0_908 = arith.constant 0 : index
    %c2_909 = arith.constant 2 : index
    %1290 = vector.load %arg7[%c2_907, %c0_908, %c2_909] : memref<4x9x72xf32, #tpu.memory_space<vmem>>, vector<1x8x64xf32>
    %1291 = vector.shape_cast %1290 : vector<1x8x64xf32> to vector<8x64xf32>
    %1292 = vector.broadcast %1289 : vector<1x64xf32> to vector<8x64xf32>
    %1293 = arith.mulf %1292, %1291 : vector<8x64xf32>
    %1294 = arith.addf %1288, %1293 : vector<8x64xf32>
    %c127 = arith.constant 127 : index
    %c0_910 = arith.constant 0 : index
    %1295 = vector.load %arg3[%c127, %c0_910] : memref<144x64xf32, #tpu.memory_space<vmem>>, vector<1x64xf32>
    %c2_911 = arith.constant 2 : index
    %c0_912 = arith.constant 0 : index
    %c4_913 = arith.constant 4 : index
    %1296 = vector.load %arg7[%c2_911, %c0_912, %c4_913] : memref<4x9x72xf32, #tpu.memory_space<vmem>>, vector<1x8x64xf32>
    %1297 = vector.shape_cast %1296 : vector<1x8x64xf32> to vector<8x64xf32>
    %1298 = vector.broadcast %1295 : vector<1x64xf32> to vector<8x64xf32>
    %1299 = arith.mulf %1298, %1297 : vector<8x64xf32>
    %1300 = arith.addf %1294, %1299 : vector<8x64xf32>
    %c128 = arith.constant 128 : index
    %c0_914 = arith.constant 0 : index
    %1301 = vector.load %arg3[%c128, %c0_914] : memref<144x64xf32, #tpu.memory_space<vmem>>, vector<1x64xf32>
    %c2_915 = arith.constant 2 : index
    %c0_916 = arith.constant 0 : index
    %c6_917 = arith.constant 6 : index
    %1302 = vector.load %arg7[%c2_915, %c0_916, %c6_917] : memref<4x9x72xf32, #tpu.memory_space<vmem>>, vector<1x8x64xf32>
    %1303 = vector.shape_cast %1302 : vector<1x8x64xf32> to vector<8x64xf32>
    %1304 = vector.broadcast %1301 : vector<1x64xf32> to vector<8x64xf32>
    %1305 = arith.mulf %1304, %1303 : vector<8x64xf32>
    %1306 = arith.addf %1300, %1305 : vector<8x64xf32>
    %c129 = arith.constant 129 : index
    %c0_918 = arith.constant 0 : index
    %1307 = vector.load %arg3[%c129, %c0_918] : memref<144x64xf32, #tpu.memory_space<vmem>>, vector<1x64xf32>
    %c2_919 = arith.constant 2 : index
    %c0_920 = arith.constant 0 : index
    %c2_921 = arith.constant 2 : index
    %1308 = vector.load %arg6[%c2_919, %c0_920, %c2_921] : memref<4x9x72xf32, #tpu.memory_space<vmem>>, vector<1x8x64xf32>
    %1309 = vector.shape_cast %1308 : vector<1x8x64xf32> to vector<8x64xf32>
    %1310 = vector.broadcast %1307 : vector<1x64xf32> to vector<8x64xf32>
    %1311 = arith.mulf %1310, %1309 : vector<8x64xf32>
    %1312 = arith.addf %1306, %1311 : vector<8x64xf32>
    %c130 = arith.constant 130 : index
    %c0_922 = arith.constant 0 : index
    %1313 = vector.load %arg3[%c130, %c0_922] : memref<144x64xf32, #tpu.memory_space<vmem>>, vector<1x64xf32>
    %c2_923 = arith.constant 2 : index
    %c0_924 = arith.constant 0 : index
    %c4_925 = arith.constant 4 : index
    %1314 = vector.load %arg6[%c2_923, %c0_924, %c4_925] : memref<4x9x72xf32, #tpu.memory_space<vmem>>, vector<1x8x64xf32>
    %1315 = vector.shape_cast %1314 : vector<1x8x64xf32> to vector<8x64xf32>
    %1316 = vector.broadcast %1313 : vector<1x64xf32> to vector<8x64xf32>
    %1317 = arith.mulf %1316, %1315 : vector<8x64xf32>
    %1318 = arith.addf %1312, %1317 : vector<8x64xf32>
    %c131 = arith.constant 131 : index
    %c0_926 = arith.constant 0 : index
    %1319 = vector.load %arg3[%c131, %c0_926] : memref<144x64xf32, #tpu.memory_space<vmem>>, vector<1x64xf32>
    %c2_927 = arith.constant 2 : index
    %c0_928 = arith.constant 0 : index
    %c6_929 = arith.constant 6 : index
    %1320 = vector.load %arg6[%c2_927, %c0_928, %c6_929] : memref<4x9x72xf32, #tpu.memory_space<vmem>>, vector<1x8x64xf32>
    %1321 = vector.shape_cast %1320 : vector<1x8x64xf32> to vector<8x64xf32>
    %1322 = vector.broadcast %1319 : vector<1x64xf32> to vector<8x64xf32>
    %1323 = arith.mulf %1322, %1321 : vector<8x64xf32>
    %1324 = arith.addf %1318, %1323 : vector<8x64xf32>
    %c132 = arith.constant 132 : index
    %c0_930 = arith.constant 0 : index
    %1325 = vector.load %arg3[%c132, %c0_930] : memref<144x64xf32, #tpu.memory_space<vmem>>, vector<1x64xf32>
    %c2_931 = arith.constant 2 : index
    %c1_932 = arith.constant 1 : index
    %c2_933 = arith.constant 2 : index
    %1326 = vector.load %arg7[%c2_931, %c1_932, %c2_933] : memref<4x9x72xf32, #tpu.memory_space<vmem>>, vector<1x8x64xf32>
    %1327 = vector.shape_cast %1326 : vector<1x8x64xf32> to vector<8x64xf32>
    %1328 = vector.broadcast %1325 : vector<1x64xf32> to vector<8x64xf32>
    %1329 = arith.mulf %1328, %1327 : vector<8x64xf32>
    %1330 = arith.addf %1324, %1329 : vector<8x64xf32>
    %c133 = arith.constant 133 : index
    %c0_934 = arith.constant 0 : index
    %1331 = vector.load %arg3[%c133, %c0_934] : memref<144x64xf32, #tpu.memory_space<vmem>>, vector<1x64xf32>
    %c2_935 = arith.constant 2 : index
    %c1_936 = arith.constant 1 : index
    %c4_937 = arith.constant 4 : index
    %1332 = vector.load %arg7[%c2_935, %c1_936, %c4_937] : memref<4x9x72xf32, #tpu.memory_space<vmem>>, vector<1x8x64xf32>
    %1333 = vector.shape_cast %1332 : vector<1x8x64xf32> to vector<8x64xf32>
    %1334 = vector.broadcast %1331 : vector<1x64xf32> to vector<8x64xf32>
    %1335 = arith.mulf %1334, %1333 : vector<8x64xf32>
    %1336 = arith.addf %1330, %1335 : vector<8x64xf32>
    %c134 = arith.constant 134 : index
    %c0_938 = arith.constant 0 : index
    %1337 = vector.load %arg3[%c134, %c0_938] : memref<144x64xf32, #tpu.memory_space<vmem>>, vector<1x64xf32>
    %c2_939 = arith.constant 2 : index
    %c1_940 = arith.constant 1 : index
    %c6_941 = arith.constant 6 : index
    %1338 = vector.load %arg7[%c2_939, %c1_940, %c6_941] : memref<4x9x72xf32, #tpu.memory_space<vmem>>, vector<1x8x64xf32>
    %1339 = vector.shape_cast %1338 : vector<1x8x64xf32> to vector<8x64xf32>
    %1340 = vector.broadcast %1337 : vector<1x64xf32> to vector<8x64xf32>
    %1341 = arith.mulf %1340, %1339 : vector<8x64xf32>
    %1342 = arith.addf %1336, %1341 : vector<8x64xf32>
    %c135 = arith.constant 135 : index
    %c0_942 = arith.constant 0 : index
    %1343 = vector.load %arg3[%c135, %c0_942] : memref<144x64xf32, #tpu.memory_space<vmem>>, vector<1x64xf32>
    %c3_943 = arith.constant 3 : index
    %c0_944 = arith.constant 0 : index
    %c2_945 = arith.constant 2 : index
    %1344 = vector.load %arg7[%c3_943, %c0_944, %c2_945] : memref<4x9x72xf32, #tpu.memory_space<vmem>>, vector<1x8x64xf32>
    %1345 = vector.shape_cast %1344 : vector<1x8x64xf32> to vector<8x64xf32>
    %1346 = vector.broadcast %1343 : vector<1x64xf32> to vector<8x64xf32>
    %1347 = arith.mulf %1346, %1345 : vector<8x64xf32>
    %1348 = arith.addf %1342, %1347 : vector<8x64xf32>
    %c136 = arith.constant 136 : index
    %c0_946 = arith.constant 0 : index
    %1349 = vector.load %arg3[%c136, %c0_946] : memref<144x64xf32, #tpu.memory_space<vmem>>, vector<1x64xf32>
    %c3_947 = arith.constant 3 : index
    %c0_948 = arith.constant 0 : index
    %c4_949 = arith.constant 4 : index
    %1350 = vector.load %arg7[%c3_947, %c0_948, %c4_949] : memref<4x9x72xf32, #tpu.memory_space<vmem>>, vector<1x8x64xf32>
    %1351 = vector.shape_cast %1350 : vector<1x8x64xf32> to vector<8x64xf32>
    %1352 = vector.broadcast %1349 : vector<1x64xf32> to vector<8x64xf32>
    %1353 = arith.mulf %1352, %1351 : vector<8x64xf32>
    %1354 = arith.addf %1348, %1353 : vector<8x64xf32>
    %c137 = arith.constant 137 : index
    %c0_950 = arith.constant 0 : index
    %1355 = vector.load %arg3[%c137, %c0_950] : memref<144x64xf32, #tpu.memory_space<vmem>>, vector<1x64xf32>
    %c3_951 = arith.constant 3 : index
    %c0_952 = arith.constant 0 : index
    %c6_953 = arith.constant 6 : index
    %1356 = vector.load %arg7[%c3_951, %c0_952, %c6_953] : memref<4x9x72xf32, #tpu.memory_space<vmem>>, vector<1x8x64xf32>
    %1357 = vector.shape_cast %1356 : vector<1x8x64xf32> to vector<8x64xf32>
    %1358 = vector.broadcast %1355 : vector<1x64xf32> to vector<8x64xf32>
    %1359 = arith.mulf %1358, %1357 : vector<8x64xf32>
    %1360 = arith.addf %1354, %1359 : vector<8x64xf32>
    %c138 = arith.constant 138 : index
    %c0_954 = arith.constant 0 : index
    %1361 = vector.load %arg3[%c138, %c0_954] : memref<144x64xf32, #tpu.memory_space<vmem>>, vector<1x64xf32>
    %c3_955 = arith.constant 3 : index
    %c0_956 = arith.constant 0 : index
    %c2_957 = arith.constant 2 : index
    %1362 = vector.load %arg6[%c3_955, %c0_956, %c2_957] : memref<4x9x72xf32, #tpu.memory_space<vmem>>, vector<1x8x64xf32>
    %1363 = vector.shape_cast %1362 : vector<1x8x64xf32> to vector<8x64xf32>
    %1364 = vector.broadcast %1361 : vector<1x64xf32> to vector<8x64xf32>
    %1365 = arith.mulf %1364, %1363 : vector<8x64xf32>
    %1366 = arith.addf %1360, %1365 : vector<8x64xf32>
    %c139 = arith.constant 139 : index
    %c0_958 = arith.constant 0 : index
    %1367 = vector.load %arg3[%c139, %c0_958] : memref<144x64xf32, #tpu.memory_space<vmem>>, vector<1x64xf32>
    %c3_959 = arith.constant 3 : index
    %c0_960 = arith.constant 0 : index
    %c4_961 = arith.constant 4 : index
    %1368 = vector.load %arg6[%c3_959, %c0_960, %c4_961] : memref<4x9x72xf32, #tpu.memory_space<vmem>>, vector<1x8x64xf32>
    %1369 = vector.shape_cast %1368 : vector<1x8x64xf32> to vector<8x64xf32>
    %1370 = vector.broadcast %1367 : vector<1x64xf32> to vector<8x64xf32>
    %1371 = arith.mulf %1370, %1369 : vector<8x64xf32>
    %1372 = arith.addf %1366, %1371 : vector<8x64xf32>
    %c140 = arith.constant 140 : index
    %c0_962 = arith.constant 0 : index
    %1373 = vector.load %arg3[%c140, %c0_962] : memref<144x64xf32, #tpu.memory_space<vmem>>, vector<1x64xf32>
    %c3_963 = arith.constant 3 : index
    %c0_964 = arith.constant 0 : index
    %c6_965 = arith.constant 6 : index
    %1374 = vector.load %arg6[%c3_963, %c0_964, %c6_965] : memref<4x9x72xf32, #tpu.memory_space<vmem>>, vector<1x8x64xf32>
    %1375 = vector.shape_cast %1374 : vector<1x8x64xf32> to vector<8x64xf32>
    %1376 = vector.broadcast %1373 : vector<1x64xf32> to vector<8x64xf32>
    %1377 = arith.mulf %1376, %1375 : vector<8x64xf32>
    %1378 = arith.addf %1372, %1377 : vector<8x64xf32>
    %c141 = arith.constant 141 : index
    %c0_966 = arith.constant 0 : index
    %1379 = vector.load %arg3[%c141, %c0_966] : memref<144x64xf32, #tpu.memory_space<vmem>>, vector<1x64xf32>
    %c3_967 = arith.constant 3 : index
    %c1_968 = arith.constant 1 : index
    %c2_969 = arith.constant 2 : index
    %1380 = vector.load %arg7[%c3_967, %c1_968, %c2_969] : memref<4x9x72xf32, #tpu.memory_space<vmem>>, vector<1x8x64xf32>
    %1381 = vector.shape_cast %1380 : vector<1x8x64xf32> to vector<8x64xf32>
    %1382 = vector.broadcast %1379 : vector<1x64xf32> to vector<8x64xf32>
    %1383 = arith.mulf %1382, %1381 : vector<8x64xf32>
    %1384 = arith.addf %1378, %1383 : vector<8x64xf32>
    %c142 = arith.constant 142 : index
    %c0_970 = arith.constant 0 : index
    %1385 = vector.load %arg3[%c142, %c0_970] : memref<144x64xf32, #tpu.memory_space<vmem>>, vector<1x64xf32>
    %c3_971 = arith.constant 3 : index
    %c1_972 = arith.constant 1 : index
    %c4_973 = arith.constant 4 : index
    %1386 = vector.load %arg7[%c3_971, %c1_972, %c4_973] : memref<4x9x72xf32, #tpu.memory_space<vmem>>, vector<1x8x64xf32>
    %1387 = vector.shape_cast %1386 : vector<1x8x64xf32> to vector<8x64xf32>
    %1388 = vector.broadcast %1385 : vector<1x64xf32> to vector<8x64xf32>
    %1389 = arith.mulf %1388, %1387 : vector<8x64xf32>
    %1390 = arith.addf %1384, %1389 : vector<8x64xf32>
    %c143 = arith.constant 143 : index
    %c0_974 = arith.constant 0 : index
    %1391 = vector.load %arg3[%c143, %c0_974] : memref<144x64xf32, #tpu.memory_space<vmem>>, vector<1x64xf32>
    %c3_975 = arith.constant 3 : index
    %c1_976 = arith.constant 1 : index
    %c6_977 = arith.constant 6 : index
    %1392 = vector.load %arg7[%c3_975, %c1_976, %c6_977] : memref<4x9x72xf32, #tpu.memory_space<vmem>>, vector<1x8x64xf32>
    %1393 = vector.shape_cast %1392 : vector<1x8x64xf32> to vector<8x64xf32>
    %1394 = vector.broadcast %1391 : vector<1x64xf32> to vector<8x64xf32>
    %1395 = arith.mulf %1394, %1393 : vector<8x64xf32>
    %1396 = arith.addf %1390, %1395 : vector<8x64xf32>
    %cst_978 = arith.constant 0.000000e+00 : f32
    %1397 = vector.broadcast %cst_978 : f32 to vector<8x64xf32>
    %c72_979 = arith.constant 72 : index
    %c0_980 = arith.constant 0 : index
    %1398 = vector.load %arg3[%c72_979, %c0_980] : memref<144x64xf32, #tpu.memory_space<vmem>>, vector<1x64xf32>
    %c0_981 = arith.constant 0 : index
    %c0_982 = arith.constant 0 : index
    %c2_983 = arith.constant 2 : index
    %1399 = vector.load %arg6[%c0_981, %c0_982, %c2_983] : memref<4x9x72xf32, #tpu.memory_space<vmem>>, vector<1x8x64xf32>
    %1400 = vector.shape_cast %1399 : vector<1x8x64xf32> to vector<8x64xf32>
    %1401 = vector.broadcast %1398 : vector<1x64xf32> to vector<8x64xf32>
    %1402 = arith.mulf %1401, %1400 : vector<8x64xf32>
    %1403 = arith.addf %1397, %1402 : vector<8x64xf32>
    %c73_984 = arith.constant 73 : index
    %c0_985 = arith.constant 0 : index
    %1404 = vector.load %arg3[%c73_984, %c0_985] : memref<144x64xf32, #tpu.memory_space<vmem>>, vector<1x64xf32>
    %c0_986 = arith.constant 0 : index
    %c0_987 = arith.constant 0 : index
    %c4_988 = arith.constant 4 : index
    %1405 = vector.load %arg6[%c0_986, %c0_987, %c4_988] : memref<4x9x72xf32, #tpu.memory_space<vmem>>, vector<1x8x64xf32>
    %1406 = vector.shape_cast %1405 : vector<1x8x64xf32> to vector<8x64xf32>
    %1407 = vector.broadcast %1404 : vector<1x64xf32> to vector<8x64xf32>
    %1408 = arith.mulf %1407, %1406 : vector<8x64xf32>
    %1409 = arith.addf %1403, %1408 : vector<8x64xf32>
    %c74_989 = arith.constant 74 : index
    %c0_990 = arith.constant 0 : index
    %1410 = vector.load %arg3[%c74_989, %c0_990] : memref<144x64xf32, #tpu.memory_space<vmem>>, vector<1x64xf32>
    %c0_991 = arith.constant 0 : index
    %c0_992 = arith.constant 0 : index
    %c6_993 = arith.constant 6 : index
    %1411 = vector.load %arg6[%c0_991, %c0_992, %c6_993] : memref<4x9x72xf32, #tpu.memory_space<vmem>>, vector<1x8x64xf32>
    %1412 = vector.shape_cast %1411 : vector<1x8x64xf32> to vector<8x64xf32>
    %1413 = vector.broadcast %1410 : vector<1x64xf32> to vector<8x64xf32>
    %1414 = arith.mulf %1413, %1412 : vector<8x64xf32>
    %1415 = arith.addf %1409, %1414 : vector<8x64xf32>
    %c75_994 = arith.constant 75 : index
    %c0_995 = arith.constant 0 : index
    %1416 = vector.load %arg3[%c75_994, %c0_995] : memref<144x64xf32, #tpu.memory_space<vmem>>, vector<1x64xf32>
    %c0_996 = arith.constant 0 : index
    %c1_997 = arith.constant 1 : index
    %c2_998 = arith.constant 2 : index
    %1417 = vector.load %arg7[%c0_996, %c1_997, %c2_998] : memref<4x9x72xf32, #tpu.memory_space<vmem>>, vector<1x8x64xf32>
    %1418 = vector.shape_cast %1417 : vector<1x8x64xf32> to vector<8x64xf32>
    %1419 = vector.broadcast %1416 : vector<1x64xf32> to vector<8x64xf32>
    %1420 = arith.mulf %1419, %1418 : vector<8x64xf32>
    %1421 = arith.addf %1415, %1420 : vector<8x64xf32>
    %c76_999 = arith.constant 76 : index
    %c0_1000 = arith.constant 0 : index
    %1422 = vector.load %arg3[%c76_999, %c0_1000] : memref<144x64xf32, #tpu.memory_space<vmem>>, vector<1x64xf32>
    %c0_1001 = arith.constant 0 : index
    %c1_1002 = arith.constant 1 : index
    %c4_1003 = arith.constant 4 : index
    %1423 = vector.load %arg7[%c0_1001, %c1_1002, %c4_1003] : memref<4x9x72xf32, #tpu.memory_space<vmem>>, vector<1x8x64xf32>
    %1424 = vector.shape_cast %1423 : vector<1x8x64xf32> to vector<8x64xf32>
    %1425 = vector.broadcast %1422 : vector<1x64xf32> to vector<8x64xf32>
    %1426 = arith.mulf %1425, %1424 : vector<8x64xf32>
    %1427 = arith.addf %1421, %1426 : vector<8x64xf32>
    %c77_1004 = arith.constant 77 : index
    %c0_1005 = arith.constant 0 : index
    %1428 = vector.load %arg3[%c77_1004, %c0_1005] : memref<144x64xf32, #tpu.memory_space<vmem>>, vector<1x64xf32>
    %c0_1006 = arith.constant 0 : index
    %c1_1007 = arith.constant 1 : index
    %c6_1008 = arith.constant 6 : index
    %1429 = vector.load %arg7[%c0_1006, %c1_1007, %c6_1008] : memref<4x9x72xf32, #tpu.memory_space<vmem>>, vector<1x8x64xf32>
    %1430 = vector.shape_cast %1429 : vector<1x8x64xf32> to vector<8x64xf32>
    %1431 = vector.broadcast %1428 : vector<1x64xf32> to vector<8x64xf32>
    %1432 = arith.mulf %1431, %1430 : vector<8x64xf32>
    %1433 = arith.addf %1427, %1432 : vector<8x64xf32>
    %c78_1009 = arith.constant 78 : index
    %c0_1010 = arith.constant 0 : index
    %1434 = vector.load %arg3[%c78_1009, %c0_1010] : memref<144x64xf32, #tpu.memory_space<vmem>>, vector<1x64xf32>
    %c0_1011 = arith.constant 0 : index
    %c1_1012 = arith.constant 1 : index
    %c2_1013 = arith.constant 2 : index
    %1435 = vector.load %arg6[%c0_1011, %c1_1012, %c2_1013] : memref<4x9x72xf32, #tpu.memory_space<vmem>>, vector<1x8x64xf32>
    %1436 = vector.shape_cast %1435 : vector<1x8x64xf32> to vector<8x64xf32>
    %1437 = vector.broadcast %1434 : vector<1x64xf32> to vector<8x64xf32>
    %1438 = arith.mulf %1437, %1436 : vector<8x64xf32>
    %1439 = arith.addf %1433, %1438 : vector<8x64xf32>
    %c79_1014 = arith.constant 79 : index
    %c0_1015 = arith.constant 0 : index
    %1440 = vector.load %arg3[%c79_1014, %c0_1015] : memref<144x64xf32, #tpu.memory_space<vmem>>, vector<1x64xf32>
    %c0_1016 = arith.constant 0 : index
    %c1_1017 = arith.constant 1 : index
    %c4_1018 = arith.constant 4 : index
    %1441 = vector.load %arg6[%c0_1016, %c1_1017, %c4_1018] : memref<4x9x72xf32, #tpu.memory_space<vmem>>, vector<1x8x64xf32>
    %1442 = vector.shape_cast %1441 : vector<1x8x64xf32> to vector<8x64xf32>
    %1443 = vector.broadcast %1440 : vector<1x64xf32> to vector<8x64xf32>
    %1444 = arith.mulf %1443, %1442 : vector<8x64xf32>
    %1445 = arith.addf %1439, %1444 : vector<8x64xf32>
    %c80_1019 = arith.constant 80 : index
    %c0_1020 = arith.constant 0 : index
    %1446 = vector.load %arg3[%c80_1019, %c0_1020] : memref<144x64xf32, #tpu.memory_space<vmem>>, vector<1x64xf32>
    %c0_1021 = arith.constant 0 : index
    %c1_1022 = arith.constant 1 : index
    %c6_1023 = arith.constant 6 : index
    %1447 = vector.load %arg6[%c0_1021, %c1_1022, %c6_1023] : memref<4x9x72xf32, #tpu.memory_space<vmem>>, vector<1x8x64xf32>
    %1448 = vector.shape_cast %1447 : vector<1x8x64xf32> to vector<8x64xf32>
    %1449 = vector.broadcast %1446 : vector<1x64xf32> to vector<8x64xf32>
    %1450 = arith.mulf %1449, %1448 : vector<8x64xf32>
    %1451 = arith.addf %1445, %1450 : vector<8x64xf32>
    %c81_1024 = arith.constant 81 : index
    %c0_1025 = arith.constant 0 : index
    %1452 = vector.load %arg3[%c81_1024, %c0_1025] : memref<144x64xf32, #tpu.memory_space<vmem>>, vector<1x64xf32>
    %c1_1026 = arith.constant 1 : index
    %c0_1027 = arith.constant 0 : index
    %c2_1028 = arith.constant 2 : index
    %1453 = vector.load %arg6[%c1_1026, %c0_1027, %c2_1028] : memref<4x9x72xf32, #tpu.memory_space<vmem>>, vector<1x8x64xf32>
    %1454 = vector.shape_cast %1453 : vector<1x8x64xf32> to vector<8x64xf32>
    %1455 = vector.broadcast %1452 : vector<1x64xf32> to vector<8x64xf32>
    %1456 = arith.mulf %1455, %1454 : vector<8x64xf32>
    %1457 = arith.addf %1451, %1456 : vector<8x64xf32>
    %c82_1029 = arith.constant 82 : index
    %c0_1030 = arith.constant 0 : index
    %1458 = vector.load %arg3[%c82_1029, %c0_1030] : memref<144x64xf32, #tpu.memory_space<vmem>>, vector<1x64xf32>
    %c1_1031 = arith.constant 1 : index
    %c0_1032 = arith.constant 0 : index
    %c4_1033 = arith.constant 4 : index
    %1459 = vector.load %arg6[%c1_1031, %c0_1032, %c4_1033] : memref<4x9x72xf32, #tpu.memory_space<vmem>>, vector<1x8x64xf32>
    %1460 = vector.shape_cast %1459 : vector<1x8x64xf32> to vector<8x64xf32>
    %1461 = vector.broadcast %1458 : vector<1x64xf32> to vector<8x64xf32>
    %1462 = arith.mulf %1461, %1460 : vector<8x64xf32>
    %1463 = arith.addf %1457, %1462 : vector<8x64xf32>
    %c83_1034 = arith.constant 83 : index
    %c0_1035 = arith.constant 0 : index
    %1464 = vector.load %arg3[%c83_1034, %c0_1035] : memref<144x64xf32, #tpu.memory_space<vmem>>, vector<1x64xf32>
    %c1_1036 = arith.constant 1 : index
    %c0_1037 = arith.constant 0 : index
    %c6_1038 = arith.constant 6 : index
    %1465 = vector.load %arg6[%c1_1036, %c0_1037, %c6_1038] : memref<4x9x72xf32, #tpu.memory_space<vmem>>, vector<1x8x64xf32>
    %1466 = vector.shape_cast %1465 : vector<1x8x64xf32> to vector<8x64xf32>
    %1467 = vector.broadcast %1464 : vector<1x64xf32> to vector<8x64xf32>
    %1468 = arith.mulf %1467, %1466 : vector<8x64xf32>
    %1469 = arith.addf %1463, %1468 : vector<8x64xf32>
    %c84_1039 = arith.constant 84 : index
    %c0_1040 = arith.constant 0 : index
    %1470 = vector.load %arg3[%c84_1039, %c0_1040] : memref<144x64xf32, #tpu.memory_space<vmem>>, vector<1x64xf32>
    %c1_1041 = arith.constant 1 : index
    %c1_1042 = arith.constant 1 : index
    %c2_1043 = arith.constant 2 : index
    %1471 = vector.load %arg7[%c1_1041, %c1_1042, %c2_1043] : memref<4x9x72xf32, #tpu.memory_space<vmem>>, vector<1x8x64xf32>
    %1472 = vector.shape_cast %1471 : vector<1x8x64xf32> to vector<8x64xf32>
    %1473 = vector.broadcast %1470 : vector<1x64xf32> to vector<8x64xf32>
    %1474 = arith.mulf %1473, %1472 : vector<8x64xf32>
    %1475 = arith.addf %1469, %1474 : vector<8x64xf32>
    %c85_1044 = arith.constant 85 : index
    %c0_1045 = arith.constant 0 : index
    %1476 = vector.load %arg3[%c85_1044, %c0_1045] : memref<144x64xf32, #tpu.memory_space<vmem>>, vector<1x64xf32>
    %c1_1046 = arith.constant 1 : index
    %c1_1047 = arith.constant 1 : index
    %c4_1048 = arith.constant 4 : index
    %1477 = vector.load %arg7[%c1_1046, %c1_1047, %c4_1048] : memref<4x9x72xf32, #tpu.memory_space<vmem>>, vector<1x8x64xf32>
    %1478 = vector.shape_cast %1477 : vector<1x8x64xf32> to vector<8x64xf32>
    %1479 = vector.broadcast %1476 : vector<1x64xf32> to vector<8x64xf32>
    %1480 = arith.mulf %1479, %1478 : vector<8x64xf32>
    %1481 = arith.addf %1475, %1480 : vector<8x64xf32>
    %c86_1049 = arith.constant 86 : index
    %c0_1050 = arith.constant 0 : index
    %1482 = vector.load %arg3[%c86_1049, %c0_1050] : memref<144x64xf32, #tpu.memory_space<vmem>>, vector<1x64xf32>
    %c1_1051 = arith.constant 1 : index
    %c1_1052 = arith.constant 1 : index
    %c6_1053 = arith.constant 6 : index
    %1483 = vector.load %arg7[%c1_1051, %c1_1052, %c6_1053] : memref<4x9x72xf32, #tpu.memory_space<vmem>>, vector<1x8x64xf32>
    %1484 = vector.shape_cast %1483 : vector<1x8x64xf32> to vector<8x64xf32>
    %1485 = vector.broadcast %1482 : vector<1x64xf32> to vector<8x64xf32>
    %1486 = arith.mulf %1485, %1484 : vector<8x64xf32>
    %1487 = arith.addf %1481, %1486 : vector<8x64xf32>
    %c87_1054 = arith.constant 87 : index
    %c0_1055 = arith.constant 0 : index
    %1488 = vector.load %arg3[%c87_1054, %c0_1055] : memref<144x64xf32, #tpu.memory_space<vmem>>, vector<1x64xf32>
    %c1_1056 = arith.constant 1 : index
    %c1_1057 = arith.constant 1 : index
    %c2_1058 = arith.constant 2 : index
    %1489 = vector.load %arg6[%c1_1056, %c1_1057, %c2_1058] : memref<4x9x72xf32, #tpu.memory_space<vmem>>, vector<1x8x64xf32>
    %1490 = vector.shape_cast %1489 : vector<1x8x64xf32> to vector<8x64xf32>
    %1491 = vector.broadcast %1488 : vector<1x64xf32> to vector<8x64xf32>
    %1492 = arith.mulf %1491, %1490 : vector<8x64xf32>
    %1493 = arith.addf %1487, %1492 : vector<8x64xf32>
    %c88_1059 = arith.constant 88 : index
    %c0_1060 = arith.constant 0 : index
    %1494 = vector.load %arg3[%c88_1059, %c0_1060] : memref<144x64xf32, #tpu.memory_space<vmem>>, vector<1x64xf32>
    %c1_1061 = arith.constant 1 : index
    %c1_1062 = arith.constant 1 : index
    %c4_1063 = arith.constant 4 : index
    %1495 = vector.load %arg6[%c1_1061, %c1_1062, %c4_1063] : memref<4x9x72xf32, #tpu.memory_space<vmem>>, vector<1x8x64xf32>
    %1496 = vector.shape_cast %1495 : vector<1x8x64xf32> to vector<8x64xf32>
    %1497 = vector.broadcast %1494 : vector<1x64xf32> to vector<8x64xf32>
    %1498 = arith.mulf %1497, %1496 : vector<8x64xf32>
    %1499 = arith.addf %1493, %1498 : vector<8x64xf32>
    %c89_1064 = arith.constant 89 : index
    %c0_1065 = arith.constant 0 : index
    %1500 = vector.load %arg3[%c89_1064, %c0_1065] : memref<144x64xf32, #tpu.memory_space<vmem>>, vector<1x64xf32>
    %c1_1066 = arith.constant 1 : index
    %c1_1067 = arith.constant 1 : index
    %c6_1068 = arith.constant 6 : index
    %1501 = vector.load %arg6[%c1_1066, %c1_1067, %c6_1068] : memref<4x9x72xf32, #tpu.memory_space<vmem>>, vector<1x8x64xf32>
    %1502 = vector.shape_cast %1501 : vector<1x8x64xf32> to vector<8x64xf32>
    %1503 = vector.broadcast %1500 : vector<1x64xf32> to vector<8x64xf32>
    %1504 = arith.mulf %1503, %1502 : vector<8x64xf32>
    %1505 = arith.addf %1499, %1504 : vector<8x64xf32>
    %c90_1069 = arith.constant 90 : index
    %c0_1070 = arith.constant 0 : index
    %1506 = vector.load %arg3[%c90_1069, %c0_1070] : memref<144x64xf32, #tpu.memory_space<vmem>>, vector<1x64xf32>
    %c2_1071 = arith.constant 2 : index
    %c0_1072 = arith.constant 0 : index
    %c2_1073 = arith.constant 2 : index
    %1507 = vector.load %arg6[%c2_1071, %c0_1072, %c2_1073] : memref<4x9x72xf32, #tpu.memory_space<vmem>>, vector<1x8x64xf32>
    %1508 = vector.shape_cast %1507 : vector<1x8x64xf32> to vector<8x64xf32>
    %1509 = vector.broadcast %1506 : vector<1x64xf32> to vector<8x64xf32>
    %1510 = arith.mulf %1509, %1508 : vector<8x64xf32>
    %1511 = arith.addf %1505, %1510 : vector<8x64xf32>
    %c91_1074 = arith.constant 91 : index
    %c0_1075 = arith.constant 0 : index
    %1512 = vector.load %arg3[%c91_1074, %c0_1075] : memref<144x64xf32, #tpu.memory_space<vmem>>, vector<1x64xf32>
    %c2_1076 = arith.constant 2 : index
    %c0_1077 = arith.constant 0 : index
    %c4_1078 = arith.constant 4 : index
    %1513 = vector.load %arg6[%c2_1076, %c0_1077, %c4_1078] : memref<4x9x72xf32, #tpu.memory_space<vmem>>, vector<1x8x64xf32>
    %1514 = vector.shape_cast %1513 : vector<1x8x64xf32> to vector<8x64xf32>
    %1515 = vector.broadcast %1512 : vector<1x64xf32> to vector<8x64xf32>
    %1516 = arith.mulf %1515, %1514 : vector<8x64xf32>
    %1517 = arith.addf %1511, %1516 : vector<8x64xf32>
    %c92_1079 = arith.constant 92 : index
    %c0_1080 = arith.constant 0 : index
    %1518 = vector.load %arg3[%c92_1079, %c0_1080] : memref<144x64xf32, #tpu.memory_space<vmem>>, vector<1x64xf32>
    %c2_1081 = arith.constant 2 : index
    %c0_1082 = arith.constant 0 : index
    %c6_1083 = arith.constant 6 : index
    %1519 = vector.load %arg6[%c2_1081, %c0_1082, %c6_1083] : memref<4x9x72xf32, #tpu.memory_space<vmem>>, vector<1x8x64xf32>
    %1520 = vector.shape_cast %1519 : vector<1x8x64xf32> to vector<8x64xf32>
    %1521 = vector.broadcast %1518 : vector<1x64xf32> to vector<8x64xf32>
    %1522 = arith.mulf %1521, %1520 : vector<8x64xf32>
    %1523 = arith.addf %1517, %1522 : vector<8x64xf32>
    %c93_1084 = arith.constant 93 : index
    %c0_1085 = arith.constant 0 : index
    %1524 = vector.load %arg3[%c93_1084, %c0_1085] : memref<144x64xf32, #tpu.memory_space<vmem>>, vector<1x64xf32>
    %c2_1086 = arith.constant 2 : index
    %c1_1087 = arith.constant 1 : index
    %c2_1088 = arith.constant 2 : index
    %1525 = vector.load %arg7[%c2_1086, %c1_1087, %c2_1088] : memref<4x9x72xf32, #tpu.memory_space<vmem>>, vector<1x8x64xf32>
    %1526 = vector.shape_cast %1525 : vector<1x8x64xf32> to vector<8x64xf32>
    %1527 = vector.broadcast %1524 : vector<1x64xf32> to vector<8x64xf32>
    %1528 = arith.mulf %1527, %1526 : vector<8x64xf32>
    %1529 = arith.addf %1523, %1528 : vector<8x64xf32>
    %c94_1089 = arith.constant 94 : index
    %c0_1090 = arith.constant 0 : index
    %1530 = vector.load %arg3[%c94_1089, %c0_1090] : memref<144x64xf32, #tpu.memory_space<vmem>>, vector<1x64xf32>
    %c2_1091 = arith.constant 2 : index
    %c1_1092 = arith.constant 1 : index
    %c4_1093 = arith.constant 4 : index
    %1531 = vector.load %arg7[%c2_1091, %c1_1092, %c4_1093] : memref<4x9x72xf32, #tpu.memory_space<vmem>>, vector<1x8x64xf32>
    %1532 = vector.shape_cast %1531 : vector<1x8x64xf32> to vector<8x64xf32>
    %1533 = vector.broadcast %1530 : vector<1x64xf32> to vector<8x64xf32>
    %1534 = arith.mulf %1533, %1532 : vector<8x64xf32>
    %1535 = arith.addf %1529, %1534 : vector<8x64xf32>
    %c95_1094 = arith.constant 95 : index
    %c0_1095 = arith.constant 0 : index
    %1536 = vector.load %arg3[%c95_1094, %c0_1095] : memref<144x64xf32, #tpu.memory_space<vmem>>, vector<1x64xf32>
    %c2_1096 = arith.constant 2 : index
    %c1_1097 = arith.constant 1 : index
    %c6_1098 = arith.constant 6 : index
    %1537 = vector.load %arg7[%c2_1096, %c1_1097, %c6_1098] : memref<4x9x72xf32, #tpu.memory_space<vmem>>, vector<1x8x64xf32>
    %1538 = vector.shape_cast %1537 : vector<1x8x64xf32> to vector<8x64xf32>
    %1539 = vector.broadcast %1536 : vector<1x64xf32> to vector<8x64xf32>
    %1540 = arith.mulf %1539, %1538 : vector<8x64xf32>
    %1541 = arith.addf %1535, %1540 : vector<8x64xf32>
    %c96_1099 = arith.constant 96 : index
    %c0_1100 = arith.constant 0 : index
    %1542 = vector.load %arg3[%c96_1099, %c0_1100] : memref<144x64xf32, #tpu.memory_space<vmem>>, vector<1x64xf32>
    %c2_1101 = arith.constant 2 : index
    %c1_1102 = arith.constant 1 : index
    %c2_1103 = arith.constant 2 : index
    %1543 = vector.load %arg6[%c2_1101, %c1_1102, %c2_1103] : memref<4x9x72xf32, #tpu.memory_space<vmem>>, vector<1x8x64xf32>
    %1544 = vector.shape_cast %1543 : vector<1x8x64xf32> to vector<8x64xf32>
    %1545 = vector.broadcast %1542 : vector<1x64xf32> to vector<8x64xf32>
    %1546 = arith.mulf %1545, %1544 : vector<8x64xf32>
    %1547 = arith.addf %1541, %1546 : vector<8x64xf32>
    %c97_1104 = arith.constant 97 : index
    %c0_1105 = arith.constant 0 : index
    %1548 = vector.load %arg3[%c97_1104, %c0_1105] : memref<144x64xf32, #tpu.memory_space<vmem>>, vector<1x64xf32>
    %c2_1106 = arith.constant 2 : index
    %c1_1107 = arith.constant 1 : index
    %c4_1108 = arith.constant 4 : index
    %1549 = vector.load %arg6[%c2_1106, %c1_1107, %c4_1108] : memref<4x9x72xf32, #tpu.memory_space<vmem>>, vector<1x8x64xf32>
    %1550 = vector.shape_cast %1549 : vector<1x8x64xf32> to vector<8x64xf32>
    %1551 = vector.broadcast %1548 : vector<1x64xf32> to vector<8x64xf32>
    %1552 = arith.mulf %1551, %1550 : vector<8x64xf32>
    %1553 = arith.addf %1547, %1552 : vector<8x64xf32>
    %c98_1109 = arith.constant 98 : index
    %c0_1110 = arith.constant 0 : index
    %1554 = vector.load %arg3[%c98_1109, %c0_1110] : memref<144x64xf32, #tpu.memory_space<vmem>>, vector<1x64xf32>
    %c2_1111 = arith.constant 2 : index
    %c1_1112 = arith.constant 1 : index
    %c6_1113 = arith.constant 6 : index
    %1555 = vector.load %arg6[%c2_1111, %c1_1112, %c6_1113] : memref<4x9x72xf32, #tpu.memory_space<vmem>>, vector<1x8x64xf32>
    %1556 = vector.shape_cast %1555 : vector<1x8x64xf32> to vector<8x64xf32>
    %1557 = vector.broadcast %1554 : vector<1x64xf32> to vector<8x64xf32>
    %1558 = arith.mulf %1557, %1556 : vector<8x64xf32>
    %1559 = arith.addf %1553, %1558 : vector<8x64xf32>
    %c99_1114 = arith.constant 99 : index
    %c0_1115 = arith.constant 0 : index
    %1560 = vector.load %arg3[%c99_1114, %c0_1115] : memref<144x64xf32, #tpu.memory_space<vmem>>, vector<1x64xf32>
    %c3_1116 = arith.constant 3 : index
    %c0_1117 = arith.constant 0 : index
    %c2_1118 = arith.constant 2 : index
    %1561 = vector.load %arg6[%c3_1116, %c0_1117, %c2_1118] : memref<4x9x72xf32, #tpu.memory_space<vmem>>, vector<1x8x64xf32>
    %1562 = vector.shape_cast %1561 : vector<1x8x64xf32> to vector<8x64xf32>
    %1563 = vector.broadcast %1560 : vector<1x64xf32> to vector<8x64xf32>
    %1564 = arith.mulf %1563, %1562 : vector<8x64xf32>
    %1565 = arith.addf %1559, %1564 : vector<8x64xf32>
    %c100_1119 = arith.constant 100 : index
    %c0_1120 = arith.constant 0 : index
    %1566 = vector.load %arg3[%c100_1119, %c0_1120] : memref<144x64xf32, #tpu.memory_space<vmem>>, vector<1x64xf32>
    %c3_1121 = arith.constant 3 : index
    %c0_1122 = arith.constant 0 : index
    %c4_1123 = arith.constant 4 : index
    %1567 = vector.load %arg6[%c3_1121, %c0_1122, %c4_1123] : memref<4x9x72xf32, #tpu.memory_space<vmem>>, vector<1x8x64xf32>
    %1568 = vector.shape_cast %1567 : vector<1x8x64xf32> to vector<8x64xf32>
    %1569 = vector.broadcast %1566 : vector<1x64xf32> to vector<8x64xf32>
    %1570 = arith.mulf %1569, %1568 : vector<8x64xf32>
    %1571 = arith.addf %1565, %1570 : vector<8x64xf32>
    %c101_1124 = arith.constant 101 : index
    %c0_1125 = arith.constant 0 : index
    %1572 = vector.load %arg3[%c101_1124, %c0_1125] : memref<144x64xf32, #tpu.memory_space<vmem>>, vector<1x64xf32>
    %c3_1126 = arith.constant 3 : index
    %c0_1127 = arith.constant 0 : index
    %c6_1128 = arith.constant 6 : index
    %1573 = vector.load %arg6[%c3_1126, %c0_1127, %c6_1128] : memref<4x9x72xf32, #tpu.memory_space<vmem>>, vector<1x8x64xf32>
    %1574 = vector.shape_cast %1573 : vector<1x8x64xf32> to vector<8x64xf32>
    %1575 = vector.broadcast %1572 : vector<1x64xf32> to vector<8x64xf32>
    %1576 = arith.mulf %1575, %1574 : vector<8x64xf32>
    %1577 = arith.addf %1571, %1576 : vector<8x64xf32>
    %c102_1129 = arith.constant 102 : index
    %c0_1130 = arith.constant 0 : index
    %1578 = vector.load %arg3[%c102_1129, %c0_1130] : memref<144x64xf32, #tpu.memory_space<vmem>>, vector<1x64xf32>
    %c3_1131 = arith.constant 3 : index
    %c1_1132 = arith.constant 1 : index
    %c2_1133 = arith.constant 2 : index
    %1579 = vector.load %arg7[%c3_1131, %c1_1132, %c2_1133] : memref<4x9x72xf32, #tpu.memory_space<vmem>>, vector<1x8x64xf32>
    %1580 = vector.shape_cast %1579 : vector<1x8x64xf32> to vector<8x64xf32>
    %1581 = vector.broadcast %1578 : vector<1x64xf32> to vector<8x64xf32>
    %1582 = arith.mulf %1581, %1580 : vector<8x64xf32>
    %1583 = arith.addf %1577, %1582 : vector<8x64xf32>
    %c103_1134 = arith.constant 103 : index
    %c0_1135 = arith.constant 0 : index
    %1584 = vector.load %arg3[%c103_1134, %c0_1135] : memref<144x64xf32, #tpu.memory_space<vmem>>, vector<1x64xf32>
    %c3_1136 = arith.constant 3 : index
    %c1_1137 = arith.constant 1 : index
    %c4_1138 = arith.constant 4 : index
    %1585 = vector.load %arg7[%c3_1136, %c1_1137, %c4_1138] : memref<4x9x72xf32, #tpu.memory_space<vmem>>, vector<1x8x64xf32>
    %1586 = vector.shape_cast %1585 : vector<1x8x64xf32> to vector<8x64xf32>
    %1587 = vector.broadcast %1584 : vector<1x64xf32> to vector<8x64xf32>
    %1588 = arith.mulf %1587, %1586 : vector<8x64xf32>
    %1589 = arith.addf %1583, %1588 : vector<8x64xf32>
    %c104_1139 = arith.constant 104 : index
    %c0_1140 = arith.constant 0 : index
    %1590 = vector.load %arg3[%c104_1139, %c0_1140] : memref<144x64xf32, #tpu.memory_space<vmem>>, vector<1x64xf32>
    %c3_1141 = arith.constant 3 : index
    %c1_1142 = arith.constant 1 : index
    %c6_1143 = arith.constant 6 : index
    %1591 = vector.load %arg7[%c3_1141, %c1_1142, %c6_1143] : memref<4x9x72xf32, #tpu.memory_space<vmem>>, vector<1x8x64xf32>
    %1592 = vector.shape_cast %1591 : vector<1x8x64xf32> to vector<8x64xf32>
    %1593 = vector.broadcast %1590 : vector<1x64xf32> to vector<8x64xf32>
    %1594 = arith.mulf %1593, %1592 : vector<8x64xf32>
    %1595 = arith.addf %1589, %1594 : vector<8x64xf32>
    %c105_1144 = arith.constant 105 : index
    %c0_1145 = arith.constant 0 : index
    %1596 = vector.load %arg3[%c105_1144, %c0_1145] : memref<144x64xf32, #tpu.memory_space<vmem>>, vector<1x64xf32>
    %c3_1146 = arith.constant 3 : index
    %c1_1147 = arith.constant 1 : index
    %c2_1148 = arith.constant 2 : index
    %1597 = vector.load %arg6[%c3_1146, %c1_1147, %c2_1148] : memref<4x9x72xf32, #tpu.memory_space<vmem>>, vector<1x8x64xf32>
    %1598 = vector.shape_cast %1597 : vector<1x8x64xf32> to vector<8x64xf32>
    %1599 = vector.broadcast %1596 : vector<1x64xf32> to vector<8x64xf32>
    %1600 = arith.mulf %1599, %1598 : vector<8x64xf32>
    %1601 = arith.addf %1595, %1600 : vector<8x64xf32>
    %c106_1149 = arith.constant 106 : index
    %c0_1150 = arith.constant 0 : index
    %1602 = vector.load %arg3[%c106_1149, %c0_1150] : memref<144x64xf32, #tpu.memory_space<vmem>>, vector<1x64xf32>
    %c3_1151 = arith.constant 3 : index
    %c1_1152 = arith.constant 1 : index
    %c4_1153 = arith.constant 4 : index
    %1603 = vector.load %arg6[%c3_1151, %c1_1152, %c4_1153] : memref<4x9x72xf32, #tpu.memory_space<vmem>>, vector<1x8x64xf32>
    %1604 = vector.shape_cast %1603 : vector<1x8x64xf32> to vector<8x64xf32>
    %1605 = vector.broadcast %1602 : vector<1x64xf32> to vector<8x64xf32>
    %1606 = arith.mulf %1605, %1604 : vector<8x64xf32>
    %1607 = arith.addf %1601, %1606 : vector<8x64xf32>
    %c107_1154 = arith.constant 107 : index
    %c0_1155 = arith.constant 0 : index
    %1608 = vector.load %arg3[%c107_1154, %c0_1155] : memref<144x64xf32, #tpu.memory_space<vmem>>, vector<1x64xf32>
    %c3_1156 = arith.constant 3 : index
    %c1_1157 = arith.constant 1 : index
    %c6_1158 = arith.constant 6 : index
    %1609 = vector.load %arg6[%c3_1156, %c1_1157, %c6_1158] : memref<4x9x72xf32, #tpu.memory_space<vmem>>, vector<1x8x64xf32>
    %1610 = vector.shape_cast %1609 : vector<1x8x64xf32> to vector<8x64xf32>
    %1611 = vector.broadcast %1608 : vector<1x64xf32> to vector<8x64xf32>
    %1612 = arith.mulf %1611, %1610 : vector<8x64xf32>
    %1613 = arith.addf %1607, %1612 : vector<8x64xf32>
    %cst_1159 = arith.constant 0.000000e+00 : f32
    %1614 = vector.broadcast %cst_1159 : f32 to vector<8x64xf32>
    %c108_1160 = arith.constant 108 : index
    %c0_1161 = arith.constant 0 : index
    %1615 = vector.load %arg3[%c108_1160, %c0_1161] : memref<144x64xf32, #tpu.memory_space<vmem>>, vector<1x64xf32>
    %c0_1162 = arith.constant 0 : index
    %c0_1163 = arith.constant 0 : index
    %c2_1164 = arith.constant 2 : index
    %1616 = vector.load %arg6[%c0_1162, %c0_1163, %c2_1164] : memref<4x9x72xf32, #tpu.memory_space<vmem>>, vector<1x8x64xf32>
    %1617 = vector.shape_cast %1616 : vector<1x8x64xf32> to vector<8x64xf32>
    %1618 = vector.broadcast %1615 : vector<1x64xf32> to vector<8x64xf32>
    %1619 = arith.mulf %1618, %1617 : vector<8x64xf32>
    %1620 = arith.addf %1614, %1619 : vector<8x64xf32>
    %c109_1165 = arith.constant 109 : index
    %c0_1166 = arith.constant 0 : index
    %1621 = vector.load %arg3[%c109_1165, %c0_1166] : memref<144x64xf32, #tpu.memory_space<vmem>>, vector<1x64xf32>
    %c0_1167 = arith.constant 0 : index
    %c0_1168 = arith.constant 0 : index
    %c4_1169 = arith.constant 4 : index
    %1622 = vector.load %arg6[%c0_1167, %c0_1168, %c4_1169] : memref<4x9x72xf32, #tpu.memory_space<vmem>>, vector<1x8x64xf32>
    %1623 = vector.shape_cast %1622 : vector<1x8x64xf32> to vector<8x64xf32>
    %1624 = vector.broadcast %1621 : vector<1x64xf32> to vector<8x64xf32>
    %1625 = arith.mulf %1624, %1623 : vector<8x64xf32>
    %1626 = arith.addf %1620, %1625 : vector<8x64xf32>
    %c110_1170 = arith.constant 110 : index
    %c0_1171 = arith.constant 0 : index
    %1627 = vector.load %arg3[%c110_1170, %c0_1171] : memref<144x64xf32, #tpu.memory_space<vmem>>, vector<1x64xf32>
    %c0_1172 = arith.constant 0 : index
    %c0_1173 = arith.constant 0 : index
    %c6_1174 = arith.constant 6 : index
    %1628 = vector.load %arg6[%c0_1172, %c0_1173, %c6_1174] : memref<4x9x72xf32, #tpu.memory_space<vmem>>, vector<1x8x64xf32>
    %1629 = vector.shape_cast %1628 : vector<1x8x64xf32> to vector<8x64xf32>
    %1630 = vector.broadcast %1627 : vector<1x64xf32> to vector<8x64xf32>
    %1631 = arith.mulf %1630, %1629 : vector<8x64xf32>
    %1632 = arith.addf %1626, %1631 : vector<8x64xf32>
    %c111_1175 = arith.constant 111 : index
    %c0_1176 = arith.constant 0 : index
    %1633 = vector.load %arg3[%c111_1175, %c0_1176] : memref<144x64xf32, #tpu.memory_space<vmem>>, vector<1x64xf32>
    %c0_1177 = arith.constant 0 : index
    %c1_1178 = arith.constant 1 : index
    %c2_1179 = arith.constant 2 : index
    %1634 = vector.load %arg7[%c0_1177, %c1_1178, %c2_1179] : memref<4x9x72xf32, #tpu.memory_space<vmem>>, vector<1x8x64xf32>
    %1635 = vector.shape_cast %1634 : vector<1x8x64xf32> to vector<8x64xf32>
    %1636 = vector.broadcast %1633 : vector<1x64xf32> to vector<8x64xf32>
    %1637 = arith.mulf %1636, %1635 : vector<8x64xf32>
    %1638 = arith.addf %1632, %1637 : vector<8x64xf32>
    %c112_1180 = arith.constant 112 : index
    %c0_1181 = arith.constant 0 : index
    %1639 = vector.load %arg3[%c112_1180, %c0_1181] : memref<144x64xf32, #tpu.memory_space<vmem>>, vector<1x64xf32>
    %c0_1182 = arith.constant 0 : index
    %c1_1183 = arith.constant 1 : index
    %c4_1184 = arith.constant 4 : index
    %1640 = vector.load %arg7[%c0_1182, %c1_1183, %c4_1184] : memref<4x9x72xf32, #tpu.memory_space<vmem>>, vector<1x8x64xf32>
    %1641 = vector.shape_cast %1640 : vector<1x8x64xf32> to vector<8x64xf32>
    %1642 = vector.broadcast %1639 : vector<1x64xf32> to vector<8x64xf32>
    %1643 = arith.mulf %1642, %1641 : vector<8x64xf32>
    %1644 = arith.addf %1638, %1643 : vector<8x64xf32>
    %c113_1185 = arith.constant 113 : index
    %c0_1186 = arith.constant 0 : index
    %1645 = vector.load %arg3[%c113_1185, %c0_1186] : memref<144x64xf32, #tpu.memory_space<vmem>>, vector<1x64xf32>
    %c0_1187 = arith.constant 0 : index
    %c1_1188 = arith.constant 1 : index
    %c6_1189 = arith.constant 6 : index
    %1646 = vector.load %arg7[%c0_1187, %c1_1188, %c6_1189] : memref<4x9x72xf32, #tpu.memory_space<vmem>>, vector<1x8x64xf32>
    %1647 = vector.shape_cast %1646 : vector<1x8x64xf32> to vector<8x64xf32>
    %1648 = vector.broadcast %1645 : vector<1x64xf32> to vector<8x64xf32>
    %1649 = arith.mulf %1648, %1647 : vector<8x64xf32>
    %1650 = arith.addf %1644, %1649 : vector<8x64xf32>
    %c114_1190 = arith.constant 114 : index
    %c0_1191 = arith.constant 0 : index
    %1651 = vector.load %arg3[%c114_1190, %c0_1191] : memref<144x64xf32, #tpu.memory_space<vmem>>, vector<1x64xf32>
    %c0_1192 = arith.constant 0 : index
    %c1_1193 = arith.constant 1 : index
    %c2_1194 = arith.constant 2 : index
    %1652 = vector.load %arg6[%c0_1192, %c1_1193, %c2_1194] : memref<4x9x72xf32, #tpu.memory_space<vmem>>, vector<1x8x64xf32>
    %1653 = vector.shape_cast %1652 : vector<1x8x64xf32> to vector<8x64xf32>
    %1654 = vector.broadcast %1651 : vector<1x64xf32> to vector<8x64xf32>
    %1655 = arith.mulf %1654, %1653 : vector<8x64xf32>
    %1656 = arith.addf %1650, %1655 : vector<8x64xf32>
    %c115_1195 = arith.constant 115 : index
    %c0_1196 = arith.constant 0 : index
    %1657 = vector.load %arg3[%c115_1195, %c0_1196] : memref<144x64xf32, #tpu.memory_space<vmem>>, vector<1x64xf32>
    %c0_1197 = arith.constant 0 : index
    %c1_1198 = arith.constant 1 : index
    %c4_1199 = arith.constant 4 : index
    %1658 = vector.load %arg6[%c0_1197, %c1_1198, %c4_1199] : memref<4x9x72xf32, #tpu.memory_space<vmem>>, vector<1x8x64xf32>
    %1659 = vector.shape_cast %1658 : vector<1x8x64xf32> to vector<8x64xf32>
    %1660 = vector.broadcast %1657 : vector<1x64xf32> to vector<8x64xf32>
    %1661 = arith.mulf %1660, %1659 : vector<8x64xf32>
    %1662 = arith.addf %1656, %1661 : vector<8x64xf32>
    %c116_1200 = arith.constant 116 : index
    %c0_1201 = arith.constant 0 : index
    %1663 = vector.load %arg3[%c116_1200, %c0_1201] : memref<144x64xf32, #tpu.memory_space<vmem>>, vector<1x64xf32>
    %c0_1202 = arith.constant 0 : index
    %c1_1203 = arith.constant 1 : index
    %c6_1204 = arith.constant 6 : index
    %1664 = vector.load %arg6[%c0_1202, %c1_1203, %c6_1204] : memref<4x9x72xf32, #tpu.memory_space<vmem>>, vector<1x8x64xf32>
    %1665 = vector.shape_cast %1664 : vector<1x8x64xf32> to vector<8x64xf32>
    %1666 = vector.broadcast %1663 : vector<1x64xf32> to vector<8x64xf32>
    %1667 = arith.mulf %1666, %1665 : vector<8x64xf32>
    %1668 = arith.addf %1662, %1667 : vector<8x64xf32>
    %c117_1205 = arith.constant 117 : index
    %c0_1206 = arith.constant 0 : index
    %1669 = vector.load %arg3[%c117_1205, %c0_1206] : memref<144x64xf32, #tpu.memory_space<vmem>>, vector<1x64xf32>
    %c1_1207 = arith.constant 1 : index
    %c0_1208 = arith.constant 0 : index
    %c2_1209 = arith.constant 2 : index
    %1670 = vector.load %arg6[%c1_1207, %c0_1208, %c2_1209] : memref<4x9x72xf32, #tpu.memory_space<vmem>>, vector<1x8x64xf32>
    %1671 = vector.shape_cast %1670 : vector<1x8x64xf32> to vector<8x64xf32>
    %1672 = vector.broadcast %1669 : vector<1x64xf32> to vector<8x64xf32>
    %1673 = arith.mulf %1672, %1671 : vector<8x64xf32>
    %1674 = arith.addf %1668, %1673 : vector<8x64xf32>
    %c118_1210 = arith.constant 118 : index
    %c0_1211 = arith.constant 0 : index
    %1675 = vector.load %arg3[%c118_1210, %c0_1211] : memref<144x64xf32, #tpu.memory_space<vmem>>, vector<1x64xf32>
    %c1_1212 = arith.constant 1 : index
    %c0_1213 = arith.constant 0 : index
    %c4_1214 = arith.constant 4 : index
    %1676 = vector.load %arg6[%c1_1212, %c0_1213, %c4_1214] : memref<4x9x72xf32, #tpu.memory_space<vmem>>, vector<1x8x64xf32>
    %1677 = vector.shape_cast %1676 : vector<1x8x64xf32> to vector<8x64xf32>
    %1678 = vector.broadcast %1675 : vector<1x64xf32> to vector<8x64xf32>
    %1679 = arith.mulf %1678, %1677 : vector<8x64xf32>
    %1680 = arith.addf %1674, %1679 : vector<8x64xf32>
    %c119_1215 = arith.constant 119 : index
    %c0_1216 = arith.constant 0 : index
    %1681 = vector.load %arg3[%c119_1215, %c0_1216] : memref<144x64xf32, #tpu.memory_space<vmem>>, vector<1x64xf32>
    %c1_1217 = arith.constant 1 : index
    %c0_1218 = arith.constant 0 : index
    %c6_1219 = arith.constant 6 : index
    %1682 = vector.load %arg6[%c1_1217, %c0_1218, %c6_1219] : memref<4x9x72xf32, #tpu.memory_space<vmem>>, vector<1x8x64xf32>
    %1683 = vector.shape_cast %1682 : vector<1x8x64xf32> to vector<8x64xf32>
    %1684 = vector.broadcast %1681 : vector<1x64xf32> to vector<8x64xf32>
    %1685 = arith.mulf %1684, %1683 : vector<8x64xf32>
    %1686 = arith.addf %1680, %1685 : vector<8x64xf32>
    %c120_1220 = arith.constant 120 : index
    %c0_1221 = arith.constant 0 : index
    %1687 = vector.load %arg3[%c120_1220, %c0_1221] : memref<144x64xf32, #tpu.memory_space<vmem>>, vector<1x64xf32>
    %c1_1222 = arith.constant 1 : index
    %c1_1223 = arith.constant 1 : index
    %c2_1224 = arith.constant 2 : index
    %1688 = vector.load %arg7[%c1_1222, %c1_1223, %c2_1224] : memref<4x9x72xf32, #tpu.memory_space<vmem>>, vector<1x8x64xf32>
    %1689 = vector.shape_cast %1688 : vector<1x8x64xf32> to vector<8x64xf32>
    %1690 = vector.broadcast %1687 : vector<1x64xf32> to vector<8x64xf32>
    %1691 = arith.mulf %1690, %1689 : vector<8x64xf32>
    %1692 = arith.addf %1686, %1691 : vector<8x64xf32>
    %c121_1225 = arith.constant 121 : index
    %c0_1226 = arith.constant 0 : index
    %1693 = vector.load %arg3[%c121_1225, %c0_1226] : memref<144x64xf32, #tpu.memory_space<vmem>>, vector<1x64xf32>
    %c1_1227 = arith.constant 1 : index
    %c1_1228 = arith.constant 1 : index
    %c4_1229 = arith.constant 4 : index
    %1694 = vector.load %arg7[%c1_1227, %c1_1228, %c4_1229] : memref<4x9x72xf32, #tpu.memory_space<vmem>>, vector<1x8x64xf32>
    %1695 = vector.shape_cast %1694 : vector<1x8x64xf32> to vector<8x64xf32>
    %1696 = vector.broadcast %1693 : vector<1x64xf32> to vector<8x64xf32>
    %1697 = arith.mulf %1696, %1695 : vector<8x64xf32>
    %1698 = arith.addf %1692, %1697 : vector<8x64xf32>
    %c122_1230 = arith.constant 122 : index
    %c0_1231 = arith.constant 0 : index
    %1699 = vector.load %arg3[%c122_1230, %c0_1231] : memref<144x64xf32, #tpu.memory_space<vmem>>, vector<1x64xf32>
    %c1_1232 = arith.constant 1 : index
    %c1_1233 = arith.constant 1 : index
    %c6_1234 = arith.constant 6 : index
    %1700 = vector.load %arg7[%c1_1232, %c1_1233, %c6_1234] : memref<4x9x72xf32, #tpu.memory_space<vmem>>, vector<1x8x64xf32>
    %1701 = vector.shape_cast %1700 : vector<1x8x64xf32> to vector<8x64xf32>
    %1702 = vector.broadcast %1699 : vector<1x64xf32> to vector<8x64xf32>
    %1703 = arith.mulf %1702, %1701 : vector<8x64xf32>
    %1704 = arith.addf %1698, %1703 : vector<8x64xf32>
    %c123_1235 = arith.constant 123 : index
    %c0_1236 = arith.constant 0 : index
    %1705 = vector.load %arg3[%c123_1235, %c0_1236] : memref<144x64xf32, #tpu.memory_space<vmem>>, vector<1x64xf32>
    %c1_1237 = arith.constant 1 : index
    %c1_1238 = arith.constant 1 : index
    %c2_1239 = arith.constant 2 : index
    %1706 = vector.load %arg6[%c1_1237, %c1_1238, %c2_1239] : memref<4x9x72xf32, #tpu.memory_space<vmem>>, vector<1x8x64xf32>
    %1707 = vector.shape_cast %1706 : vector<1x8x64xf32> to vector<8x64xf32>
    %1708 = vector.broadcast %1705 : vector<1x64xf32> to vector<8x64xf32>
    %1709 = arith.mulf %1708, %1707 : vector<8x64xf32>
    %1710 = arith.addf %1704, %1709 : vector<8x64xf32>
    %c124_1240 = arith.constant 124 : index
    %c0_1241 = arith.constant 0 : index
    %1711 = vector.load %arg3[%c124_1240, %c0_1241] : memref<144x64xf32, #tpu.memory_space<vmem>>, vector<1x64xf32>
    %c1_1242 = arith.constant 1 : index
    %c1_1243 = arith.constant 1 : index
    %c4_1244 = arith.constant 4 : index
    %1712 = vector.load %arg6[%c1_1242, %c1_1243, %c4_1244] : memref<4x9x72xf32, #tpu.memory_space<vmem>>, vector<1x8x64xf32>
    %1713 = vector.shape_cast %1712 : vector<1x8x64xf32> to vector<8x64xf32>
    %1714 = vector.broadcast %1711 : vector<1x64xf32> to vector<8x64xf32>
    %1715 = arith.mulf %1714, %1713 : vector<8x64xf32>
    %1716 = arith.addf %1710, %1715 : vector<8x64xf32>
    %c125_1245 = arith.constant 125 : index
    %c0_1246 = arith.constant 0 : index
    %1717 = vector.load %arg3[%c125_1245, %c0_1246] : memref<144x64xf32, #tpu.memory_space<vmem>>, vector<1x64xf32>
    %c1_1247 = arith.constant 1 : index
    %c1_1248 = arith.constant 1 : index
    %c6_1249 = arith.constant 6 : index
    %1718 = vector.load %arg6[%c1_1247, %c1_1248, %c6_1249] : memref<4x9x72xf32, #tpu.memory_space<vmem>>, vector<1x8x64xf32>
    %1719 = vector.shape_cast %1718 : vector<1x8x64xf32> to vector<8x64xf32>
    %1720 = vector.broadcast %1717 : vector<1x64xf32> to vector<8x64xf32>
    %1721 = arith.mulf %1720, %1719 : vector<8x64xf32>
    %1722 = arith.addf %1716, %1721 : vector<8x64xf32>
    %c126_1250 = arith.constant 126 : index
    %c0_1251 = arith.constant 0 : index
    %1723 = vector.load %arg3[%c126_1250, %c0_1251] : memref<144x64xf32, #tpu.memory_space<vmem>>, vector<1x64xf32>
    %c2_1252 = arith.constant 2 : index
    %c0_1253 = arith.constant 0 : index
    %c2_1254 = arith.constant 2 : index
    %1724 = vector.load %arg6[%c2_1252, %c0_1253, %c2_1254] : memref<4x9x72xf32, #tpu.memory_space<vmem>>, vector<1x8x64xf32>
    %1725 = vector.shape_cast %1724 : vector<1x8x64xf32> to vector<8x64xf32>
    %1726 = vector.broadcast %1723 : vector<1x64xf32> to vector<8x64xf32>
    %1727 = arith.mulf %1726, %1725 : vector<8x64xf32>
    %1728 = arith.addf %1722, %1727 : vector<8x64xf32>
    %c127_1255 = arith.constant 127 : index
    %c0_1256 = arith.constant 0 : index
    %1729 = vector.load %arg3[%c127_1255, %c0_1256] : memref<144x64xf32, #tpu.memory_space<vmem>>, vector<1x64xf32>
    %c2_1257 = arith.constant 2 : index
    %c0_1258 = arith.constant 0 : index
    %c4_1259 = arith.constant 4 : index
    %1730 = vector.load %arg6[%c2_1257, %c0_1258, %c4_1259] : memref<4x9x72xf32, #tpu.memory_space<vmem>>, vector<1x8x64xf32>
    %1731 = vector.shape_cast %1730 : vector<1x8x64xf32> to vector<8x64xf32>
    %1732 = vector.broadcast %1729 : vector<1x64xf32> to vector<8x64xf32>
    %1733 = arith.mulf %1732, %1731 : vector<8x64xf32>
    %1734 = arith.addf %1728, %1733 : vector<8x64xf32>
    %c128_1260 = arith.constant 128 : index
    %c0_1261 = arith.constant 0 : index
    %1735 = vector.load %arg3[%c128_1260, %c0_1261] : memref<144x64xf32, #tpu.memory_space<vmem>>, vector<1x64xf32>
    %c2_1262 = arith.constant 2 : index
    %c0_1263 = arith.constant 0 : index
    %c6_1264 = arith.constant 6 : index
    %1736 = vector.load %arg6[%c2_1262, %c0_1263, %c6_1264] : memref<4x9x72xf32, #tpu.memory_space<vmem>>, vector<1x8x64xf32>
    %1737 = vector.shape_cast %1736 : vector<1x8x64xf32> to vector<8x64xf32>
    %1738 = vector.broadcast %1735 : vector<1x64xf32> to vector<8x64xf32>
    %1739 = arith.mulf %1738, %1737 : vector<8x64xf32>
    %1740 = arith.addf %1734, %1739 : vector<8x64xf32>
    %c129_1265 = arith.constant 129 : index
    %c0_1266 = arith.constant 0 : index
    %1741 = vector.load %arg3[%c129_1265, %c0_1266] : memref<144x64xf32, #tpu.memory_space<vmem>>, vector<1x64xf32>
    %c2_1267 = arith.constant 2 : index
    %c1_1268 = arith.constant 1 : index
    %c2_1269 = arith.constant 2 : index
    %1742 = vector.load %arg7[%c2_1267, %c1_1268, %c2_1269] : memref<4x9x72xf32, #tpu.memory_space<vmem>>, vector<1x8x64xf32>
    %1743 = vector.shape_cast %1742 : vector<1x8x64xf32> to vector<8x64xf32>
    %1744 = vector.broadcast %1741 : vector<1x64xf32> to vector<8x64xf32>
    %1745 = arith.mulf %1744, %1743 : vector<8x64xf32>
    %1746 = arith.addf %1740, %1745 : vector<8x64xf32>
    %c130_1270 = arith.constant 130 : index
    %c0_1271 = arith.constant 0 : index
    %1747 = vector.load %arg3[%c130_1270, %c0_1271] : memref<144x64xf32, #tpu.memory_space<vmem>>, vector<1x64xf32>
    %c2_1272 = arith.constant 2 : index
    %c1_1273 = arith.constant 1 : index
    %c4_1274 = arith.constant 4 : index
    %1748 = vector.load %arg7[%c2_1272, %c1_1273, %c4_1274] : memref<4x9x72xf32, #tpu.memory_space<vmem>>, vector<1x8x64xf32>
    %1749 = vector.shape_cast %1748 : vector<1x8x64xf32> to vector<8x64xf32>
    %1750 = vector.broadcast %1747 : vector<1x64xf32> to vector<8x64xf32>
    %1751 = arith.mulf %1750, %1749 : vector<8x64xf32>
    %1752 = arith.addf %1746, %1751 : vector<8x64xf32>
    %c131_1275 = arith.constant 131 : index
    %c0_1276 = arith.constant 0 : index
    %1753 = vector.load %arg3[%c131_1275, %c0_1276] : memref<144x64xf32, #tpu.memory_space<vmem>>, vector<1x64xf32>
    %c2_1277 = arith.constant 2 : index
    %c1_1278 = arith.constant 1 : index
    %c6_1279 = arith.constant 6 : index
    %1754 = vector.load %arg7[%c2_1277, %c1_1278, %c6_1279] : memref<4x9x72xf32, #tpu.memory_space<vmem>>, vector<1x8x64xf32>
    %1755 = vector.shape_cast %1754 : vector<1x8x64xf32> to vector<8x64xf32>
    %1756 = vector.broadcast %1753 : vector<1x64xf32> to vector<8x64xf32>
    %1757 = arith.mulf %1756, %1755 : vector<8x64xf32>
    %1758 = arith.addf %1752, %1757 : vector<8x64xf32>
    %c132_1280 = arith.constant 132 : index
    %c0_1281 = arith.constant 0 : index
    %1759 = vector.load %arg3[%c132_1280, %c0_1281] : memref<144x64xf32, #tpu.memory_space<vmem>>, vector<1x64xf32>
    %c2_1282 = arith.constant 2 : index
    %c1_1283 = arith.constant 1 : index
    %c2_1284 = arith.constant 2 : index
    %1760 = vector.load %arg6[%c2_1282, %c1_1283, %c2_1284] : memref<4x9x72xf32, #tpu.memory_space<vmem>>, vector<1x8x64xf32>
    %1761 = vector.shape_cast %1760 : vector<1x8x64xf32> to vector<8x64xf32>
    %1762 = vector.broadcast %1759 : vector<1x64xf32> to vector<8x64xf32>
    %1763 = arith.mulf %1762, %1761 : vector<8x64xf32>
    %1764 = arith.addf %1758, %1763 : vector<8x64xf32>
    %c133_1285 = arith.constant 133 : index
    %c0_1286 = arith.constant 0 : index
    %1765 = vector.load %arg3[%c133_1285, %c0_1286] : memref<144x64xf32, #tpu.memory_space<vmem>>, vector<1x64xf32>
    %c2_1287 = arith.constant 2 : index
    %c1_1288 = arith.constant 1 : index
    %c4_1289 = arith.constant 4 : index
    %1766 = vector.load %arg6[%c2_1287, %c1_1288, %c4_1289] : memref<4x9x72xf32, #tpu.memory_space<vmem>>, vector<1x8x64xf32>
    %1767 = vector.shape_cast %1766 : vector<1x8x64xf32> to vector<8x64xf32>
    %1768 = vector.broadcast %1765 : vector<1x64xf32> to vector<8x64xf32>
    %1769 = arith.mulf %1768, %1767 : vector<8x64xf32>
    %1770 = arith.addf %1764, %1769 : vector<8x64xf32>
    %c134_1290 = arith.constant 134 : index
    %c0_1291 = arith.constant 0 : index
    %1771 = vector.load %arg3[%c134_1290, %c0_1291] : memref<144x64xf32, #tpu.memory_space<vmem>>, vector<1x64xf32>
    %c2_1292 = arith.constant 2 : index
    %c1_1293 = arith.constant 1 : index
    %c6_1294 = arith.constant 6 : index
    %1772 = vector.load %arg6[%c2_1292, %c1_1293, %c6_1294] : memref<4x9x72xf32, #tpu.memory_space<vmem>>, vector<1x8x64xf32>
    %1773 = vector.shape_cast %1772 : vector<1x8x64xf32> to vector<8x64xf32>
    %1774 = vector.broadcast %1771 : vector<1x64xf32> to vector<8x64xf32>
    %1775 = arith.mulf %1774, %1773 : vector<8x64xf32>
    %1776 = arith.addf %1770, %1775 : vector<8x64xf32>
    %c135_1295 = arith.constant 135 : index
    %c0_1296 = arith.constant 0 : index
    %1777 = vector.load %arg3[%c135_1295, %c0_1296] : memref<144x64xf32, #tpu.memory_space<vmem>>, vector<1x64xf32>
    %c3_1297 = arith.constant 3 : index
    %c0_1298 = arith.constant 0 : index
    %c2_1299 = arith.constant 2 : index
    %1778 = vector.load %arg6[%c3_1297, %c0_1298, %c2_1299] : memref<4x9x72xf32, #tpu.memory_space<vmem>>, vector<1x8x64xf32>
    %1779 = vector.shape_cast %1778 : vector<1x8x64xf32> to vector<8x64xf32>
    %1780 = vector.broadcast %1777 : vector<1x64xf32> to vector<8x64xf32>
    %1781 = arith.mulf %1780, %1779 : vector<8x64xf32>
    %1782 = arith.addf %1776, %1781 : vector<8x64xf32>
    %c136_1300 = arith.constant 136 : index
    %c0_1301 = arith.constant 0 : index
    %1783 = vector.load %arg3[%c136_1300, %c0_1301] : memref<144x64xf32, #tpu.memory_space<vmem>>, vector<1x64xf32>
    %c3_1302 = arith.constant 3 : index
    %c0_1303 = arith.constant 0 : index
    %c4_1304 = arith.constant 4 : index
    %1784 = vector.load %arg6[%c3_1302, %c0_1303, %c4_1304] : memref<4x9x72xf32, #tpu.memory_space<vmem>>, vector<1x8x64xf32>
    %1785 = vector.shape_cast %1784 : vector<1x8x64xf32> to vector<8x64xf32>
    %1786 = vector.broadcast %1783 : vector<1x64xf32> to vector<8x64xf32>
    %1787 = arith.mulf %1786, %1785 : vector<8x64xf32>
    %1788 = arith.addf %1782, %1787 : vector<8x64xf32>
    %c137_1305 = arith.constant 137 : index
    %c0_1306 = arith.constant 0 : index
    %1789 = vector.load %arg3[%c137_1305, %c0_1306] : memref<144x64xf32, #tpu.memory_space<vmem>>, vector<1x64xf32>
    %c3_1307 = arith.constant 3 : index
    %c0_1308 = arith.constant 0 : index
    %c6_1309 = arith.constant 6 : index
    %1790 = vector.load %arg6[%c3_1307, %c0_1308, %c6_1309] : memref<4x9x72xf32, #tpu.memory_space<vmem>>, vector<1x8x64xf32>
    %1791 = vector.shape_cast %1790 : vector<1x8x64xf32> to vector<8x64xf32>
    %1792 = vector.broadcast %1789 : vector<1x64xf32> to vector<8x64xf32>
    %1793 = arith.mulf %1792, %1791 : vector<8x64xf32>
    %1794 = arith.addf %1788, %1793 : vector<8x64xf32>
    %c138_1310 = arith.constant 138 : index
    %c0_1311 = arith.constant 0 : index
    %1795 = vector.load %arg3[%c138_1310, %c0_1311] : memref<144x64xf32, #tpu.memory_space<vmem>>, vector<1x64xf32>
    %c3_1312 = arith.constant 3 : index
    %c1_1313 = arith.constant 1 : index
    %c2_1314 = arith.constant 2 : index
    %1796 = vector.load %arg7[%c3_1312, %c1_1313, %c2_1314] : memref<4x9x72xf32, #tpu.memory_space<vmem>>, vector<1x8x64xf32>
    %1797 = vector.shape_cast %1796 : vector<1x8x64xf32> to vector<8x64xf32>
    %1798 = vector.broadcast %1795 : vector<1x64xf32> to vector<8x64xf32>
    %1799 = arith.mulf %1798, %1797 : vector<8x64xf32>
    %1800 = arith.addf %1794, %1799 : vector<8x64xf32>
    %c139_1315 = arith.constant 139 : index
    %c0_1316 = arith.constant 0 : index
    %1801 = vector.load %arg3[%c139_1315, %c0_1316] : memref<144x64xf32, #tpu.memory_space<vmem>>, vector<1x64xf32>
    %c3_1317 = arith.constant 3 : index
    %c1_1318 = arith.constant 1 : index
    %c4_1319 = arith.constant 4 : index
    %1802 = vector.load %arg7[%c3_1317, %c1_1318, %c4_1319] : memref<4x9x72xf32, #tpu.memory_space<vmem>>, vector<1x8x64xf32>
    %1803 = vector.shape_cast %1802 : vector<1x8x64xf32> to vector<8x64xf32>
    %1804 = vector.broadcast %1801 : vector<1x64xf32> to vector<8x64xf32>
    %1805 = arith.mulf %1804, %1803 : vector<8x64xf32>
    %1806 = arith.addf %1800, %1805 : vector<8x64xf32>
    %c140_1320 = arith.constant 140 : index
    %c0_1321 = arith.constant 0 : index
    %1807 = vector.load %arg3[%c140_1320, %c0_1321] : memref<144x64xf32, #tpu.memory_space<vmem>>, vector<1x64xf32>
    %c3_1322 = arith.constant 3 : index
    %c1_1323 = arith.constant 1 : index
    %c6_1324 = arith.constant 6 : index
    %1808 = vector.load %arg7[%c3_1322, %c1_1323, %c6_1324] : memref<4x9x72xf32, #tpu.memory_space<vmem>>, vector<1x8x64xf32>
    %1809 = vector.shape_cast %1808 : vector<1x8x64xf32> to vector<8x64xf32>
    %1810 = vector.broadcast %1807 : vector<1x64xf32> to vector<8x64xf32>
    %1811 = arith.mulf %1810, %1809 : vector<8x64xf32>
    %1812 = arith.addf %1806, %1811 : vector<8x64xf32>
    %c141_1325 = arith.constant 141 : index
    %c0_1326 = arith.constant 0 : index
    %1813 = vector.load %arg3[%c141_1325, %c0_1326] : memref<144x64xf32, #tpu.memory_space<vmem>>, vector<1x64xf32>
    %c3_1327 = arith.constant 3 : index
    %c1_1328 = arith.constant 1 : index
    %c2_1329 = arith.constant 2 : index
    %1814 = vector.load %arg6[%c3_1327, %c1_1328, %c2_1329] : memref<4x9x72xf32, #tpu.memory_space<vmem>>, vector<1x8x64xf32>
    %1815 = vector.shape_cast %1814 : vector<1x8x64xf32> to vector<8x64xf32>
    %1816 = vector.broadcast %1813 : vector<1x64xf32> to vector<8x64xf32>
    %1817 = arith.mulf %1816, %1815 : vector<8x64xf32>
    %1818 = arith.addf %1812, %1817 : vector<8x64xf32>
    %c142_1330 = arith.constant 142 : index
    %c0_1331 = arith.constant 0 : index
    %1819 = vector.load %arg3[%c142_1330, %c0_1331] : memref<144x64xf32, #tpu.memory_space<vmem>>, vector<1x64xf32>
    %c3_1332 = arith.constant 3 : index
    %c1_1333 = arith.constant 1 : index
    %c4_1334 = arith.constant 4 : index
    %1820 = vector.load %arg6[%c3_1332, %c1_1333, %c4_1334] : memref<4x9x72xf32, #tpu.memory_space<vmem>>, vector<1x8x64xf32>
    %1821 = vector.shape_cast %1820 : vector<1x8x64xf32> to vector<8x64xf32>
    %1822 = vector.broadcast %1819 : vector<1x64xf32> to vector<8x64xf32>
    %1823 = arith.mulf %1822, %1821 : vector<8x64xf32>
    %1824 = arith.addf %1818, %1823 : vector<8x64xf32>
    %c143_1335 = arith.constant 143 : index
    %c0_1336 = arith.constant 0 : index
    %1825 = vector.load %arg3[%c143_1335, %c0_1336] : memref<144x64xf32, #tpu.memory_space<vmem>>, vector<1x64xf32>
    %c3_1337 = arith.constant 3 : index
    %c1_1338 = arith.constant 1 : index
    %c6_1339 = arith.constant 6 : index
    %1826 = vector.load %arg6[%c3_1337, %c1_1338, %c6_1339] : memref<4x9x72xf32, #tpu.memory_space<vmem>>, vector<1x8x64xf32>
    %1827 = vector.shape_cast %1826 : vector<1x8x64xf32> to vector<8x64xf32>
    %1828 = vector.broadcast %1825 : vector<1x64xf32> to vector<8x64xf32>
    %1829 = arith.mulf %1828, %1827 : vector<8x64xf32>
    %1830 = arith.addf %1824, %1829 : vector<8x64xf32>
    %1831 = tpu.concatenate %1179, %1396, %1613, %1830 in 1 : vector<8x64xf32>, vector<8x64xf32>, vector<8x64xf32>, vector<8x64xf32> -> vector<8x256xf32>
    %c0_1340 = arith.constant 0 : index
    %c1_1341 = arith.constant 1 : index
    %c0_1342 = arith.constant 0 : index
    %c0_1343 = arith.constant 0 : index
    %1832 = vector.load %arg4[%c0_1340, %c1_1341, %c0_1342, %c0_1343] : memref<1x2x8x256xf32, #tpu.memory_space<vmem>>, vector<1x1x8x256xf32>
    %1833 = vector.shape_cast %1832 : vector<1x1x8x256xf32> to vector<8x256xf32>
    %1834 = vector.shape_cast %1831 : vector<8x256xf32> to vector<1x1x8x256xf32>
    tpu.vector_store %arg4[%c0_1340, %c1_1341, %c0_1342, %c0_1343], %1834 {strides = array<i32>} : memref<1x2x8x256xf32, #tpu.memory_space<vmem>>, vector<1x1x8x256xf32>,
    return
  }
  func.func @transform_0(%arg0: i32, %arg1: i32) -> (i32, i32, i32, i32) {
    %c0_i32 = arith.constant 0 : i32
    %c0_i32_0 = arith.constant 0 : i32
    %c0_i32_1 = arith.constant 0 : i32
    %c0_i32_2 = arith.constant 0 : i32
    return %arg0, %c0_i32, %c0_i32_0, %c0_i32_1 : i32, i32, i32, i32
  }
  func.func @transform_1(%arg0: i32, %arg1: i32) -> (i32, i32) {
    %c0_i32 = arith.constant 0 : i32
    %c0_i32_0 = arith.constant 0 : i32
    %c0_i32_1 = arith.constant 0 : i32
    return %c0_i32, %c0_i32_0 : i32, i32
  }
  func.func @transform_2(%arg0: i32, %arg1: i32) -> (i32, i32, i32, i32) {
    %c0_i32 = arith.constant 0 : i32
    %c0_i32_0 = arith.constant 0 : i32
    %c0_i32_1 = arith.constant 0 : i32
    return %arg0, %c0_i32, %arg1, %c0_i32_0 : i32, i32, i32, i32
  }
}

</mosaic_0001>

<bundles_post_ra>
// kernel: _lambda_.1
= control target key start
LH: loop header
LB: loop body
LE: loop exit
PB: predicated region body
PF: predicated region fallthrough
CT: control target
= control target key end

     0   :  { %s2515_s9 = smov 0   ;;  %s2517_s10 = smov 0   ;;  %s3728_s0 = inlined_call_operand.vmem [shape: f32[2,4,18,72], index: 0, kind: input, shape index: {}]   ;;  %s3729_s1 = inlined_call_operand.vmem [shape: f32[144,64], index: 1, kind: input, shape index: {}]   ;;  %s3730_s2 = inlined_call_operand.vmem [shape: f32[2,2,16,256], index: 2, kind: output, shape index: {}]  }
   0x1   :  { %s2519_s11 = smov 0   ;;  %s2521_s12 = smov 0  }
   0x2   :  { %s2523_s13 = smov 0   ;;  %s2525_s14 = smov 0  }
   0x3   :  { %s2527_s15 = smov 0  }
   0x4 LB: > { %s21_s16 = sadd.s32 1, %s2484_s13  ;;  %s24_s17 = sadd.s32 1, %s2488_s14  ;;  %s2492_s15 = sphi %s2527_s15, %s12_s15   ;;  %s2488_s14 = sphi %s2525_s14, %s3737_s14   ;;  %s2484_s13 = sphi %s2523_s13, %s3736_s13   ;;  %s2480_s12 = sphi %s2521_s12, %s3735_s12   ;;  %s2476_s11 = sphi %s2519_s11, %s3734_s11   ;;  %s2472_s10 = sphi %s2517_s10, %s3733_s10   ;;  %s2468_s9 = sphi %s2515_s9, %s3732_s9  }
   0x5   : > { %p22_p0 = scmp.ge.s32.totalorder %s21_s16, 2  ;;  %s2210_s18 = sadd.s32 4294967295, %s2492_s15  }
   0x6   : > { %p90_p1 = scmp.ne.s32.totalorder %s2472_s10, %s2468_s9  ;;  %p91_p2 = scmp.eq.s32.totalorder %s2210_s18, 3 }
   0x7   : > { %s3739_s16 = smov (%p22_p0, %s21_s16), 0  ;;  %s3741_s17 = smov (!%p22_p0, %s24_s17), %s2488_s14 }
   0x8   : > { %s76_s19 = ssub.s32 %s2484_s13, %s3739_s16  ;;  %p26_p3 = scmp.ge.s32.totalorder %s3741_s17, 2 }
   0x9   : > { %p2214_p4 = scmp.ge.s32.totalorder %s2492_s15, 1  ;;  %p2561_p5 = por %p91_p2, %p90_p1 }
   0xa   : > { %p126_p6 = scmp.lt.s32.totalorder %s2492_s15, 5  ;;  %s3743_s17 = smov (%p26_p3, %s3741_s17), 0 }
   0xb   : > { %s75_s21 = ssub.s32 %s2488_s14, %s3743_s17  ;;  %s80_s23 = sadd.s32 1, %s2472_s10 }
   0xc   : > { %p127_p7 = pnand %p2214_p4, %p126_p6  ;;  %s77_s22 = sor.u32 %s76_s19, %s75_s21 }
   0xd   : > { %p78_p8 = scmp.eq.s32.totalorder %s77_s22, 0  ;;  %p147_p9 = scmp.lt.s32.totalorder (!%p127_p7), %s2480_s12, 1  ;;  %v153_v8 = vlaneseq (!%p127_p7)  ;;  %vm217_vm2 = vcmask (!%p127_p7), 31744   ;;  %vm250_vm3 = vcmask (!%p127_p7), 556032   ;;  %v2496_v12 = vmov (!%p127_p7), 0.0  }
   0xe   : > { %130 = sbr.rel (%p127_p7) target bundleno = 613 (0x265), region = 28  ;;  %s2217_s27 = sshll.u32 (!%p127_p7), %s2476_s11, 3  ;;  %vm299_vm5 = vcmask (!%p127_p7), 588800   ;;  %vm301_vm9 = vcmask (!%p127_p7), 582656   ;;  %vm378_vm13 = vcmask (!%p127_p7), 581632   ;;  %vm1266_vm14 = vcmask (!%p127_p7), 523264  }
   0xf   : > { %s2572_s24 = scalar_select %p78_p8, %s2472_s10, %s80_s23  }
  0x10   : > { %s2494_s4 = smov (!%p127_p7), 4   ;;  %s2495_s5 = smov (!%p127_p7), 124   ;;  %v154_v9 = vand.u32 (!%p127_p7), 127, %v153_v8  ;;  %v326_v11 = vshrl.u32 (!%p127_p7), %v153_v8, 7  ;;  %v328_v18 = vstv (!%p127_p7), %s2217_s27 }
  0x11   : > { %s2497_s6 = smov (!%p127_p7), 126   ;;  %s2498_s7 = smov (!%p127_p7), 122  }
  0x12   : > { %v159_v10 = vand.u32 (!%p127_p7), 3, %v154_v9  ;;  %v327_v23 = vadd.s32 (!%p127_p7), 8, %v326_v11  ;;  %v329_v24 = vadd.s32 (!%p127_p7), %v328_v18, %v326_v11  ;;  %vm167_vm4 = vcmp.ge.s32.totalorder (!%p127_p7), %v154_v9, 4 }
  0x13   : > { %vm168_vm6 = vcmp.lt.s32.totalorder (!%p127_p7), %v154_v9, 68 }
  0x14   : > { %vm172_vm0 = vcmp.lt.s32.totalorder (!%p127_p7), %v159_v10, 2  ;;  %vm174_vm1 = vcmp.ge.s32.totalorder (!%p127_p7), %v159_v10, 2  ;;  %v330_v34 = vadd.s32 (!%p127_p7), %v328_v18, %v327_v23  ;;  %vm331_vm7 = vcmp.lt.s32.totalorder (!%p127_p7), %v329_v24, 16  ;;  %vm169_vm8 = vmand (!%p127_p7), %vm167_vm4, %vm168_vm6 }
  0x15   : > { %s148_s25 = scalar_select %p147_p9, %s2480_s12, 1  ;;  %v2614_v13 = vsel %vm172_vm0, 0.25, %v2496_v12  ;;  %v2616_v14 = vsel %vm174_vm1, 0.25, %v2496_v12  ;;  %v2219_v45 = vsel %vm331_vm7, 1.0, %v2496_v12  ;;  %vm337_vm10 = vcmp.ge.s32.totalorder %v329_v24, 1 }
  0x16   : > { %vm332_vm11 = vcmp.lt.s32.totalorder %v330_v34, 16  ;;  %v2218_v46 = vsel %vm169_vm8, 1.0, %v2496_v12  ;;  %vm338_vm12 = vcmp.ge.s32.totalorder %v330_v34, 1  ;;  %v2221_v56 = vsel %vm337_vm10, 1.0, %v2496_v12  ;;  %s2371_s28 = sshll.u32 (%p2561_p5), %s2480_s12, 3 }
  0x17   : > { %s2375_s26 = smul.u32 96, %s148_s25  ;;  %v2220_v55 = vsel %vm332_vm11, 1.0, %v2496_v12  ;;  %v2645_v57 = vmul.f32 %v2219_v45, %v2218_v46  ;;  %v2222_v59 = vsel %vm338_vm12, 1.0, %v2496_v12  ;;  %s2499_s25 = smov 64  }
  0x18   : > { %v2660_v12 = vmul.f32 %v2220_v55, %v2218_v46 }
  0x19   : > { %s151_s30 = scalar_lea.vmem %s3728_s0, %s2375_s26  ;;  %s144_s26 = sand.u32 1, %s2468_s9  }
  0x1a   : > { %s176_s3 = scalar_lea.vmem %s151_s30, %s2217_s27  ;;  %s2370_s9 = sshll.u32 (%p2561_p5), %s2476_s11, 1 }
  0x1b   : > { %v177_v0 = vld [vmem:[%s176_s3] sm:$0xff]  ;;  %v178_v1 = vld [vmem:[%s176_s3 + $0x8] sm:$0x3]  ;;  %v2586_v3 = vld [vmem:[%s176_s3 + $0x18] sm:$0xff]  ;;  %s2117_s29 = sadd.s32 (%p2561_p5), %s2371_s28, %s2370_s9 }
  0x1c   : > { %193 = vrot.lane.b32.xlu0 %v177_v0, %s2494_s4  ;;  %226 = vrot.lane.b32.xlu1 %v177_v0, %s2495_s5  ;;  %v2584_v2 = vld [vmem:[%s176_s3 + $0x20] sm:$0x3]  ;;  %v2594_v4 = vld [vmem:[%s176_s3 + $0x38] sm:$0x3]  ;;  %v267_v16 = vmul.f32 0.75, %v177_v0  ;;  %v268_v26 = vmul.f32 0.75, %v178_v1 }
  0x1d   : > { %v2596_v5 = vld [vmem:[%s176_s3 + $0x30] sm:$0xff]  ;;  %v2606_v7 = vld [vmem:[%s176_s3 + $0x48] sm:$0xff]  ;;  %v270_v36 = vmul.f32 0.75, %v2584_v2  ;;  %v269_v38 = vmul.f32 0.75, %v2586_v3 }
  0x1e   : > { %v2604_v6 = vld [vmem:[%s176_s3 + $0x50] sm:$0x3] }
  0x1f   : > { %v2658_v11 = vmul.f32 0.75, %v2604_v6 }
  0x20   : > { %195 = vrot.lane.b32.xlu0 %v178_v1, %s2494_s4  ;;  %228 = vrot.lane.b32.xlu1 %v178_v1, %s2495_s5 }
  0x24   : > { %199 = vrot.lane.b32.xlu1 %v2584_v2, %s2494_s4  ;;  %197 = vrot.lane.b32.xlu0 %v2586_v3, %s2494_s4 }
  0x28   : > { %232 = vrot.lane.b32.xlu1 %v2584_v2, %s2495_s5  ;;  %230 = vrot.lane.b32.xlu0 %v2586_v3, %s2495_s5 }
  0x2c   : > { %203 = vrot.lane.b32.xlu1 %v2594_v4, %s2494_s4  ;;  %201 = vrot.lane.b32.xlu0 %v2596_v5, %s2494_s4 }
  0x30   : > { %236 = vrot.lane.b32.xlu1 %v2594_v4, %s2495_s5  ;;  %234 = vrot.lane.b32.xlu0 %v2596_v5, %s2495_s5 }
  0x34   : > { %207 = vrot.lane.b32.xlu1 %v2604_v6, %s2494_s4  ;;  %205 = vrot.lane.b32.xlu0 %v2606_v7, %s2494_s4 }
  0x38   : > { %240 = vrot.lane.b32.xlu1 %v2604_v6, %s2495_s5  ;;  %238 = vrot.lane.b32.xlu0 %v2606_v7, %s2495_s5 }
  0x8e   : > { %v194_v15 = vpop.permute.xlu0 %193  ;;  %v227_v17 = vpop.permute.xlu1 %226 }
  0x8f   : > { %v218_v19 = vsel %vm217_vm2, %v177_v0, %v194_v15  ;;  %v251_v20 = vsel %vm250_vm3, %v227_v17, %v177_v0  ;;  %v272_v0 = vmul.f32 0.75, %v2594_v4  ;;  %v2662_v15 = vmul.f32 %v2221_v56, %v2218_v46 }
  0x90   : > { %v259_v21 = vmul.f32 %v218_v19, %v2614_v13  ;;  %v283_v22 = vmul.f32 %v251_v20, %v2616_v14 }
  0x92   : > { %v275_v25 = vadd.f32 %v267_v16, %v259_v21  ;;  %v196_v27 = vpop.permute.xlu0 %195  ;;  %v229_v28 = vpop.permute.xlu1 %228  ;;  %v2664_v16 = vmul.f32 %v2222_v59, %v2218_v46 }
  0x93   : > { %v219_v29 = vsel %vm217_vm2, %v178_v1, %v196_v27  ;;  %v252_v30 = vsel %vm250_vm3, %v229_v28, %v178_v1 }
  0x94   : > { %v291_v31 = vadd.f32 %v283_v22, %v275_v25  ;;  %v260_v32 = vmul.f32 %v219_v29, %v2614_v13  ;;  %v284_v33 = vmul.f32 %v252_v30, %v2616_v14 }
  0x96   : > { %300 = vst.msk [vmem:[#allocation2] sm:$0xff] %vm299_vm5, %v291_v31  ;;  %v276_v35 = vadd.f32 %v268_v26, %v260_v32  ;;  %v200_v37 = vpop.permute.xlu1 %199  ;;  %v198_v39 = vpop.permute.xlu0 %197 }
  0x97   : > { %v221_v40 = vsel %vm217_vm2, %v2584_v2, %v200_v37  ;;  %v220_v41 = vsel %vm217_vm2, %v2586_v3, %v198_v39 }
  0x98   : > { %v292_v42 = vadd.f32 %v284_v33, %v276_v35  ;;  %v262_v43 = vmul.f32 %v221_v40, %v2614_v13  ;;  %v261_v44 = vmul.f32 %v220_v41, %v2614_v13 }
  0x9a   : > { %302 = vst.msk [vmem:[#allocation2 + $0x8] sm:$0x3] %vm301_vm9, %v292_v42  ;;  %v278_v47 = vadd.f32 %v270_v36, %v262_v43  ;;  %v277_v48 = vadd.f32 %v269_v38, %v261_v44  ;;  %v233_v49 = vpop.permute.xlu1 %232  ;;  %v231_v50 = vpop.permute.xlu0 %230  ;;  %v273_v38 = vmul.f32 0.75, %v2606_v7 }
  0x9b   : > { %v254_v51 = vsel %vm250_vm3, %v233_v49, %v2584_v2  ;;  %v253_v52 = vsel %vm250_vm3, %v231_v50, %v2586_v3  ;;  %v271_v2 = vmul.f32 0.75, %v2596_v5 }
  0x9c   : > { %v286_v53 = vmul.f32 %v254_v51, %v2616_v14  ;;  %v285_v54 = vmul.f32 %v253_v52, %v2616_v14 }
  0x9d   : > { %v309_v58 = vld [vmem:[#allocation2] sm:$0xff] }
  0x9e   : > { %v294_v60 = vadd.f32 %v286_v53, %v278_v47  ;;  %v293_v61 = vadd.f32 %v285_v54, %v277_v48  ;;  %v204_v62 = vpop.permute.xlu1 %203  ;;  %v202_v63 = vpop.permute.xlu0 %201  ;;  %v386_v8 = vmul.f32 0.75, %v309_v58  ;;  %v343_v20 = vmul.f32 0.25, %v309_v58 }
  0x9f   : > { %v223_v1 = vsel %vm217_vm2, %v2594_v4, %v204_v62  ;;  %v222_v3 = vsel %vm217_vm2, %v2596_v5, %v202_v63 }
  0xa0   : > { %304 = vst.msk [vmem:[#allocation2 + $0x18] sm:$0x3] %vm301_vm9, %v294_v60  ;;  %v264_v9 = vmul.f32 %v223_v1, %v2614_v13  ;;  %v263_v10 = vmul.f32 %v222_v3, %v2614_v13 }
  0xa1   : > { %303 = vst.msk [vmem:[#allocation2 + $0x10] sm:$0xff] %vm299_vm5, %v293_v61  ;;  %v310_v17 = vld [vmem:[#allocation2 + $0x8] sm:$0x1]  ;;  %v318_v19 = vld [vmem:[#allocation2 + $0x9] sm:$0x1] }
  0xa2   : > { %v317_v18 = vld [vmem:[#allocation2 + $0x1] sm:$0xff]  ;;  %v387_v23 = vmul.f32 0.75, %v310_v17  ;;  %v395_v24 = vmul.f32 0.25, %v318_v19  ;;  %v237_v25 = vpop.permute.xlu1 %236  ;;  %v235_v26 = vpop.permute.xlu0 %234  ;;  %v344_v27 = vmul.f32 0.25, %v310_v17  ;;  %v352_v28 = vmul.f32 0.75, %v318_v19 }
  0xa3   : > { %v394_v21 = vmul.f32 0.25, %v317_v18  ;;  %v351_v22 = vmul.f32 0.75, %v317_v18  ;;  %v280_v29 = vadd.f32 %v272_v0, %v264_v9  ;;  %v279_v30 = vadd.f32 %v271_v2, %v263_v10 }
  0xa4   : > { %v403_v33 = vadd.f32 %v395_v24, %v387_v23  ;;  %v256_v34 = vsel %vm250_vm3, %v237_v25, %v2594_v4  ;;  %v360_v35 = vadd.f32 %v352_v28, %v344_v27  ;;  %v255_v37 = vsel %vm250_vm3, %v235_v26, %v2596_v5 }
  0xa5   : > { %v402_v31 = vadd.f32 %v394_v21, %v386_v8  ;;  %v359_v32 = vadd.f32 %v351_v22, %v343_v20  ;;  %v288_v36 = vmul.f32 %v256_v34, %v2616_v14  ;;  %v287_v42 = vmul.f32 %v255_v37, %v2616_v14 }
  0xa6   : > { %v413_v41 = vmul.f32 %v2664_v16, %v403_v33  ;;  %v208_v43 = vpop.permute.xlu1 %207  ;;  %v206_v44 = vpop.permute.xlu0 %205  ;;  %v370_v47 = vmul.f32 %v2660_v12, %v360_v35 }
  0xa7   : > { %v412_v39 = vmul.f32 %v2662_v15, %v402_v31  ;;  %v369_v40 = vmul.f32 %v2645_v57, %v359_v32  ;;  %v312_v45 = vld [vmem:[#allocation2 + $0x18] sm:$0x1]  ;;  %v320_v4 = vld [vmem:[#allocation2 + $0x19] sm:$0x1]  ;;  %v296_v48 = vadd.f32 %v288_v36, %v280_v29  ;;  %v225_v5 = vsel %vm217_vm2, %v2604_v6, %v208_v43 }
  0xa8   : > { %v311_v46 = vld [vmem:[#allocation2 + $0x10] sm:$0xff]  ;;  %v224_v49 = vsel %vm217_vm2, %v2606_v7, %v206_v44  ;;  %421 = vst.msk [vmem:[#allocation4 + $0x8] sm:$0x1] %vm378_vm13, %v413_v41  ;;  %v295_v53 = vadd.f32 %v287_v42, %v279_v30  ;;  %v389_v54 = vmul.f32 0.75, %v312_v45  ;;  %379 = vst.msk [vmem:[#allocation3 + $0x8] sm:$0x1] %vm378_vm13, %v370_v47  ;;  %v266_v61 = vmul.f32 %v225_v5, %v2614_v13 }
  0xa9   : > { %420 = vst.msk [vmem:[#allocation4] sm:$0xff] %vm299_vm5, %v412_v39  ;;  %377 = vst.msk [vmem:[#allocation3] sm:$0xff] %vm299_vm5, %v369_v40  ;;  %v319_v50 = vld [vmem:[#allocation2 + $0x11] sm:$0xff]  ;;  %v388_v51 = vmul.f32 0.75, %v311_v46  ;;  %v345_v52 = vmul.f32 0.25, %v311_v46  ;;  %v397_v58 = vmul.f32 0.25, %v320_v4  ;;  %v265_v62 = vmul.f32 %v224_v49, %v2614_v13 }
  0xaa   : > { %v396_v55 = vmul.f32 0.25, %v319_v50  ;;  %v353_v56 = vmul.f32 0.75, %v319_v50  ;;  %306 = vst.msk [vmem:[#allocation2 + $0x28] sm:$0x3] %vm301_vm9, %v296_v48  ;;  %v346_v59 = vmul.f32 0.25, %v312_v45  ;;  %v354_v60 = vmul.f32 0.75, %v320_v4  ;;  %v241_v63 = vpop.permute.xlu1 %240  ;;  %v239_v0 = vpop.permute.xlu0 %238 }
  0xab   : > { %305 = vst.msk [vmem:[#allocation2 + $0x20] sm:$0xff] %vm299_vm5, %v295_v53  ;;  %v405_v3 = vadd.f32 %v397_v58, %v389_v54  ;;  %v258_v8 = vsel %vm250_vm3, %v241_v63, %v2604_v6  ;;  %v282_v10 = vadd.f32 %v2658_v11, %v266_v61  ;;  %v281_v17 = vadd.f32 %v273_v38, %v265_v62 }
  0xac   : > { %v404_v1 = vadd.f32 %v396_v55, %v388_v51  ;;  %v361_v2 = vadd.f32 %v353_v56, %v345_v52  ;;  %v362_v9 = vadd.f32 %v354_v60, %v346_v59  ;;  %v290_v18 = vmul.f32 %v258_v8, %v2616_v14  ;;  %v2260_v8 = vld [vmem:[%s3729_s1 + $0x25] ss:$0 sm:$0xff] }
  0xad   : > { %v415_v13 = vmul.f32 %v2664_v16, %v405_v3  ;;  %v257_v21 = vsel %vm250_vm3, %v239_v0, %v2606_v7  ;;  %v2224_v3 = vld [vmem:[%s3729_s1 + $0x1] ss:$0 sm:$0xff] }
  0xae   : > { %v414_v19 = vmul.f32 %v2662_v15, %v404_v1  ;;  %v371_v20 = vmul.f32 %v2645_v57, %v361_v2  ;;  %v372_v22 = vmul.f32 %v2660_v12, %v362_v9  ;;  %v298_v23 = vadd.f32 %v290_v18, %v282_v10  ;;  %v2223_v9 = vld [vmem:[%s3729_s1] ss:$0 sm:$0xff]  ;;  %v2259_v10 = vld [vmem:[%s3729_s1 + $0x24] ss:$0 sm:$0xff] }
  0xaf   : > { %v289_v6 = vmul.f32 %v257_v21, %v2616_v14  ;;  %423 = vst.msk [vmem:[#allocation4 + $0x18] sm:$0x1] %vm378_vm13, %v415_v13 }
  0xb0   : > { %v2700_v24 = vld [vmem:[#allocation4] sm:$0xff]  ;;  %422 = vst.msk [vmem:[#allocation4 + $0x10] sm:$0xff] %vm299_vm5, %v414_v19  ;;  %380 = vst.msk [vmem:[#allocation3 + $0x10] sm:$0xff] %vm299_vm5, %v371_v20 }
  0xb1   : > { %445 = vrot.lane.b32.xlu1 %v2700_v24, %s2495_s5  ;;  %435 = vrot.lane.b32.xlu0 %v2700_v24, %s2497_s6  ;;  %v314_v7 = vld [vmem:[#allocation2 + $0x28] sm:$0x1]  ;;  %v322_v11 = vld [vmem:[#allocation2 + $0x29] sm:$0x1]  ;;  %381 = vst.msk [vmem:[#allocation3 + $0x18] sm:$0x1] %vm378_vm13, %v372_v22  ;;  %v297_v14 = vadd.f32 %v289_v6, %v281_v17 }
  0xb2   : > { %308 = vst.msk [vmem:[#allocation2 + $0x38] sm:$0x3] %vm301_vm9, %v298_v23  ;;  %v313_v25 = vld [vmem:[#allocation2 + $0x20] sm:$0xff]  ;;  %v391_v27 = vmul.f32 0.75, %v314_v7  ;;  %v399_v28 = vmul.f32 0.25, %v322_v11  ;;  %v348_v37 = vmul.f32 0.25, %v314_v7 }
  0xb3   : > { %v321_v26 = vld [vmem:[#allocation2 + $0x21] sm:$0xff]  ;;  %v390_v29 = vmul.f32 0.75, %v313_v25  ;;  %v347_v31 = vmul.f32 0.25, %v313_v25  ;;  %307 = vst.msk [vmem:[#allocation2 + $0x30] sm:$0xff] %vm299_vm5, %v297_v14  ;;  %v356_v38 = vmul.f32 0.75, %v322_v11 }
  0xb4   : > { %v398_v30 = vmul.f32 0.25, %v321_v26  ;;  %v355_v32 = vmul.f32 0.75, %v321_v26  ;;  %v461_v33 = vld [vmem:[#allocation3] sm:$0xff]  ;;  %v407_v34 = vadd.f32 %v399_v28, %v391_v27 }
  0xb5   : > { %455 = vrot.lane.b32.xlu0 %v2700_v24, %s2498_s7  ;;  %467 = vrot.lane.b32.xlu1 %v461_v33, %s2497_s6  ;;  %v364_v42 = vadd.f32 %v356_v38, %v348_v37  ;;  %v2225_v22 = vld [vmem:[%s3729_s1 + $0x2] ss:$0 sm:$0xff]  ;;  %v2261_v23 = vld [vmem:[%s3729_s1 + $0x26] ss:$0 sm:$0xff] }
  0xb6   : > { %v406_v35 = vadd.f32 %v398_v30, %v390_v29  ;;  %v363_v36 = vadd.f32 %v355_v32, %v347_v31  ;;  %v417_v39 = vmul.f32 %v2664_v16, %v407_v34  ;;  %v2816_v7 = vld [vmem:[%s3729_s1 + $0x27] ss:$0 sm:$0xff]  ;;  %v2823_v29 = vld [vmem:[%s3729_s1 + $0x4] ss:$0 sm:$0xff]  ;;  %v2828_v30 = vld [vmem:[%s3729_s1 + $0x28] ss:$0 sm:$0xff] }
  0xb7   : > { %v374_v49 = vmul.f32 %v2660_v12, %v364_v42  ;;  %v591_v63 = vld [vmem:[#allocation4 + $0x11] sm:$0xff]  ;;  %v2840_v37 = vld [vmem:[%s3729_s1 + $0x29] ss:$0 sm:$0xff] }
  0xb8   : > { %v416_v40 = vmul.f32 %v2662_v15, %v406_v35  ;;  %v373_v41 = vmul.f32 %v2645_v57, %v363_v36  ;;  %425 = vst.msk [vmem:[#allocation4 + $0x28] sm:$0x1] %vm378_vm13, %v417_v39  ;;  %v1111_v0 = vld [vmem:[#allocation3 + $0x11] sm:$0xff]  ;;  %v2835_v36 = vld [vmem:[%s3729_s1 + $0x5] ss:$0 sm:$0xff] }
  0xb9   : > { %v316_v43 = vld [vmem:[#allocation2 + $0x38] sm:$0x1]  ;;  %v324_v44 = vld [vmem:[#allocation2 + $0x39] sm:$0x1]  ;;  %477 = vrot.lane.b32.xlu0 %v461_v33, %s2495_s5  ;;  %487 = vrot.lane.b32.xlu1 %v461_v33, %s2498_s7  ;;  %383 = vst.msk [vmem:[#allocation3 + $0x28] sm:$0x1] %vm378_vm13, %v374_v49 }
  0xba   : > { %424 = vst.msk [vmem:[#allocation4 + $0x20] sm:$0xff] %vm299_vm5, %v416_v40  ;;  %382 = vst.msk [vmem:[#allocation3 + $0x20] sm:$0xff] %vm299_vm5, %v373_v41  ;;  %v350_v45 = vmul.f32 0.25, %v316_v43  ;;  %v358_v4 = vmul.f32 0.75, %v324_v44  ;;  %v393_v46 = vmul.f32 0.75, %v316_v43  ;;  %v401_v47 = vmul.f32 0.25, %v324_v44 }
  0xbb   : > { %v315_v48 = vld [vmem:[#allocation2 + $0x30] sm:$0xff]  ;;  %v2295_v43 = vld [vmem:[%s3729_s1 + $0x48] ss:$0 sm:$0xff] }
  0xbc   : > { %v323_v5 = vld [vmem:[#allocation2 + $0x31] sm:$0xff]  ;;  %v392_v50 = vmul.f32 0.75, %v315_v48  ;;  %v409_v52 = vadd.f32 %v401_v47, %v393_v46  ;;  %v366_v53 = vadd.f32 %v358_v4, %v350_v45  ;;  %v349_v54 = vmul.f32 0.25, %v315_v48  ;;  %v2331_v47 = vld [vmem:[%s3729_s1 + $0x6c] ss:$0 sm:$0xff] }
  0xbd   : > { %v400_v51 = vmul.f32 0.25, %v323_v5  ;;  %v357_v55 = vmul.f32 0.75, %v323_v5  ;;  %1278 = vrot.lane.b32.xlu0 %v2700_v24, %s2497_s6  ;;  %1288 = vrot.lane.b32.xlu1 %v2700_v24, %s2495_s5  ;;  %v2296_v48 = vld [vmem:[%s3729_s1 + $0x49] ss:$0 sm:$0xff]  ;;  %v2332_v5 = vld [vmem:[%s3729_s1 + $0x6d] ss:$0 sm:$0xff] }
  0xbe   : > { %v419_v58 = vmul.f32 %v2664_v16, %v409_v52  ;;  %v376_v59 = vmul.f32 %v2660_v12, %v366_v53  ;;  %v493_v12 = vld [vmem:[#allocation4 + $0x1] sm:$0xff]  ;;  %v559_v16 = vld [vmem:[#allocation3 + $0x10] sm:$0xff] }
  0xbf   : > { %v408_v56 = vadd.f32 %v400_v51, %v392_v50  ;;  %v365_v60 = vadd.f32 %v357_v55, %v349_v54 }
  0xc0   : > { %427 = vst.msk [vmem:[#allocation4 + $0x38] sm:$0x1] %vm378_vm13, %v419_v58  ;;  %385 = vst.msk [vmem:[#allocation3 + $0x38] sm:$0x1] %vm378_vm13, %v376_v59 }
  0xc1   : > { %v418_v61 = vmul.f32 %v2662_v15, %v408_v56  ;;  %v375_v62 = vmul.f32 %v2645_v57, %v365_v60  ;;  %1310 = vrot.lane.b32.xlu0 %v461_v33, %s2497_s6  ;;  %1320 = vrot.lane.b32.xlu1 %v461_v33, %s2495_s5  ;;  %v1082_v57 = vld [vmem:[#allocation3 + $0x1] sm:$0xff]  ;;  %v526_v15 = vld [vmem:[#allocation4 + $0x10] sm:$0xff] }
  0xc2   : > { %v624_v1 = vld [vmem:[#allocation4 + $0x20] sm:$0xff] }
  0xc3   : > { %426 = vst.msk [vmem:[#allocation4 + $0x30] sm:$0xff] %vm299_vm5, %v418_v61  ;;  %384 = vst.msk [vmem:[#allocation3 + $0x30] sm:$0xff] %vm299_vm5, %v375_v62  ;;  %v657_v2 = vld [vmem:[#allocation3 + $0x20] sm:$0xff] }
  0xc4   : > { %v689_v28 = vld [vmem:[#allocation4 + $0x21] sm:$0xff] }
  0xc5   : > { %1298 = vrot.lane.b32.xlu0 %v2700_v24, %s2498_s7  ;;  %1330 = vrot.lane.b32.xlu1 %v461_v33, %s2498_s7  ;;  %v2811_v24 = vld [vmem:[%s3729_s1 + $0x3] ss:$0 sm:$0xff] }
  0xc9   : > { %499 = vrot.lane.b32.xlu0 %v493_v12, %s2497_s6  ;;  %1342 = vrot.lane.b32.xlu1 %v493_v12, %s2497_s6 }
  0xcd   : > { %509 = vrot.lane.b32.xlu0 %v493_v12, %s2495_s5  ;;  %1352 = vrot.lane.b32.xlu1 %v493_v12, %s2495_s5 }
  0xd1   : > { %519 = vrot.lane.b32.xlu0 %v493_v12, %s2498_s7  ;;  %1362 = vrot.lane.b32.xlu1 %v493_v12, %s2498_s7 }
  0xd5   : > { %1084 = vrot.lane.b32.xlu0 %v1082_v57, %s2497_s6  ;;  %1921 = vrot.lane.b32.xlu1 %v1082_v57, %s2497_s6 }
  0xd9   : > { %1089 = vrot.lane.b32.xlu0 %v1082_v57, %s2495_s5  ;;  %1926 = vrot.lane.b32.xlu1 %v1082_v57, %s2495_s5 }
  0xdd   : > { %1094 = vrot.lane.b32.xlu0 %v1082_v57, %s2498_s7  ;;  %1931 = vrot.lane.b32.xlu1 %v1082_v57, %s2498_s7 }
  0xe1   : > { %532 = vrot.lane.b32.xlu0 %v526_v15, %s2497_s6  ;;  %565 = vrot.lane.b32.xlu1 %v559_v16, %s2497_s6 }
  0xe5   : > { %1374 = vrot.lane.b32.xlu0 %v526_v15, %s2497_s6  ;;  %1406 = vrot.lane.b32.xlu1 %v559_v16, %s2497_s6 }
  0xe9   : > { %542 = vrot.lane.b32.xlu0 %v526_v15, %s2495_s5  ;;  %575 = vrot.lane.b32.xlu1 %v559_v16, %s2495_s5 }
  0xed   : > { %1384 = vrot.lane.b32.xlu0 %v526_v15, %s2495_s5  ;;  %1416 = vrot.lane.b32.xlu1 %v559_v16, %s2495_s5 }
  0xf1   : > { %552 = vrot.lane.b32.xlu0 %v526_v15, %s2498_s7  ;;  %585 = vrot.lane.b32.xlu1 %v559_v16, %s2498_s7 }
  0xf5   : > { %1394 = vrot.lane.b32.xlu0 %v526_v15, %s2498_s7  ;;  %1426 = vrot.lane.b32.xlu1 %v559_v16, %s2498_s7 }
  0xf9   : > { %597 = vrot.lane.b32.xlu0 %v591_v63, %s2497_s6  ;;  %1438 = vrot.lane.b32.xlu1 %v591_v63, %s2497_s6 }
  0xfd   : > { %607 = vrot.lane.b32.xlu0 %v591_v63, %s2495_s5  ;;  %1448 = vrot.lane.b32.xlu1 %v591_v63, %s2495_s5 }
 0x101   : > { %617 = vrot.lane.b32.xlu0 %v591_v63, %s2498_s7  ;;  %1458 = vrot.lane.b32.xlu1 %v591_v63, %s2498_s7 }
 0x105   : > { %1113 = vrot.lane.b32.xlu0 %v1111_v0, %s2497_s6  ;;  %1950 = vrot.lane.b32.xlu1 %v1111_v0, %s2497_s6 }
 0x109   : > { %1118 = vrot.lane.b32.xlu0 %v1111_v0, %s2495_s5  ;;  %1955 = vrot.lane.b32.xlu1 %v1111_v0, %s2495_s5 }
 0x10d   : > { %1123 = vrot.lane.b32.xlu0 %v1111_v0, %s2498_s7  ;;  %1960 = vrot.lane.b32.xlu1 %v1111_v0, %s2498_s7 }
 0x111   : > { %630 = vrot.lane.b32.xlu0 %v624_v1, %s2497_s6  ;;  %663 = vrot.lane.b32.xlu1 %v657_v2, %s2497_s6 }
 0x115   : > { %1470 = vrot.lane.b32.xlu0 %v624_v1, %s2497_s6  ;;  %1502 = vrot.lane.b32.xlu1 %v657_v2, %s2497_s6 }
 0x119   : > { %640 = vrot.lane.b32.xlu0 %v624_v1, %s2495_s5  ;;  %673 = vrot.lane.b32.xlu1 %v657_v2, %s2495_s5 }
 0x11d   : > { %1480 = vrot.lane.b32.xlu0 %v624_v1, %s2495_s5  ;;  %1512 = vrot.lane.b32.xlu1 %v657_v2, %s2495_s5 }
 0x121   : > { %650 = vrot.lane.b32.xlu0 %v624_v1, %s2498_s7  ;;  %683 = vrot.lane.b32.xlu1 %v657_v2, %s2498_s7 }
 0x123   : > { %v446_v17 = vpop.permute.xlu1 %445  ;;  %v436_v18 = vpop.permute.xlu0 %435 }
 0x124   : > { %v448_v19 = vmul.f32 %v2224_v3, %v446_v17  ;;  %v830_v20 = vmul.f32 %v2260_v8, %v446_v17  ;;  %v438_v13 = vmul.f32 %v2223_v9, %v436_v18  ;;  %v823_v21 = vmul.f32 %v2259_v10, %v436_v18 }
 0x125   : > { %1490 = vrot.lane.b32.xlu0 %v624_v1, %s2498_s7  ;;  %1522 = vrot.lane.b32.xlu1 %v657_v2, %s2498_s7 }
 0x126   : > { %v449_v14 = vadd.f32 %v448_v19, %v438_v13  ;;  %v831_v25 = vadd.f32 %v830_v20, %v823_v21  ;;  %v2297_v19 = vld [vmem:[%s3729_s1 + $0x4a] ss:$0 sm:$0xff]  ;;  %v2333_v20 = vld [vmem:[%s3729_s1 + $0x6e] ss:$0 sm:$0xff]  ;;  %v2298_v13 = vld [vmem:[%s3729_s1 + $0x4b] ss:$0 sm:$0xff] }
 0x127   : > { %v456_v6 = vpop.permute.xlu0 %455  ;;  %v468_v11 = vpop.permute.xlu1 %467  ;;  %v2334_v21 = vld [vmem:[%s3729_s1 + $0x6f] ss:$0 sm:$0xff] }
 0x128   : > { %v458_v26 = vmul.f32 %v2225_v22, %v456_v6  ;;  %v837_v27 = vmul.f32 %v2261_v23, %v456_v6  ;;  %v470_v33 = vmul.f32 %v2811_v24, %v468_v11  ;;  %v844_v34 = vmul.f32 %v2816_v7, %v468_v11 }
 0x129   : > { %695 = vrot.lane.b32.xlu0 %v689_v28, %s2497_s6  ;;  %1534 = vrot.lane.b32.xlu1 %v689_v28, %s2497_s6  ;;  %v1070_v44 = vmul.f32 %v2223_v9, %v468_v11  ;;  %v1186_v45 = vmul.f32 %v2259_v10, %v468_v11  ;;  %v1140_v10 = vld [vmem:[#allocation3 + $0x21] sm:$0xff] }
 0x12a   : > { %v459_v31 = vadd.f32 %v458_v26, %v449_v14  ;;  %v838_v32 = vadd.f32 %v837_v27, %v831_v25 }
 0x12b   : > { %v478_v35 = vpop.permute.xlu0 %477  ;;  %v488_v38 = vpop.permute.xlu1 %487 }
 0x12c   : > { %v471_v39 = vadd.f32 %v470_v33, %v459_v31  ;;  %v845_v40 = vadd.f32 %v844_v34, %v838_v32  ;;  %v480_v41 = vmul.f32 %v2823_v29, %v478_v35  ;;  %v851_v42 = vmul.f32 %v2828_v30, %v478_v35  ;;  %v2894_v31 = vld [vmem:[%s3729_s1 + $0x71] ss:$0 sm:$0xff] }
 0x12d   : > { %v1072_v4 = vmul.f32 %v2224_v3, %v478_v35  ;;  %v1188_v46 = vmul.f32 %v2260_v8, %v478_v35  ;;  %705 = vrot.lane.b32.xlu0 %v689_v28, %s2495_s5  ;;  %v490_v51 = vmul.f32 %v2835_v36, %v488_v38  ;;  %v858_v52 = vmul.f32 %v2840_v37, %v488_v38 }
 0x12e   : > { %v481_v49 = vadd.f32 %v480_v41, %v471_v39  ;;  %v852_v50 = vadd.f32 %v851_v42, %v845_v40  ;;  %1544 = vrot.lane.b32.xlu1 %v689_v28, %s2495_s5  ;;  %v1074_v55 = vmul.f32 %v2225_v22, %v488_v38  ;;  %v1190_v56 = vmul.f32 %v2261_v23, %v488_v38  ;;  %v2299_v22 = vld [vmem:[%s3729_s1 + $0x4c] ss:$0 sm:$0xff]  ;;  %v2335_v23 = vld [vmem:[%s3729_s1 + $0x70] ss:$0 sm:$0xff]  ;;  %v2901_v42 = vld [vmem:[%s3729_s1 + $0x6] ss:$0 sm:$0xff] }
 0x12f   : > { %v1073_v53 = vadd.f32 %v1072_v4, %v1070_v44  ;;  %v1189_v54 = vadd.f32 %v1188_v46, %v1186_v45  ;;  %v1279_v58 = vpop.permute.xlu0 %1278  ;;  %v1289_v59 = vpop.permute.xlu1 %1288 }
 0x130   : > { %v1281_v60 = vmul.f32 %v2295_v43, %v1279_v58  ;;  %v1660_v61 = vmul.f32 %v2331_v47, %v1279_v58  ;;  %v1291_v62 = vmul.f32 %v2296_v48, %v1289_v59  ;;  %v1667_v12 = vmul.f32 %v2332_v5, %v1289_v59 }
 0x131   : > { %v1075_v57 = vadd.f32 %v1074_v55, %v1073_v53  ;;  %v1191_v15 = vadd.f32 %v1190_v56, %v1189_v54  ;;  %715 = vrot.lane.b32.xlu0 %v689_v28, %s2498_s7  ;;  %v2861_v16 = vadd.f32 %v490_v51, %v481_v49  ;;  %v2863_v63 = vadd.f32 %v858_v52, %v852_v50 }
 0x132   : > { %v1292_v0 = vadd.f32 %v1291_v62, %v1281_v60  ;;  %v1668_v1 = vadd.f32 %v1667_v12, %v1660_v61  ;;  %1554 = vrot.lane.b32.xlu1 %v689_v28, %s2498_s7  ;;  %v2889_v28 = vld [vmem:[%s3729_s1 + $0x4d] ss:$0 sm:$0xff] }
 0x133   : > { %v1311_v2 = vpop.permute.xlu0 %1310  ;;  %v1321_v3 = vpop.permute.xlu1 %1320 }
 0x134   : > { %v1907_v8 = vmul.f32 %v2295_v43, %v1311_v2  ;;  %v2023_v9 = vmul.f32 %v2331_v47, %v1311_v2  ;;  %v1909_v17 = vmul.f32 %v2296_v48, %v1321_v3  ;;  %v2025_v18 = vmul.f32 %v2332_v5, %v1321_v3  ;;  %v2906_v43 = vld [vmem:[%s3729_s1 + $0x2a] ss:$0 sm:$0xff] }
 0x135   : > { %1142 = vrot.lane.b32.xlu0 %v1140_v10, %s2497_s6  ;;  %v1313_v32 = vmul.f32 %v2298_v13, %v1311_v2  ;;  %v1681_v33 = vmul.f32 %v2334_v21, %v1311_v2  ;;  %v1323_v38 = vmul.f32 %v2299_v22, %v1321_v3  ;;  %v1688_v39 = vmul.f32 %v2335_v23, %v1321_v3 }
 0x136   : > { %1979 = vrot.lane.b32.xlu1 %v1140_v10, %s2497_s6  ;;  %v1910_v6 = vadd.f32 %v1909_v17, %v1907_v8  ;;  %v2026_v11 = vadd.f32 %v2025_v18, %v2023_v9  ;;  %v2926_v9 = vld [vmem:[#allocation4 + $0x30] sm:$0xff]  ;;  %v2936_v17 = vld [vmem:[%s3729_s1 + $0x2b] ss:$0 sm:$0xff] }
 0x137   : > { %v1299_v14 = vpop.permute.xlu0 %1298  ;;  %v1331_v25 = vpop.permute.xlu1 %1330 }
 0x138   : > { %v1301_v26 = vmul.f32 %v2297_v19, %v1299_v14  ;;  %v1674_v27 = vmul.f32 %v2333_v20, %v1299_v14  ;;  %v1911_v34 = vmul.f32 %v2297_v19, %v1331_v25  ;;  %v2027_v35 = vmul.f32 %v2333_v20, %v1331_v25 }
 0x139   : > { %1147 = vrot.lane.b32.xlu0 %v1140_v10, %s2495_s5  ;;  %v1333_v44 = vmul.f32 %v2889_v28, %v1331_v25  ;;  %v1695_v45 = vmul.f32 %v2894_v31, %v1331_v25 }
 0x13a   : > { %v1302_v40 = vadd.f32 %v1301_v26, %v1292_v0  ;;  %v1675_v41 = vadd.f32 %v1674_v27, %v1668_v1  ;;  %1984 = vrot.lane.b32.xlu1 %v1140_v10, %s2495_s5  ;;  %v1912_v4 = vadd.f32 %v1911_v34, %v1910_v6  ;;  %v2028_v46 = vadd.f32 %v2027_v35, %v2026_v11 }
 0x13b   : > { %v500_v47 = vpop.permute.xlu0 %499  ;;  %v1343_v48 = vpop.permute.xlu1 %1342 }
 0x13c   : > { %v1314_v5 = vadd.f32 %v1313_v32, %v1302_v40  ;;  %v1682_v49 = vadd.f32 %v1681_v33, %v1675_v41  ;;  %v1076_v50 = vmul.f32 %v2811_v24, %v500_v47  ;;  %v1192_v51 = vmul.f32 %v2816_v7, %v500_v47  ;;  %v2301_v24 = vld [vmem:[%s3729_s1 + $0x4e] ss:$0 sm:$0xff]  ;;  %v2337_v7 = vld [vmem:[%s3729_s1 + $0x72] ss:$0 sm:$0xff] }
 0x13d   : > { %v1913_v52 = vmul.f32 %v2298_v13, %v1343_v48  ;;  %v2029_v53 = vmul.f32 %v2334_v21, %v1343_v48  ;;  %1152 = vrot.lane.b32.xlu0 %v1140_v10, %s2498_s7  ;;  %v502_v54 = vmul.f32 %v2901_v42, %v500_v47  ;;  %v865_v55 = vmul.f32 %v2906_v43, %v500_v47 }
 0x13e   : > { %v1324_v56 = vadd.f32 %v1323_v38, %v1314_v5  ;;  %v1689_v58 = vadd.f32 %v1688_v39, %v1682_v49  ;;  %v1077_v59 = vadd.f32 %v1076_v50, %v1075_v57  ;;  %v1193_v60 = vadd.f32 %v1192_v51, %v1191_v15  ;;  %1989 = vrot.lane.b32.xlu1 %v1140_v10, %s2498_s7  ;;  %v2931_v10 = vld [vmem:[%s3729_s1 + $0x7] ss:$0 sm:$0xff]  ;;  %v2231_v38 = vld [vmem:[%s3729_s1 + $0x8] ss:$0 sm:$0xff]  ;;  %v2267_v39 = vld [vmem:[%s3729_s1 + $0x2c] ss:$0 sm:$0xff] }
 0x13f   : > { %v1914_v61 = vadd.f32 %v1913_v52, %v1912_v4  ;;  %v2030_v62 = vadd.f32 %v2029_v53, %v2028_v46  ;;  %v510_v12 = vpop.permute.xlu0 %509  ;;  %v1353_v0 = vpop.permute.xlu1 %1352  ;;  %v503_v1 = vadd.f32 %v502_v54, %v2861_v16  ;;  %v866_v2 = vadd.f32 %v865_v55, %v2863_v63  ;;  %v2303_v4 = vld [vmem:[%s3729_s1 + $0x50] ss:$0 sm:$0xff]  ;;  %v2339_v46 = vld [vmem:[%s3729_s1 + $0x74] ss:$0 sm:$0xff] }
 0x140   : > { %v1078_v57 = vmul.f32 %v2823_v29, %v510_v12  ;;  %v1194_v15 = vmul.f32 %v2828_v30, %v510_v12  ;;  %v1915_v3 = vmul.f32 %v2299_v22, %v1353_v0  ;;  %v2031_v8 = vmul.f32 %v2335_v23, %v1353_v0  ;;  %v2940_v29 = vld [vmem:[#allocation3 + $0x30] sm:$0xff]  ;;  %v2302_v22 = vld [vmem:[%s3729_s1 + $0x4f] ss:$0 sm:$0xff] }
 0x141   : > { %728 = vrot.lane.b32.xlu0 %v2926_v9, %s2497_s6  ;;  %v1334_v30 = vadd.f32 %v1333_v44, %v1324_v56  ;;  %v1345_v16 = vmul.f32 %v2301_v24, %v1343_v48  ;;  %v1696_v63 = vadd.f32 %v1695_v45, %v1689_v58  ;;  %v1702_v18 = vmul.f32 %v2337_v7, %v1343_v48  ;;  %v2338_v23 = vld [vmem:[%s3729_s1 + $0x73] ss:$0 sm:$0xff] }
 0x142   : > { %761 = vrot.lane.b32.xlu1 %v2940_v29, %s2497_s6  ;;  %v1079_v19 = vadd.f32 %v1078_v57, %v1077_v59  ;;  %v1195_v20 = vadd.f32 %v1194_v15, %v1193_v60  ;;  %v1916_v13 = vadd.f32 %v1915_v3, %v1914_v61  ;;  %v2032_v21 = vadd.f32 %v2031_v8, %v2030_v62 }
 0x143   : > { %v520_v6 = vpop.permute.xlu0 %519  ;;  %v1363_v11 = vpop.permute.xlu1 %1362  ;;  %v1346_v14 = vadd.f32 %v1345_v16, %v1334_v30  ;;  %v1703_v25 = vadd.f32 %v1702_v18, %v1696_v63  ;;  %v512_v26 = vmul.f32 %v2931_v10, %v510_v12  ;;  %v872_v27 = vmul.f32 %v2936_v17, %v510_v12 }
 0x144   : > { %v1080_v32 = vmul.f32 %v2835_v36, %v520_v6  ;;  %v1196_v33 = vmul.f32 %v2840_v37, %v520_v6  ;;  %v1917_v34 = vmul.f32 %v2889_v28, %v1363_v11  ;;  %v2033_v35 = vmul.f32 %v2894_v31, %v1363_v11 }
 0x145   : > { %1566 = vrot.lane.b32.xlu0 %v2926_v9, %s2497_s6  ;;  %v513_v40 = vadd.f32 %v512_v26, %v503_v1  ;;  %v873_v41 = vadd.f32 %v872_v27, %v866_v2  ;;  %v1355_v36 = vmul.f32 %v2302_v22, %v1353_v0  ;;  %v1709_v44 = vmul.f32 %v2338_v23, %v1353_v0 }
 0x146   : > { %1598 = vrot.lane.b32.xlu1 %v2940_v29, %s2497_s6  ;;  %v1081_v37 = vadd.f32 %v1080_v32, %v1079_v19  ;;  %v1197_v28 = vadd.f32 %v1196_v33, %v1195_v20  ;;  %v1918_v31 = vadd.f32 %v1917_v34, %v1916_v13  ;;  %v2034_v45 = vadd.f32 %v2033_v35, %v2032_v21  ;;  %v2268_v21 = vld [vmem:[%s3729_s1 + $0x2d] ss:$0 sm:$0xff]  ;;  %v2304_v34 = vld [vmem:[%s3729_s1 + $0x51] ss:$0 sm:$0xff]  ;;  %v2340_v35 = vld [vmem:[%s3729_s1 + $0x75] ss:$0 sm:$0xff] }
 0x147   : > { %v1085_v47 = vpop.permute.xlu0 %1084  ;;  %v1922_v48 = vpop.permute.xlu1 %1921  ;;  %v1356_v5 = vadd.f32 %v1355_v36, %v1346_v14  ;;  %v1710_v49 = vadd.f32 %v1709_v44, %v1703_v25  ;;  %v522_v50 = vmul.f32 %v2231_v38, %v520_v6  ;;  %v879_v51 = vmul.f32 %v2267_v39, %v520_v6 }
 0x148   : > { %v1087_v52 = vmul.f32 %v2901_v42, %v1085_v47  ;;  %v1198_v53 = vmul.f32 %v2906_v43, %v1085_v47  ;;  %v1924_v54 = vmul.f32 %v2301_v24, %v1922_v48  ;;  %v2035_v55 = vmul.f32 %v2337_v7, %v1922_v48 }
 0x149   : > { %738 = vrot.lane.b32.xlu0 %v2926_v9, %s2495_s5  ;;  %v1365_v56 = vmul.f32 %v2303_v4, %v1363_v11  ;;  %v1716_v58 = vmul.f32 %v2339_v46, %v1363_v11  ;;  %v523_v59 = vadd.f32 %v522_v50, %v513_v40  ;;  %v880_v60 = vadd.f32 %v879_v51, %v873_v41 }
 0x14a   : > { %v1088_v61 = vadd.f32 %v1087_v52, %v1081_v37  ;;  %v1199_v62 = vadd.f32 %v1198_v53, %v1197_v28  ;;  %v1925_v12 = vadd.f32 %v1924_v54, %v1918_v31  ;;  %v2036_v0 = vadd.f32 %v2035_v55, %v2034_v45  ;;  %771 = vrot.lane.b32.xlu1 %v2940_v29, %s2495_s5  ;;  %v2305_v55 = vld [vmem:[%s3729_s1 + $0x52] ss:$0 sm:$0xff] }
 0x14b   : > { %v1090_v1 = vpop.permute.xlu0 %1089  ;;  %v1927_v42 = vpop.permute.xlu1 %1926  ;;  %v1366_v2 = vadd.f32 %v1365_v56, %v1356_v5  ;;  %v1717_v43 = vadd.f32 %v1716_v58, %v1710_v49  ;;  %v2341_v56 = vld [vmem:[%s3729_s1 + $0x76] ss:$0 sm:$0xff] }
 0x14c   : > { %v1092_v24 = vmul.f32 %v2931_v10, %v1090_v1  ;;  %v1200_v7 = vmul.f32 %v2936_v17, %v1090_v1  ;;  %v1929_v57 = vmul.f32 %v2302_v22, %v1927_v42  ;;  %v2037_v15 = vmul.f32 %v2338_v23, %v1927_v42  ;;  %v2232_v17 = vld [vmem:[%s3729_s1 + $0x9] ss:$0 sm:$0xff] }
 0x14d   : > { %1576 = vrot.lane.b32.xlu0 %v2926_v9, %s2495_s5 }
 0x14e   : > { %v1093_v3 = vadd.f32 %v1092_v24, %v1088_v61  ;;  %v1201_v8 = vadd.f32 %v1200_v7, %v1199_v62  ;;  %v1930_v30 = vadd.f32 %v1929_v57, %v1925_v12  ;;  %v2038_v16 = vadd.f32 %v2037_v15, %v2036_v0  ;;  %1608 = vrot.lane.b32.xlu1 %v2940_v29, %s2495_s5  ;;  %v3027_v0 = vld [vmem:[%s3729_s1 + $0xc] ss:$0 sm:$0xff]  ;;  %v2234_v7 = vld [vmem:[%s3729_s1 + $0xb] ss:$0 sm:$0xff]  ;;  %v2270_v57 = vld [vmem:[%s3729_s1 + $0x2f] ss:$0 sm:$0xff] }
 0x14f   : > { %v1095_v63 = vpop.permute.xlu0 %1094  ;;  %v1932_v18 = vpop.permute.xlu1 %1931  ;;  %v3044_v15 = vld [vmem:[%s3729_s1 + $0x54] ss:$0 sm:$0xff] }
 0x150   : > { %v1097_v19 = vmul.f32 %v2231_v38, %v1095_v63  ;;  %v1202_v20 = vmul.f32 %v2267_v39, %v1095_v63  ;;  %v1934_v13 = vmul.f32 %v2303_v4, %v1932_v18  ;;  %v2039_v10 = vmul.f32 %v2339_v46, %v1932_v18  ;;  %v2233_v4 = vld [vmem:[%s3729_s1 + $0xa] ss:$0 sm:$0xff]  ;;  %v2269_v46 = vld [vmem:[%s3729_s1 + $0x2e] ss:$0 sm:$0xff]  ;;  %v3060_v63 = vld [vmem:[%s3729_s1 + $0x31] ss:$0 sm:$0xff] }
 0x151   : > { %748 = vrot.lane.b32.xlu0 %v2926_v9, %s2498_s7 }
 0x152   : > { %v1098_v22 = vadd.f32 %v1097_v19, %v1093_v3  ;;  %v1203_v23 = vadd.f32 %v1202_v20, %v1201_v8  ;;  %v1935_v6 = vadd.f32 %v1934_v13, %v1930_v30  ;;  %v2040_v11 = vadd.f32 %v2039_v10, %v2038_v16  ;;  %781 = vrot.lane.b32.xlu1 %v2940_v29, %s2498_s7  ;;  %v3049_v3 = vld [vmem:[%s3729_s1 + $0x78] ss:$0 sm:$0xff]  ;;  %v3055_v16 = vld [vmem:[%s3729_s1 + $0xd] ss:$0 sm:$0xff] }
 0x153   : > { %v533_v14 = vpop.permute.xlu0 %532  ;;  %v2994_v25 = vpop.permute.xlu1 %565 }
 0x154   : > { %v535_v26 = vmul.f32 %v2232_v17, %v533_v14  ;;  %v886_v27 = vmul.f32 %v2268_v21, %v533_v14  ;;  %v1099_v32 = vmul.f32 %v2232_v17, %v2994_v25  ;;  %v1204_v33 = vmul.f32 %v2268_v21, %v2994_v25  ;;  %v3069_v21 = vld [vmem:[%s3729_s1 + $0x55] ss:$0 sm:$0xff] }
 0x155   : > { %1586 = vrot.lane.b32.xlu0 %v2926_v9, %s2498_s7  ;;  %v787_v9 = vld [vmem:[#allocation4 + $0x31] sm:$0xff]  ;;  %v568_v10 = vmul.f32 %v3027_v0, %v2994_v25 }
 0x156   : > { %v536_v38 = vadd.f32 %v535_v26, %v523_v59  ;;  %v887_v39 = vadd.f32 %v886_v27, %v880_v60  ;;  %1618 = vrot.lane.b32.xlu1 %v2940_v29, %s2498_s7  ;;  %v1100_v40 = vadd.f32 %v1099_v32, %v1098_v22  ;;  %v1205_v41 = vadd.f32 %v1204_v33, %v1203_v23  ;;  %v3074_v22 = vld [vmem:[%s3729_s1 + $0x79] ss:$0 sm:$0xff]  ;;  %v2342_v33 = vld [vmem:[%s3729_s1 + $0x77] ss:$0 sm:$0xff] }
 0x157   : > { %v1375_v36 = vpop.permute.xlu0 %1374  ;;  %v1407_v44 = vpop.permute.xlu1 %1406 }
 0x158   : > { %v1377_v37 = vmul.f32 %v2304_v34, %v1375_v36  ;;  %v1723_v28 = vmul.f32 %v2340_v35, %v1375_v36  ;;  %v1936_v31 = vmul.f32 %v2304_v34, %v1407_v44  ;;  %v2041_v45 = vmul.f32 %v2340_v35, %v1407_v44 }
 0x159   : > { %793 = vrot.lane.b32.xlu0 %v787_v9, %s2497_s6  ;;  %v1409_v14 = vmul.f32 %v3044_v15, %v1407_v44  ;;  %v1744_v26 = vmul.f32 %v3049_v3, %v1407_v44 }
 0x15a   : > { %v1378_v29 = vadd.f32 %v1377_v37, %v1366_v2  ;;  %v1724_v47 = vadd.f32 %v1723_v28, %v1717_v43  ;;  %1630 = vrot.lane.b32.xlu1 %v787_v9, %s2497_s6  ;;  %v1937_v48 = vadd.f32 %v1936_v31, %v1935_v6  ;;  %v2042_v5 = vadd.f32 %v2041_v45, %v2040_v11  ;;  %v3032_v2 = vld [vmem:[%s3729_s1 + $0x30] ss:$0 sm:$0xff]  ;;  %v1169_v11 = vld [vmem:[#allocation3 + $0x31] sm:$0xff] }
 0x15b   : > { %v543_v49 = vpop.permute.xlu0 %542  ;;  %v576_v50 = vpop.permute.xlu1 %575  ;;  %v907_v17 = vmul.f32 %v3032_v2, %v2994_v25  ;;  %v2306_v25 = vld [vmem:[%s3729_s1 + $0x53] ss:$0 sm:$0xff] }
 0x15c   : > { %v545_v51 = vmul.f32 %v2233_v4, %v543_v49  ;;  %v893_v52 = vmul.f32 %v2269_v46, %v543_v49  ;;  %v1101_v53 = vmul.f32 %v2233_v4, %v576_v50  ;;  %v1206_v54 = vmul.f32 %v2269_v46, %v576_v50 }
 0x15d   : > { %803 = vrot.lane.b32.xlu0 %v787_v9, %s2495_s5  ;;  %v578_v34 = vmul.f32 %v3055_v16, %v576_v50  ;;  %v914_v35 = vmul.f32 %v3060_v63, %v576_v50 }
 0x15e   : > { %v546_v58 = vadd.f32 %v545_v51, %v536_v38  ;;  %v894_v59 = vadd.f32 %v893_v52, %v887_v39  ;;  %1640 = vrot.lane.b32.xlu1 %v787_v9, %s2495_s5  ;;  %v1102_v60 = vadd.f32 %v1101_v53, %v1100_v40  ;;  %v1207_v61 = vadd.f32 %v1206_v54, %v1205_v41  ;;  %v3090_v40 = vld [vmem:[%s3729_s1 + $0xe] ss:$0 sm:$0xff]  ;;  %v3095_v41 = vld [vmem:[%s3729_s1 + $0x32] ss:$0 sm:$0xff] }
 0x15f   : > { %v1385_v62 = vpop.permute.xlu0 %1384  ;;  %v1417_v12 = vpop.permute.xlu1 %1416 }
 0x160   : > { %v1387_v1 = vmul.f32 %v2305_v55, %v1385_v62  ;;  %v1730_v42 = vmul.f32 %v2341_v56, %v1385_v62  ;;  %v1938_v43 = vmul.f32 %v2305_v55, %v1417_v12  ;;  %v2043_v24 = vmul.f32 %v2341_v56, %v1417_v12  ;;  %v3117_v56 = vld [vmem:[%s3729_s1 + $0xf] ss:$0 sm:$0xff] }
 0x161   : > { %813 = vrot.lane.b32.xlu0 %v787_v9, %s2498_s7  ;;  %v1419_v36 = vmul.f32 %v3069_v21, %v1417_v12  ;;  %v1751_v44 = vmul.f32 %v3074_v22, %v1417_v12 }
 0x162   : > { %v1388_v8 = vadd.f32 %v1387_v1, %v1378_v29  ;;  %v1731_v30 = vadd.f32 %v1730_v42, %v1724_v47  ;;  %1650 = vrot.lane.b32.xlu1 %v787_v9, %s2498_s7  ;;  %v1939_v18 = vadd.f32 %v1938_v43, %v1937_v48  ;;  %v2044_v19 = vadd.f32 %v2043_v24, %v2042_v5  ;;  %v3103_v47 = vld [vmem:[%s3729_s1 + $0x56] ss:$0 sm:$0xff]  ;;  %v3108_v48 = vld [vmem:[%s3729_s1 + $0x7a] ss:$0 sm:$0xff] }
 0x163   : > { %v553_v20 = vpop.permute.xlu0 %552  ;;  %v586_v13 = vpop.permute.xlu1 %585 }
 0x164   : > { %v555_v23 = vmul.f32 %v2234_v7, %v553_v20  ;;  %v900_v6 = vmul.f32 %v2270_v57, %v553_v20  ;;  %v1103_v27 = vmul.f32 %v2234_v7, %v586_v13  ;;  %v1208_v32 = vmul.f32 %v2270_v57, %v586_v13 }
 0x165   : > { %1171 = vrot.lane.b32.xlu0 %v1169_v11, %s2497_s6  ;;  %v588_v5 = vmul.f32 %v3090_v40, %v586_v13  ;;  %v921_v49 = vmul.f32 %v3095_v41, %v586_v13 }
 0x166   : > { %v556_v38 = vadd.f32 %v555_v23, %v546_v58  ;;  %v901_v39 = vadd.f32 %v900_v6, %v894_v59  ;;  %2008 = vrot.lane.b32.xlu1 %v1169_v11, %s2497_s6  ;;  %v1104_v37 = vadd.f32 %v1103_v27, %v1102_v60  ;;  %v1209_v28 = vadd.f32 %v1208_v32, %v1207_v61  ;;  %v3122_v58 = vld [vmem:[%s3729_s1 + $0x33] ss:$0 sm:$0xff]  ;;  %s2215_s6 = sshll.u32 %s144_s26, 5 }
 0x167   : > { %v1395_v9 = vpop.permute.xlu0 %1394  ;;  %v1427_v31 = vpop.permute.xlu1 %1426  ;;  %s146_s27 = scalar_lea.vmem [#allocation5], %s2215_s6 }
 0x168   : > { %v569_v45 = vadd.f32 %v568_v10, %v556_v38  ;;  %v908_v4 = vadd.f32 %v907_v17, %v901_v39  ;;  %v1397_v46 = vmul.f32 %v2306_v25, %v1395_v9  ;;  %v1737_v29 = vmul.f32 %v2342_v33, %v1395_v9 }
 0x169   : > { %v1940_v50 = vmul.f32 %v2306_v25, %v1427_v31  ;;  %v2045_v51 = vmul.f32 %v2342_v33, %v1427_v31  ;;  %1176 = vrot.lane.b32.xlu0 %v1169_v11, %s2495_s5  ;;  %v1429_v59 = vmul.f32 %v3103_v47, %v1427_v31  ;;  %v1758_v60 = vmul.f32 %v3108_v48, %v1427_v31  ;;  %v2239_v25 = vld [vmem:[%s3729_s1 + $0x10] ss:$0 sm:$0xff] }
 0x16a   : > { %v579_v52 = vadd.f32 %v578_v34, %v569_v45  ;;  %v915_v53 = vadd.f32 %v914_v35, %v908_v4  ;;  %v1398_v54 = vadd.f32 %v1397_v46, %v1388_v8  ;;  %v1738_v55 = vadd.f32 %v1737_v29, %v1731_v30  ;;  %2013 = vrot.lane.b32.xlu1 %v1169_v11, %s2495_s5  ;;  %s2372_s5 = sshll.u32 (%p2561_p5), %s2117_s29, 3 }
 0x16b   : > { %v1941_v61 = vadd.f32 %v1940_v50, %v1939_v18  ;;  %v2046_v62 = vadd.f32 %v2045_v51, %v2044_v19  ;;  %v598_v12 = vpop.permute.xlu0 %597  ;;  %v1439_v1 = vpop.permute.xlu1 %1438  ;;  %s2119_s4 = scalar_lea.vmem (%p2561_p5), %s3730_s2, %s2372_s5 }
 0x16c   : > { %v1410_v42 = vadd.f32 %v1409_v14, %v1398_v54  ;;  %v1745_v43 = vadd.f32 %v1744_v26, %v1738_v55  ;;  %v1105_v24 = vmul.f32 %v3027_v0, %v598_v12  ;;  %v1210_v7 = vmul.f32 %v3032_v2, %v598_v12  ;;  %v2310_v0 = vld [vmem:[%s3729_s1 + $0x57] ss:$0 sm:$0xff]  ;;  %v2346_v14 = vld [vmem:[%s3729_s1 + $0x7b] ss:$0 sm:$0xff] }
 0x16d   : > { %v1942_v57 = vmul.f32 %v3044_v15, %v1439_v1  ;;  %v2047_v8 = vmul.f32 %v3049_v3, %v1439_v1  ;;  %1181 = vrot.lane.b32.xlu0 %v1169_v11, %s2498_s7  ;;  %v600_v30 = vmul.f32 %v3117_v56, %v598_v12  ;;  %v928_v20 = vmul.f32 %v3122_v58, %v598_v12 }
 0x16e   : > { %v1420_v18 = vadd.f32 %v1419_v36, %v1410_v42  ;;  %v1752_v19 = vadd.f32 %v1751_v44, %v1745_v43  ;;  %v1106_v13 = vadd.f32 %v1105_v24, %v1104_v37  ;;  %v1211_v10 = vadd.f32 %v1210_v7, %v1209_v28  ;;  %2018 = vrot.lane.b32.xlu1 %v1169_v11, %s2498_s7 }
 0x16f   : > { %v1943_v2 = vadd.f32 %v1942_v57, %v1941_v61  ;;  %v2048_v15 = vadd.f32 %v2047_v8, %v2046_v62  ;;  %v3137_v17 = vpop.permute.xlu0 %607  ;;  %v3139_v3 = vpop.permute.xlu1 %1448  ;;  %v589_v23 = vadd.f32 %v588_v5, %v579_v52  ;;  %v922_v6 = vadd.f32 %v921_v49, %v915_v53  ;;  %v2240_v5 = vld [vmem:[%s3729_s1 + $0x11] ss:$0 sm:$0xff] }
 0x170   : > { %v1107_v26 = vmul.f32 %v3055_v16, %v3137_v17  ;;  %v1212_v11 = vmul.f32 %v3060_v63, %v3137_v17  ;;  %v1944_v27 = vmul.f32 %v3069_v21, %v3139_v3  ;;  %v2049_v32 = vmul.f32 %v3074_v22, %v3139_v3  ;;  %v2311_v63 = vld [vmem:[%s3729_s1 + $0x58] ss:$0 sm:$0xff] }
 0x171   : > { %v601_v33 = vadd.f32 %v600_v30, %v589_v23  ;;  %v3155_v34 = vadd.f32 %v928_v20, %v922_v6  ;;  %v1430_v35 = vadd.f32 %v1429_v59, %v1420_v18  ;;  %v1441_v38 = vmul.f32 %v2310_v0, %v1439_v1 }
 0x172   : > { %v1108_v39 = vadd.f32 %v1107_v26, %v1106_v13  ;;  %v1213_v16 = vadd.f32 %v1212_v11, %v1211_v10  ;;  %v1759_v36 = vadd.f32 %v1758_v60, %v1752_v19  ;;  %v1765_v44 = vmul.f32 %v2346_v14, %v1439_v1 }
 0x173   : > { %v3160_v21 = vpop.permute.xlu0 %617  ;;  %v3162_v22 = vpop.permute.xlu1 %1458  ;;  %v1442_v37 = vadd.f32 %v1441_v38, %v1430_v35  ;;  %v1945_v28 = vadd.f32 %v1944_v27, %v1943_v2  ;;  %v2050_v9 = vadd.f32 %v2049_v32, %v2048_v15  ;;  %v610_v31 = vmul.f32 %v2239_v25, %v3137_v17  ;;  %v2241_v15 = vld [vmem:[%s3729_s1 + $0x12] ss:$0 sm:$0xff]  ;;  %v2313_v32 = vld [vmem:[%s3729_s1 + $0x5a] ss:$0 sm:$0xff] }
 0x174   : > { %v1109_v45 = vmul.f32 %v3090_v40, %v3160_v21  ;;  %v1214_v4 = vmul.f32 %v3095_v41, %v3160_v21  ;;  %v1946_v46 = vmul.f32 %v3103_v47, %v3162_v22  ;;  %v2051_v29 = vmul.f32 %v3108_v48, %v3162_v22  ;;  %v2312_v41 = vld [vmem:[%s3729_s1 + $0x59] ss:$0 sm:$0xff] }
 0x175   : > { %v3176_v49 = vadd.f32 %v1765_v44, %v1759_v36  ;;  %v611_v50 = vadd.f32 %v610_v31, %v601_v33  ;;  %v1451_v51 = vmul.f32 %v2311_v63, %v3139_v3  ;;  %v620_v59 = vmul.f32 %v2240_v5, %v3160_v21  ;;  %v2242_v36 = vld [vmem:[%s3729_s1 + $0x13] ss:$0 sm:$0xff] }
 0x176   : > { %v1110_v52 = vadd.f32 %v1109_v45, %v1108_v39  ;;  %v1215_v40 = vadd.f32 %v1214_v4, %v1213_v16  ;;  %v1947_v53 = vadd.f32 %v1946_v46, %v1945_v28  ;;  %v2052_v54 = vadd.f32 %v2051_v29, %v2050_v9  ;;  %v2314_v45 = vld [vmem:[%s3729_s1 + $0x5b] ss:$0 sm:$0xff] }
 0x177   : > { %v1114_v47 = vpop.permute.xlu0 %1113  ;;  %v1951_v55 = vpop.permute.xlu1 %1950  ;;  %v1452_v48 = vadd.f32 %v1451_v51, %v1442_v37  ;;  %v1461_v1 = vmul.f32 %v2312_v41, %v3162_v22  ;;  %v621_v30 = vadd.f32 %v620_v59, %v611_v50 }
 0x178   : > { %v1116_v60 = vmul.f32 %v3117_v56, %v1114_v47  ;;  %v1216_v61 = vmul.f32 %v3122_v58, %v1114_v47  ;;  %v1953_v62 = vmul.f32 %v2310_v0, %v1951_v55  ;;  %v2053_v12 = vmul.f32 %v2346_v14, %v1951_v55 }
 0x179   : > { %v1462_v20 = vadd.f32 %v1461_v1, %v1452_v48  ;;  %v2245_v48 = vld [vmem:[%s3729_s1 + $0x16] ss:$0 sm:$0xff]  ;;  %v2316_v1 = vld [vmem:[%s3729_s1 + $0x5d] ss:$0 sm:$0xff] }
 0x17a   : > { %v1117_v42 = vadd.f32 %v1116_v60, %v1110_v52  ;;  %v3186_v43 = vadd.f32 %v1216_v61, %v1215_v40  ;;  %v1954_v24 = vadd.f32 %v1953_v62, %v1947_v53  ;;  %v3188_v7 = vadd.f32 %v2053_v12, %v2052_v54  ;;  %v2243_v52 = vld [vmem:[%s3729_s1 + $0x14] ss:$0 sm:$0xff]  ;;  %v2244_v53 = vld [vmem:[%s3729_s1 + $0x15] ss:$0 sm:$0xff]  ;;  %v2315_v60 = vld [vmem:[%s3729_s1 + $0x5c] ss:$0 sm:$0xff] }
 0x17b   : > { %v3190_v57 = vpop.permute.xlu0 %1118  ;;  %v3192_v8 = vpop.permute.xlu1 %1955  ;;  %v3260_v12 = vld [vmem:[%s3729_s1 + $0x7c] ss:$0 sm:$0xff] }
 0x17c   : > { %v1121_v56 = vmul.f32 %v2239_v25, %v3190_v57  ;;  %v1958_v58 = vmul.f32 %v2311_v63, %v3192_v8 }
 0x17e   : > { %v1122_v18 = vadd.f32 %v1121_v56, %v1117_v42  ;;  %v1959_v19 = vadd.f32 %v1958_v58, %v1954_v24 }
 0x17f   : > { %v3196_v13 = vpop.permute.xlu0 %1123  ;;  %v3198_v10 = vpop.permute.xlu1 %1960 }
 0x180   : > { %v1126_v0 = vmul.f32 %v2240_v5, %v3196_v13  ;;  %v1963_v2 = vmul.f32 %v2312_v41, %v3198_v10 }
 0x182   : > { %v1127_v23 = vadd.f32 %v1126_v0, %v1122_v18  ;;  %v1964_v6 = vadd.f32 %v1963_v2, %v1959_v19  ;;  %v2317_v19 = vld [vmem:[%s3729_s1 + $0x5e] ss:$0 sm:$0xff]  ;;  %v1772_v2 = vmul.f32 %v3260_v12, %v3139_v3 }
 0x183   : > { %v3205_v14 = vpop.permute.xlu0 %630  ;;  %v3207_v26 = vpop.permute.xlu1 %663 }
 0x184   : > { %v633_v11 = vmul.f32 %v2241_v15, %v3205_v14  ;;  %v1128_v27 = vmul.f32 %v2241_v15, %v3207_v26  ;;  %v666_v61 = vmul.f32 %v2244_v53, %v3207_v26  ;;  %v3283_v15 = vld [vmem:[%s3729_s1 + $0x35] ss:$0 sm:$0xff] }
 0x186   : > { %v634_v25 = vadd.f32 %v633_v11, %v621_v30  ;;  %v1129_v33 = vadd.f32 %v1128_v27, %v1127_v23  ;;  %v2246_v11 = vld [vmem:[%s3729_s1 + $0x17] ss:$0 sm:$0xff] }
 0x187   : > { %v3214_v35 = vpop.permute.xlu0 %1470  ;;  %v3216_v38 = vpop.permute.xlu1 %1502 }
 0x188   : > { %v1473_v39 = vmul.f32 %v2313_v32, %v3214_v35  ;;  %v1965_v16 = vmul.f32 %v2313_v32, %v3216_v38  ;;  %v1505_v23 = vmul.f32 %v2316_v1, %v3216_v38  ;;  %v3292_v32 = vld [vmem:[%s3729_s1 + $0x18] ss:$0 sm:$0xff] }
 0x18a   : > { %v1474_v44 = vadd.f32 %v1473_v39, %v1462_v20  ;;  %v1966_v63 = vadd.f32 %v1965_v16, %v1964_v6  ;;  %v2275_v20 = vld [vmem:[%s3729_s1 + $0x34] ss:$0 sm:$0xff] }
 0x18b   : > { %v3223_v37 = vpop.permute.xlu0 %640  ;;  %v3225_v28 = vpop.permute.xlu1 %673  ;;  %v935_v3 = vmul.f32 %v2275_v20, %v3137_v17 }
 0x18c   : > { %v643_v9 = vmul.f32 %v2242_v36, %v3223_v37  ;;  %v1130_v31 = vmul.f32 %v2242_v36, %v3225_v28  ;;  %v676_v56 = vmul.f32 %v2245_v48, %v3225_v28 }
 0x18e   : > { %v644_v4 = vadd.f32 %v643_v9, %v634_v25  ;;  %v1131_v46 = vadd.f32 %v1130_v31, %v1129_v33  ;;  %v3298_v25 = vld [vmem:[%s3729_s1 + $0x7d] ss:$0 sm:$0xff]  ;;  %v2318_v33 = vld [vmem:[%s3729_s1 + $0x5f] ss:$0 sm:$0xff]  ;;  %v942_v31 = vmul.f32 %v3283_v15, %v3160_v21  ;;  %v3329_v21 = vld [vmem:[%s3729_s1 + $0x36] ss:$0 sm:$0xff] }
 0x18f   : > { %v3232_v29 = vpop.permute.xlu0 %1480  ;;  %v3234_v5 = vpop.permute.xlu1 %1512 }
 0x190   : > { %v1483_v50 = vmul.f32 %v2314_v45, %v3232_v29  ;;  %v1967_v51 = vmul.f32 %v2314_v45, %v3234_v5  ;;  %v3315_v45 = vld [vmem:[%s3729_s1 + $0x7e] ss:$0 sm:$0xff] }
 0x192   : > { %v1484_v40 = vadd.f32 %v1483_v50, %v1474_v44  ;;  %v1968_v54 = vadd.f32 %v1967_v51, %v1966_v63  ;;  %v1773_v44 = vadd.f32 %v1772_v2, %v3176_v49  ;;  %v1515_v63 = vmul.f32 %v2317_v19, %v3234_v5  ;;  %v2319_v50 = vld [vmem:[%s3729_s1 + $0x60] ss:$0 sm:$0xff] }
 0x193   : > { %v3244_v41 = vpop.permute.xlu0 %650  ;;  %v3246_v47 = vpop.permute.xlu1 %683  ;;  %v1779_v51 = vmul.f32 %v3298_v25, %v3162_v22 }
 0x194   : > { %v653_v55 = vmul.f32 %v2243_v52, %v3244_v41  ;;  %v1132_v59 = vmul.f32 %v2243_v52, %v3246_v47 }
 0x196   : > { %v654_v62 = vadd.f32 %v653_v55, %v644_v4  ;;  %v1133_v42 = vadd.f32 %v1132_v59, %v1131_v46  ;;  %v686_v4 = vmul.f32 %v2246_v11, %v3246_v47  ;;  %v3336_v55 = vld [vmem:[%s3729_s1 + $0x7f] ss:$0 sm:$0xff] }
 0x197   : > { %v3265_v24 = vpop.permute.xlu0 %1490  ;;  %v3267_v30 = vpop.permute.xlu1 %1522 }
 0x198   : > { %v667_v58 = vadd.f32 %v666_v61, %v654_v62  ;;  %v1493_v18 = vmul.f32 %v2315_v60, %v3265_v24  ;;  %v1969_v0 = vmul.f32 %v2315_v60, %v3267_v30  ;;  %v1786_v61 = vmul.f32 %v3315_v45, %v3214_v35  ;;  %v3345_v62 = vld [vmem:[%s3729_s1 + $0x37] ss:$0 sm:$0xff] }
 0x199   : > { %v949_v35 = vmul.f32 %v3329_v21, %v3205_v14  ;;  %v3370_v14 = vld [vmem:[%s3729_s1 + $0x38] ss:$0 sm:$0xff] }
 0x19a   : > { %v677_v6 = vadd.f32 %v676_v56, %v667_v58  ;;  %v1494_v27 = vadd.f32 %v1493_v18, %v1484_v40  ;;  %v1970_v39 = vadd.f32 %v1969_v0, %v1968_v54  ;;  %v1525_v40 = vmul.f32 %v2318_v33, %v3267_v30  ;;  %v2248_v58 = vld [vmem:[%s3729_s1 + $0x19] ss:$0 sm:$0xff]  ;;  %v3359_v0 = vld [vmem:[%s3729_s1 + $0x80] ss:$0 sm:$0xff] }
 0x19b   : > { %v3303_v16 = vpop.permute.xlu0 %695  ;;  %v3305_v36 = vpop.permute.xlu1 %1534  ;;  %v936_v54 = vadd.f32 %v935_v3, %v3155_v34 }
 0x19c   : > { %v1506_v9 = vadd.f32 %v1505_v23, %v1494_v27  ;;  %v1134_v17 = vmul.f32 %v2244_v53, %v3303_v16  ;;  %v1971_v46 = vmul.f32 %v2316_v1, %v3305_v36  ;;  %v698_v49 = vmul.f32 %v3292_v32, %v3303_v16  ;;  %v2320_v23 = vld [vmem:[%s3729_s1 + $0x61] ss:$0 sm:$0xff] }
 0x19d   : > { %v687_v22 = vadd.f32 %v686_v4, %v677_v6  ;;  %v1537_v56 = vmul.f32 %v2319_v50, %v3305_v36  ;;  %v943_v18 = vadd.f32 %v942_v31, %v936_v54  ;;  %v1780_v6 = vadd.f32 %v1779_v51, %v1773_v44  ;;  %v2352_v54 = vld [vmem:[%s3729_s1 + $0x81] ss:$0 sm:$0xff] }
 0x19e   : > { %v1516_v52 = vadd.f32 %v1515_v63, %v1506_v9  ;;  %v1135_v53 = vadd.f32 %v1134_v17, %v1133_v42  ;;  %v1972_v59 = vadd.f32 %v1971_v46, %v1970_v39  ;;  %v1793_v27 = vmul.f32 %v3336_v55, %v3232_v29 }
 0x19f   : > { %v3338_v60 = vpop.permute.xlu0 %705  ;;  %v699_v2 = vadd.f32 %v698_v49, %v687_v22  ;;  %v1218_v63 = vmul.f32 %v2275_v20, %v3190_v57  ;;  %v1787_v31 = vadd.f32 %v1786_v61, %v1780_v6  ;;  %v1800_v29 = vmul.f32 %v3359_v0, %v3265_v24  ;;  %v2249_v57 = vld [vmem:[%s3729_s1 + $0x1a] ss:$0 sm:$0xff]  ;;  %v2321_v24 = vld [vmem:[%s3729_s1 + $0x62] ss:$0 sm:$0xff] }
 0x1a0   : > { %v1136_v1 = vmul.f32 %v2245_v48, %v3338_v60  ;;  %v3348_v34 = vpop.permute.xlu1 %1544  ;;  %v1526_v42 = vadd.f32 %v1525_v40, %v1516_v52  ;;  %v708_v44 = vmul.f32 %v2248_v58, %v3338_v60  ;;  %v963_v20 = vmul.f32 %v3370_v14, %v3244_v41 }
 0x1a1   : > { %v1973_v48 = vmul.f32 %v2317_v19, %v3348_v34  ;;  %v956_v19 = vmul.f32 %v3345_v62, %v3223_v37  ;;  %v1547_v49 = vmul.f32 %v2320_v23, %v3348_v34  ;;  %v950_v37 = vadd.f32 %v949_v35, %v943_v18 }
 0x1a2   : > { %v1137_v3 = vadd.f32 %v1136_v1, %v1135_v53  ;;  %v1538_v39 = vadd.f32 %v1537_v56, %v1526_v42  ;;  %v709_v52 = vadd.f32 %v708_v44, %v699_v2  ;;  %v2280_v1 = vld [vmem:[%s3729_s1 + $0x39] ss:$0 sm:$0xff]  ;;  %v1220_v2 = vmul.f32 %v3283_v15, %v3196_v13 }
 0x1a3   : > { %v3375_v9 = vpop.permute.xlu0 %715  ;;  %v1974_v17 = vadd.f32 %v1973_v48, %v1972_v59  ;;  %v957_v59 = vadd.f32 %v956_v19, %v950_v37  ;;  %v1219_v48 = vadd.f32 %v1218_v63, %v3186_v43  ;;  %v1222_v19 = vmul.f32 %v3329_v21, %v3207_v26  ;;  %v2353_v43 = vld [vmem:[%s3729_s1 + $0x82] ss:$0 sm:$0xff]  ;;  %v2281_v63 = vld [vmem:[%s3729_s1 + $0x3a] ss:$0 sm:$0xff] }
 0x1a4   : > { %v1138_v4 = vmul.f32 %v2246_v11, %v3375_v9  ;;  %v3381_v46 = vpop.permute.xlu1 %1554  ;;  %v1794_v11 = vadd.f32 %v1793_v27, %v1787_v31  ;;  %v1548_v53 = vadd.f32 %v1547_v49, %v1538_v39  ;;  %v718_v41 = vmul.f32 %v2249_v57, %v3375_v9 }
 0x1a5   : > { %v1975_v51 = vmul.f32 %v2318_v33, %v3381_v46  ;;  %v2055_v33 = vmul.f32 %v3260_v12, %v3192_v8  ;;  %v1557_v35 = vmul.f32 %v2321_v24, %v3381_v46  ;;  %v964_v6 = vadd.f32 %v963_v20, %v957_v59 }
 0x1a6   : > { %v1139_v40 = vadd.f32 %v1138_v4, %v1137_v3  ;;  %v1801_v42 = vadd.f32 %v1800_v29, %v1794_v11  ;;  %v2057_v12 = vmul.f32 %v3298_v25, %v3198_v10  ;;  %v1807_v27 = vmul.f32 %v2352_v54, %v3216_v38  ;;  %v2282_v11 = vld [vmem:[%s3729_s1 + $0x3b] ss:$0 sm:$0xff] }
 0x1a7   : > { %v3396_v22 = vpop.permute.xlu0 %1142  ;;  %v1976_v61 = vadd.f32 %v1975_v51, %v1974_v17  ;;  %v719_v39 = vadd.f32 %v718_v41, %v709_v52  ;;  %v2056_v10 = vadd.f32 %v2055_v33, %v3188_v7  ;;  %v2059_v25 = vmul.f32 %v3315_v45, %v3216_v38 }
 0x1a8   : > { %v1145_v56 = vmul.f32 %v3292_v32, %v3396_v22  ;;  %v3406_v18 = vpop.permute.xlu1 %1979  ;;  %v970_v32 = vmul.f32 %v2280_v1, %v3207_v26  ;;  %v1808_v17 = vadd.f32 %v1807_v27, %v1801_v42  ;;  %v1221_v44 = vadd.f32 %v1220_v2, %v1219_v48 }
 0x1a9   : > { %v1982_v8 = vmul.f32 %v2319_v50, %v3406_v18  ;;  %v3424_v50 = vadd.f32 %v1557_v35, %v1548_v53  ;;  %v1224_v31 = vmul.f32 %v3345_v62, %v3225_v28  ;;  %v2058_v7 = vadd.f32 %v2057_v12, %v2056_v10  ;;  %v2354_v62 = vld [vmem:[%s3729_s1 + $0x83] ss:$0 sm:$0xff]  ;;  %v2284_v12 = vld [vmem:[%s3729_s1 + $0x3d] ss:$0 sm:$0xff] }
 0x1aa   : > { %v1146_v3 = vadd.f32 %v1145_v56, %v1139_v40  ;;  %v971_v29 = vadd.f32 %v970_v32, %v964_v6  ;;  %v1814_v49 = vmul.f32 %v2353_v43, %v3234_v5  ;;  %v2061_v38 = vmul.f32 %v3336_v55, %v3234_v5 }
 0x1ab   : > { %v1983_v13 = vadd.f32 %v1982_v8, %v1976_v61  ;;  %v3422_v15 = vpop.permute.xlu0 %1147  ;;  %v1223_v37 = vadd.f32 %v1222_v19, %v1221_v44  ;;  %v977_v20 = vmul.f32 %v2281_v63, %v3225_v28  ;;  %v2063_v55 = vmul.f32 %v3359_v0, %v3267_v30  ;;  %v2250_v61 = vld [vmem:[%s3729_s1 + $0x1b] ss:$0 sm:$0xff]  ;;  %v2283_v0 = vld [vmem:[%s3729_s1 + $0x3c] ss:$0 sm:$0xff] }
 0x1ac   : > { %v1150_v26 = vmul.f32 %v2248_v58, %v3422_v15  ;;  %v3433_v21 = vpop.permute.xlu1 %1984  ;;  %v1226_v58 = vmul.f32 %v3370_v14, %v3246_v47  ;;  %v1815_v5 = vadd.f32 %v1814_v49, %v1808_v17  ;;  %v1821_v33 = vmul.f32 %v2354_v62, %v3267_v30  ;;  %v2285_v49 = vld [vmem:[%s3729_s1 + $0x3e] ss:$0 sm:$0xff] }
 0x1ad   : > { %v1987_v4 = vmul.f32 %v2320_v23, %v3433_v21  ;;  %v2060_v23 = vadd.f32 %v2059_v25, %v2058_v7  ;;  %v1225_v14 = vadd.f32 %v1224_v31, %v1223_v37  ;;  %v978_v53 = vadd.f32 %v977_v20, %v971_v29  ;;  %v2251_v20 = vld [vmem:[%s3729_s1 + $0x1c] ss:$0 sm:$0xff] }
 0x1ae   : > { %v1151_v45 = vadd.f32 %v1150_v26, %v1146_v3  ;;  %v1228_v42 = vmul.f32 %v2280_v1, %v3303_v16  ;;  %v984_v56 = vmul.f32 %v2282_v11, %v3246_v47  ;;  %v2065_v48 = vmul.f32 %v2352_v54, %v3305_v36 }
 0x1af   : > { %v1988_v51 = vadd.f32 %v1987_v4, %v1983_v13  ;;  %v3447_v52 = vpop.permute.xlu0 %1152  ;;  %v2062_v41 = vadd.f32 %v2061_v38, %v2060_v23  ;;  %v1227_v35 = vadd.f32 %v1226_v58, %v1225_v14  ;;  %v1230_v30 = vmul.f32 %v2281_v63, %v3338_v60  ;;  %v2322_v13 = vld [vmem:[%s3729_s1 + $0x63] ss:$0 sm:$0xff]  ;;  %v2357_v23 = vld [vmem:[%s3729_s1 + $0x86] ss:$0 sm:$0xff] }
 0x1b0   : > { %v1155_v28 = vmul.f32 %v2249_v57, %v3447_v52  ;;  %v3455_v40 = vpop.permute.xlu1 %1989  ;;  %v1822_v1 = vadd.f32 %v1821_v33, %v1815_v5  ;;  %v2067_v47 = vmul.f32 %v2353_v43, %v3348_v34  ;;  %v991_v54 = vmul.f32 %v2283_v0, %v3303_v16  ;;  %v2356_v16 = vld [vmem:[%s3729_s1 + $0x85] ss:$0 sm:$0xff] }
 0x1b1   : > { %v1992_v59 = vmul.f32 %v2321_v24, %v3455_v40  ;;  %v2355_v24 = vld [vmem:[%s3729_s1 + $0x84] ss:$0 sm:$0xff]  ;;  %v2064_v8 = vadd.f32 %v2063_v55, %v2062_v41  ;;  %v985_v32 = vadd.f32 %v984_v56, %v978_v53  ;;  %v1229_v10 = vadd.f32 %v1228_v42, %v1227_v35 }
 0x1b2   : > { %v1156_v57 = vadd.f32 %v1155_v28, %v1151_v45  ;;  %v1232_v25 = vmul.f32 %v2282_v11, %v3375_v9  ;;  %v1828_v63 = vmul.f32 %v2355_v24, %v3305_v36  ;;  %v998_v44 = vmul.f32 %v2284_v12, %v3338_v60  ;;  %v2286_v28 = vld [vmem:[%s3729_s1 + $0x3f] ss:$0 sm:$0xff] }
 0x1b3   : > { %v1993_v2 = vadd.f32 %v1992_v59, %v1988_v51  ;;  %v729_v6 = vpop.permute.xlu0 %728  ;;  %v2066_v26 = vadd.f32 %v2065_v48, %v2064_v8  ;;  %v2069_v29 = vmul.f32 %v2354_v62, %v3381_v46  ;;  %v1231_v4 = vadd.f32 %v1230_v30, %v1229_v10  ;;  %v3530_v30 = vld [vmem:[%s3729_s1 + $0x1e] ss:$0 sm:$0xff]  ;;  %v2252_v10 = vld [vmem:[%s3729_s1 + $0x1d] ss:$0 sm:$0xff] }
 0x1b4   : > { %v731_v27 = vmul.f32 %v2250_v61, %v729_v6  ;;  %v3475_v3 = vpop.permute.xlu1 %761  ;;  %v1829_v7 = vadd.f32 %v1828_v63, %v1822_v1  ;;  %v1234_v60 = vmul.f32 %v2283_v0, %v3396_v22  ;;  %v2071_v62 = vmul.f32 %v2355_v24, %v3406_v18  ;;  %v2323_v0 = vld [vmem:[%s3729_s1 + $0x64] ss:$0 sm:$0xff] }
 0x1b5   : > { %v1157_v19 = vmul.f32 %v2250_v61, %v3475_v3  ;;  %v2068_v45 = vadd.f32 %v2067_v47, %v2066_v26  ;;  %v1233_v58 = vadd.f32 %v1232_v25, %v1231_v4  ;;  %v1835_v51 = vmul.f32 %v2356_v16, %v3348_v34  ;;  %v3547_v25 = vld [vmem:[%s3729_s1 + $0x41] ss:$0 sm:$0xff]  ;;  %v3552_v26 = vld [vmem:[%s3729_s1 + $0x66] ss:$0 sm:$0xff] }
 0x1b6   : > { %v732_v17 = vadd.f32 %v731_v27, %v719_v39  ;;  %v992_v39 = vadd.f32 %v991_v54, %v985_v32  ;;  %v1236_v22 = vmul.f32 %v2284_v12, %v3422_v15  ;;  %v1005_v55 = vmul.f32 %v2285_v49, %v3375_v9  ;;  %v2287_v9 = vld [vmem:[%s3729_s1 + $0x40] ss:$0 sm:$0xff]  ;;  %v2359_v12 = vld [vmem:[%s3729_s1 + $0x88] ss:$0 sm:$0xff] }
 0x1b7   : > { %v1158_v43 = vadd.f32 %v1157_v19, %v1156_v57  ;;  %v1567_v31 = vpop.permute.xlu0 %1566  ;;  %v2070_v18 = vadd.f32 %v2069_v29, %v2068_v45  ;;  %v1836_v59 = vadd.f32 %v1835_v51, %v1829_v7  ;;  %v2073_v34 = vmul.f32 %v2356_v16, %v3433_v21  ;;  %v3562_v29 = vld [vmem:[%s3729_s1 + $0x8a] ss:$0 sm:$0xff] }
 0x1b8   : > { %v1569_v38 = vmul.f32 %v2322_v13, %v1567_v31  ;;  %v3493_v36 = vpop.permute.xlu1 %1598  ;;  %v999_v5 = vadd.f32 %v998_v44, %v992_v39  ;;  %v1235_v33 = vadd.f32 %v1234_v60, %v1233_v58  ;;  %v1842_v15 = vmul.f32 %v2357_v23, %v3381_v46  ;;  %v3567_v60 = vld [vmem:[%s3729_s1 + $0x1f] ss:$0 sm:$0xff] }
 0x1b9   : > { %v1994_v37 = vmul.f32 %v2322_v13, %v3493_v36  ;;  %v2072_v57 = vadd.f32 %v2071_v62, %v2070_v18  ;;  %v2075_v21 = vmul.f32 %v2357_v23, %v3455_v40  ;;  %v1012_v56 = vmul.f32 %v2286_v28, %v729_v6  ;;  %v3535_v40 = vld [vmem:[%s3729_s1 + $0x42] ss:$0 sm:$0xff]  ;;  %v2324_v23 = vld [vmem:[%s3729_s1 + $0x65] ss:$0 sm:$0xff] }
 0x1ba   : > { %v1570_v11 = vadd.f32 %v1569_v38, %v3424_v50  ;;  %v1238_v50 = vmul.f32 %v2285_v49, %v3447_v52  ;;  %v2358_v52 = vld [vmem:[%s3729_s1 + $0x87] ss:$0 sm:$0xff]  ;;  %v1237_v46 = vadd.f32 %v1236_v22, %v1235_v33  ;;  %v1006_v48 = vadd.f32 %v1005_v55, %v999_v5  ;;  %v3584_v55 = vld [vmem:[%s3729_s1 + $0x43] ss:$0 sm:$0xff] }
 0x1bb   : > { %v1995_v14 = vadd.f32 %v1994_v37, %v1993_v2  ;;  %v739_v53 = vpop.permute.xlu0 %738  ;;  %v2074_v8 = vadd.f32 %v2073_v34, %v2072_v57  ;;  %v1240_v6 = vmul.f32 %v2286_v28, %v3475_v3  ;;  %v1843_v32 = vadd.f32 %v1842_v15, %v1836_v59  ;;  %v2326_v28 = vld [vmem:[%s3729_s1 + $0x67] ss:$0 sm:$0xff] }
 0x1bc   : > { %v741_v61 = vmul.f32 %v2251_v20, %v739_v53  ;;  %v3512_v41 = vpop.permute.xlu1 %771  ;;  %v1019_v1 = vmul.f32 %v2287_v9, %v739_v53  ;;  %v1239_v54 = vadd.f32 %v1238_v50, %v1237_v46  ;;  %v1849_v19 = vmul.f32 %v2358_v52, %v1567_v31 }
 0x1bd   : > { %v1159_v42 = vmul.f32 %v2251_v20, %v3512_v41  ;;  %v2076_v63 = vadd.f32 %v2075_v21, %v2074_v8  ;;  %v2077_v44 = vmul.f32 %v2358_v52, %v3493_v36  ;;  %v1033_v31 = vmul.f32 %v3535_v40, %v3475_v3 }
 0x1be   : > { %v742_v35 = vadd.f32 %v741_v61, %v732_v17  ;;  %v1013_v17 = vadd.f32 %v1012_v56, %v1006_v48  ;;  %v1241_v38 = vadd.f32 %v1240_v6, %v1239_v54  ;;  %v1601_v58 = vmul.f32 %v3552_v26, %v3493_v36  ;;  %v2327_v6 = vld [vmem:[%s3729_s1 + $0x68] ss:$0 sm:$0xff] }
 0x1bf   : > { %v1160_v24 = vadd.f32 %v1159_v42, %v1158_v43  ;;  %v1577_v2 = vpop.permute.xlu0 %1576  ;;  %v764_v43 = vmul.f32 %v3530_v30, %v3475_v3  ;;  %v1850_v3 = vadd.f32 %v1849_v19, %v1843_v32  ;;  %v1242_v62 = vmul.f32 %v2287_v9, %v3512_v41  ;;  %v3599_v9 = vld [vmem:[%s3729_s1 + $0x20] ss:$0 sm:$0xff] }
 0x1c0   : > { %v1579_v27 = vmul.f32 %v2323_v0, %v1577_v2  ;;  %v1609_v47 = vpop.permute.xlu1 %1608  ;;  %v1856_v4 = vmul.f32 %v2359_v12, %v1577_v2  ;;  %v1020_v39 = vadd.f32 %v1019_v1, %v1013_v17  ;;  %v1870_v5 = vmul.f32 %v3562_v29, %v3493_v36  ;;  %v3594_v36 = vld [vmem:[%s3729_s1 + $0x8b] ss:$0 sm:$0xff] }
 0x1c1   : > { %v1996_v13 = vmul.f32 %v2323_v0, %v1609_v47  ;;  %v2078_v22 = vadd.f32 %v2077_v44, %v2076_v63  ;;  %v774_v18 = vmul.f32 %v3567_v60, %v3512_v41  ;;  %v2079_v34 = vmul.f32 %v2359_v12, %v1609_v47 }
 0x1c2   : > { %v1580_v16 = vadd.f32 %v1579_v27, %v1570_v11  ;;  %v2360_v11 = vld [vmem:[%s3729_s1 + $0x89] ss:$0 sm:$0xff]  ;;  %v1857_v59 = vadd.f32 %v1856_v4, %v1850_v3  ;;  %v1040_v21 = vmul.f32 %v3584_v55, %v3512_v41  ;;  %v1243_v56 = vadd.f32 %v1242_v62, %v1241_v38  ;;  %v3615_v41 = vld [vmem:[%s3729_s1 + $0x21] ss:$0 sm:$0xff]  ;;  %v3635_v4 = vld [vmem:[%s3729_s1 + $0x46] ss:$0 sm:$0xff] }
 0x1c3   : > { %v1997_v7 = vadd.f32 %v1996_v13, %v1995_v14  ;;  %v749_v49 = vpop.permute.xlu0 %748  ;;  %v1611_v52 = vmul.f32 %v2326_v28, %v1609_v47  ;;  %v1877_v48 = vmul.f32 %v3594_v36, %v1609_v47  ;;  %v2080_v1 = vadd.f32 %v2079_v34, %v2078_v22  ;;  %v3621_v47 = vld [vmem:[%s3729_s1 + $0x45] ss:$0 sm:$0xff] }
 0x1c4   : > { %v751_v45 = vmul.f32 %v2252_v10, %v749_v49  ;;  %v1026_v37 = vmul.f32 %v3547_v25, %v749_v49  ;;  %v782_v20 = vpop.permute.xlu1 %781 }
 0x1c5   : > { %v1161_v51 = vmul.f32 %v2252_v10, %v782_v20  ;;  %v784_v27 = vmul.f32 %v3599_v9, %v782_v20  ;;  %v1244_v44 = vmul.f32 %v3547_v25, %v782_v20 }
 0x1c6   : > { %v752_v14 = vadd.f32 %v751_v45, %v742_v35  ;;  %v1027_v53 = vadd.f32 %v1026_v37, %v1020_v39  ;;  %v3606_v35 = vld [vmem:[%s3729_s1 + $0x44] ss:$0 sm:$0xff] }
 0x1c7   : > { %v1162_v61 = vadd.f32 %v1161_v51, %v1160_v24  ;;  %v1587_v33 = vpop.permute.xlu0 %1586  ;;  %v1047_v19 = vmul.f32 %v3606_v35, %v782_v20  ;;  %v1245_v22 = vadd.f32 %v1244_v44, %v1243_v56  ;;  %v2366_v56 = vld [vmem:[%s3729_s1 + $0x8f] ss:$0 sm:$0xff] }
 0x1c8   : > { %v765_v50 = vadd.f32 %v764_v43, %v752_v14  ;;  %v1034_v15 = vadd.f32 %v1033_v31, %v1027_v53  ;;  %v1589_v42 = vmul.f32 %v2324_v23, %v1587_v33  ;;  %v1863_v0 = vmul.f32 %v2360_v11, %v1587_v33  ;;  %v1619_v57 = vpop.permute.xlu1 %1618 }
 0x1c9   : > { %v1998_v46 = vmul.f32 %v2324_v23, %v1619_v57  ;;  %v1621_v43 = vmul.f32 %v2327_v6, %v1619_v57  ;;  %v2081_v39 = vmul.f32 %v2360_v11, %v1619_v57  ;;  %v3648_v11 = vld [vmem:[%s3729_s1 + $0x8d] ss:$0 sm:$0xff] }
 0x1ca   : > { %v775_v24 = vadd.f32 %v774_v18, %v765_v50  ;;  %v1590_v2 = vadd.f32 %v1589_v42, %v1580_v16  ;;  %v1864_v8 = vadd.f32 %v1863_v0, %v1857_v59  ;;  %v1041_v12 = vadd.f32 %v1040_v21, %v1034_v15  ;;  %v3629_v16 = vld [vmem:[%s3729_s1 + $0x8c] ss:$0 sm:$0xff]  ;;  %v3654_v18 = vld [vmem:[%s3729_s1 + $0x47] ss:$0 sm:$0xff] }
 0x1cb   : > { %v1999_v54 = vadd.f32 %v1998_v46, %v1997_v7  ;;  %v794_v32 = vpop.permute.xlu0 %793  ;;  %v2082_v50 = vadd.f32 %v2081_v39, %v2080_v1 }
 0x1cc   : > { %v1602_v13 = vadd.f32 %v1601_v58, %v1590_v2  ;;  %v1871_v10 = vadd.f32 %v1870_v5, %v1864_v8  ;;  %v1163_v63 = vmul.f32 %v3530_v30, %v794_v32  ;;  %v1631_v17 = vpop.permute.xlu1 %1630  ;;  %v796_v7 = vmul.f32 %v3615_v41, %v794_v32 }
 0x1cd   : > { %v2000_v31 = vmul.f32 %v3552_v26, %v1631_v17  ;;  %v1054_v25 = vmul.f32 %v3621_v47, %v794_v32  ;;  %v785_v20 = vadd.f32 %v784_v27, %v775_v24  ;;  %v1048_v3 = vadd.f32 %v1047_v19, %v1041_v12  ;;  %v2328_v26 = vld [vmem:[%s3729_s1 + $0x69] ss:$0 sm:$0xff]  ;;  %v2365_v24 = vld [vmem:[%s3729_s1 + $0x8e] ss:$0 sm:$0xff]  ;;  %v3676_v12 = vld [vmem:[%s3729_s1 + $0x23] ss:$0 sm:$0xff] }
 0x1ce   : > { %v1612_v49 = vadd.f32 %v1611_v52, %v1602_v13  ;;  %v1878_v30 = vadd.f32 %v1877_v48, %v1871_v10  ;;  %v1164_v38 = vadd.f32 %v1163_v63, %v1162_v61  ;;  %v1884_v58 = vmul.f32 %v3629_v16, %v1619_v57 }
 0x1cf   : > { %v2001_v45 = vadd.f32 %v2000_v31, %v1999_v54  ;;  %v804_v37 = vpop.permute.xlu0 %803  ;;  %v1246_v14 = vmul.f32 %v3535_v40, %v794_v32  ;;  %v797_v59 = vadd.f32 %v796_v7, %v785_v20  ;;  %v1055_v34 = vadd.f32 %v1054_v25, %v1048_v3  ;;  %v2257_v40 = vld [vmem:[%s3729_s1 + $0x22] ss:$0 sm:$0xff] }
 0x1d0   : > { %v1061_v62 = vmul.f32 %v3635_v4, %v804_v37  ;;  %v1165_v51 = vmul.f32 %v3567_v60, %v804_v37  ;;  %v1641_v23 = vpop.permute.xlu1 %1640  ;;  %v1622_v5 = vadd.f32 %v1621_v43, %v1612_v49  ;;  %v1633_v60 = vmul.f32 %v2328_v26, %v1631_v17 }
 0x1d1   : > { %v2002_v53 = vmul.f32 %v2326_v28, %v1641_v23  ;;  %v1885_v33 = vadd.f32 %v1884_v58, %v1878_v30  ;;  %v2083_v15 = vmul.f32 %v3562_v29, %v1631_v17  ;;  %v1891_v0 = vmul.f32 %v3648_v11, %v1631_v17  ;;  %v2329_v29 = vld [vmem:[%s3729_s1 + $0x6a] ss:$0 sm:$0xff] }
 0x1d2   : > { %v1166_v61 = vadd.f32 %v1165_v51, %v1164_v38  ;;  %v1062_v46 = vadd.f32 %v1061_v62, %v1055_v34  ;;  %v1634_v48 = vadd.f32 %v1633_v60, %v1622_v5  ;;  %v1247_v2 = vadd.f32 %v1246_v14, %v1245_v22 }
 0x1d3   : > { %v814_v42 = vpop.permute.xlu0 %813  ;;  %v2003_v57 = vadd.f32 %v2002_v53, %v2001_v45  ;;  %v1248_v8 = vmul.f32 %v3584_v55, %v804_v37  ;;  %v2085_v27 = vmul.f32 %v3594_v36, %v1641_v23  ;;  %v806_v19 = vmul.f32 %v2257_v40, %v804_v37  ;;  %v2330_v55 = vld [vmem:[%s3729_s1 + $0x6b] ss:$0 sm:$0xff] }
 0x1d4   : > { %v1068_v28 = vmul.f32 %v3654_v18, %v814_v42  ;;  %v1167_v21 = vmul.f32 %v3599_v9, %v814_v42  ;;  %v1651_v52 = vpop.permute.xlu1 %1650  ;;  %v1892_v9 = vadd.f32 %v1891_v0, %v1885_v33  ;;  %v1643_v17 = vmul.f32 %v2329_v29, %v1641_v23 }
 0x1d5   : > { %v2004_v1 = vmul.f32 %v2327_v6, %v1651_v52  ;;  %v1905_v13 = vmul.f32 %v2366_v56, %v1651_v52  ;;  %v1898_v44 = vmul.f32 %v2365_v24, %v1641_v23  ;;  %v1250_v6 = vmul.f32 %v3606_v35, %v814_v42 }
 0x1d6   : > { %v1168_v54 = vadd.f32 %v1167_v21, %v1166_v61  ;;  %v1069_v32 = vadd.f32 %v1068_v28, %v1062_v46  ;;  %v807_v36 = vadd.f32 %v806_v19, %v797_v59  ;;  %v816_v7 = vmul.f32 %v3676_v12, %v814_v42 }
 0x1d7   : > { %v1172_v10 = vpop.permute.xlu0 %1171  ;;  %v2005_v63 = vadd.f32 %v2004_v1, %v2003_v57  ;;  %v1249_v49 = vadd.f32 %v1248_v8, %v1247_v2  ;;  %v1644_v38 = vadd.f32 %v1643_v17, %v1634_v48  ;;  %v1899_v25 = vadd.f32 %v1898_v44, %v1892_v9 }
 0x1d8   : > { %v1174_v43 = vmul.f32 %v3615_v41, %v1172_v10  ;;  %v2009_v31 = vpop.permute.xlu1 %2008  ;;  %1259 = vrot.lane.b32.xlu0 %v1069_v32, %s2499_s25  ;;  %v1252_v45 = vmul.f32 %v3621_v47, %v1172_v10  ;;  %v817_v37 = vadd.f32 %v816_v7, %v807_v36  ;;  %v1653_v20 = vmul.f32 %v2330_v55, %v1651_v52 }
 0x1d9   : > { %v2011_v30 = vmul.f32 %v2328_v26, %v2009_v31  ;;  %v2084_v3 = vadd.f32 %v2083_v15, %v2082_v50  ;;  %v2087_v35 = vmul.f32 %v3629_v16, %v1651_v52  ;;  %v1906_v62 = vadd.f32 %v1905_v13, %v1899_v25 }
 0x1da   : > { %v1175_v39 = vadd.f32 %v1174_v43, %v1168_v54  ;;  %v1251_v51 = vadd.f32 %v1250_v6, %v1249_v49  ;;  %v1654_v14 = vadd.f32 %v1653_v20, %v1644_v38  ;;  %v2089_v47 = vmul.f32 %v3648_v11, %v2009_v31 }
 0x1db   : > { %v2012_v41 = vadd.f32 %v2011_v30, %v2005_v63  ;;  %v1177_v58 = vpop.permute.xlu0 %1176  ;;  %v2086_v59 = vadd.f32 %v2085_v27, %v2084_v3 }
 0x1dc   : > { %v1179_v23 = vmul.f32 %v2257_v40, %v1177_v58  ;;  %v1254_v5 = vmul.f32 %v3635_v4, %v1177_v58  ;;  %v2014_v22 = vpop.permute.xlu1 %2013  ;;  %2096 = vrot.lane.b32.xlu0 %v1906_v62, %s2499_s25  ;;  %v1253_v53 = vadd.f32 %v1252_v45, %v1251_v51 }
 0x1dd   : > { %v2016_v26 = vmul.f32 %v2329_v29, %v2014_v22  ;;  %v2088_v60 = vadd.f32 %v2087_v35, %v2086_v59  ;;  %v2091_v50 = vmul.f32 %v2365_v24, %v2014_v22 }
 0x1de   : > { %v1180_v34 = vadd.f32 %v1179_v23, %v1175_v39  ;;  %v1255_v33 = vadd.f32 %v1254_v5, %v1253_v53 }
 0x1df   : > { %v2017_v61 = vadd.f32 %v2016_v26, %v2012_v41  ;;  %v1182_v16 = vpop.permute.xlu0 %1181  ;;  %v2090_v4 = vadd.f32 %v2089_v47, %v2088_v60 }
 0x1e0   : > { %v1256_v15 = vmul.f32 %v3654_v18, %v1182_v16  ;;  %v2019_v42 = vpop.permute.xlu1 %2018  ;;  %v1184_v46 = vmul.f32 %v3676_v12, %v1182_v16 }
 0x1e1   : > { %v2093_v57 = vmul.f32 %v2366_v56, %v2019_v42  ;;  %v2092_v40 = vadd.f32 %v2091_v50, %v2090_v4  ;;  %v2021_v48 = vmul.f32 %v2330_v55, %v2019_v42 }
 0x1e2   : > { %v1257_v0 = vadd.f32 %v1256_v15, %v1255_v33  ;;  %v1185_v56 = vadd.f32 %v1184_v46, %v1180_v34 }
 0x1e3   : > { %v2094_v28 = vadd.f32 %v2093_v57, %v2092_v40  ;;  %v2022_v2 = vadd.f32 %v2021_v48, %v2017_v61 }
 0x1e4   : > { %1263 = vrot.lane.b32.xlu1 %v1257_v0, %s2499_s25 }
 0x1e8   : > { %2100 = vrot.lane.b32.xlu1 %v2094_v28, %s2499_s25 }
 0x24a   : > { %v1260_v11 = vpop.permute.xlu0 %1259 }
 0x24b   : > { %v1267_v21 = vsel %vm1266_vm14, %v817_v37, %v1260_v11 }
 0x24c   : > { %1269 = vst [vmem:[%s146_s27] sm:$0xff] %v1267_v21 }
 0x24e   : > { %v2097_v52 = vpop.permute.xlu0 %2096 }
 0x24f   : > { %v2103_v18 = vsel %vm1266_vm14, %v1654_v14, %v2097_v52 }
 0x250   : > { %2367 = vst [vmem:[%s146_s27 + $0x10] sm:$0xff] %v2103_v18 }
 0x253   : > { %v2132_v9 = vld [vmem:[%s146_s27] sm:$0xff] (%p2561_p5) }
 0x254   : > { %2133 = vst [vmem:[%s2119_s4] sm:$0xff] (%p2561_p5), %v2132_v9 }
 0x256   : > { %v1264_v29 = vpop.permute.xlu1 %1263  ;;  %2114 = sbr.rel (!%p2561_p5) target bundleno = 613 (0x265), region = 32 }
 0x257   : > { %v1268_v24 = vsel %vm1266_vm14, %v1185_v56, %v1264_v29  ;;  %v2136_v27 = vld [vmem:[%s146_s27 + $0x10] sm:$0xff] (%p2561_p5) }
 0x258   : > { %1270 = vst [vmem:[%s146_s27 + $0x8] sm:$0xff] %v1268_v24  ;;  %2137 = vst [vmem:[%s2119_s4 + $0x20] sm:$0xff] (%p2561_p5), %v2136_v27 }
 0x25a   : > { %v2101_v8 = vpop.permute.xlu1 %2100 }
 0x25b   : > { %v2104_v1 = vsel %vm1266_vm14, %v2022_v2, %v2101_v8 }
 0x25c   : > { %2368 = vst [vmem:[%s146_s27 + $0x18] sm:$0xff] %v2104_v1 }
 0x25f   : > { %v2134_v12 = vld [vmem:[%s146_s27 + $0x8] sm:$0xff] }
 0x260   : > { %2135 = vst [vmem:[%s2119_s4 + $0x8] sm:$0xff] %v2134_v12 }
 0x263   : > { %v2138_v54 = vld [vmem:[%s146_s27 + $0x18] sm:$0xff] }
 0x264   : > { %2139 = vst [vmem:[%s2119_s4 + $0x28] sm:$0xff] %v2138_v54 }
 0x265 PF: > { %s12_s15 = sadd.s32 1, %s2492_s15   ;;  %s3732_s9 = smov %s2472_s10 }
 0x266   : > { %p9_p10 = scmp.ge.s32.totalorder %s12_s15, 6   ;;  %s3733_s10 = smov %s2572_s24 }
 0x267   : > { %s3734_s11 = smov %s2484_s13  ;;  %s3735_s12 = smov %s2488_s14 }
 0x268   : > { %s3736_s13 = smov %s3739_s16  ;;  %s3737_s14 = smov %s3743_s17 }
 0x269   :  { %11 = sbr.rel (!%p9_p10) target bundleno = 4 (0x4), region = 89 }

</bundles_post_ra>
